<compile_context>
chip_gen: v7x
topology: tpu7x:2x2x1
jax: 0.10.0
libtpu: 0.0.40
codegen_flags: <defaults>
</compile_context>

<pallas_src>
import jax
import jax.numpy as jnp
from jax.experimental import pallas as pl
from jax.experimental.pallas import tpu as pltpu

TILE_B = 1024   # batch rows per grid step (sweep 1024-4096; must be mult of 128)
LANES = 128     # lane width of the packed output rows (16 batch rows x 8 feats)


def model_kernel(x_ref, wc_ref, bc_ref, w1_ref, b1_ref, w2_ref, b2_ref,
                 w3s_ref, b3_ref, out_ref):
    # x_ref  : (TILE_B, 1)        f32  input scalar per batch row
    # wc_ref : (1, 64)            f32  conv-kernel center tap per out channel
    # bc_ref : (1, 64)            f32  conv bias
    # w1_ref : (64, 64)           f32  fc1 weight (in, out)
    # w2_ref : (64, 32)           f32  fc2 weight (in, out)
    # w3s_ref: (16, 32, 128)      f32  fc3 weight, copy j zero-padded into
    #                                  lanes [8j, 8j+8)
    # b3_ref : (1, 128)           f32  fc3 bias tiled 16x along lanes
    # out_ref: (TILE_B//16, 128)  f32  row r, lanes [8j, 8j+8) hold the 8
    #                                  outputs of local batch row j*TB16 + r
    npack = w3s_ref.shape[0]          # 16
    tb16 = out_ref.shape[0]           # TILE_B // 16

    # conv (only the center tap is live for a 1x1 input) + bias + tanh  (VPU)
    v2 = jnp.tanh(x_ref[...] * wc_ref[...] + bc_ref[...])          # (TILE_B, 64)
    # fc1 -> tanh
    v4 = jnp.tanh(jnp.dot(v2, w1_ref[...],
                          preferred_element_type=jnp.float32) + b1_ref[...])
    # fc2 -> tanh
    v5 = jnp.tanh(jnp.dot(v4, w2_ref[...],
                          preferred_element_type=jnp.float32) + b2_ref[...])
    # fc3, packed: batch chunk j lands in lane block j because w3s[j] is zero
    # outside lanes [8j, 8j+8).  Accumulating the 16 small matmuls builds the
    # lane-dense output tile directly (no in-kernel reshape required).
    acc = jnp.zeros(out_ref.shape, jnp.float32)
    for j in range(npack):
        chunk = v5[j * tb16:(j + 1) * tb16, :]                      # (tb16, 32)
        acc = acc + jnp.dot(chunk, w3s_ref[j],
                            preferred_element_type=jnp.float32)
    out_ref[...] = jnp.tanh(acc + b3_ref[...])


def init_params(key):
    """Deterministic parameters in PyTorch layouts."""
    ks = jax.random.split(key, 8)
    conv_w = jax.random.normal(ks[0], (64, 1, 3, 3), jnp.float32) * 0.1  # (Cout,Cin,KH,KW)
    conv_b = jax.random.normal(ks[1], (64,), jnp.float32) * 0.1
    fc1_w = jax.random.normal(ks[2], (64, 64), jnp.float32) * 0.1        # (out,in)
    fc1_b = jax.random.normal(ks[3], (64,), jnp.float32) * 0.1
    fc2_w = jax.random.normal(ks[4], (32, 64), jnp.float32) * 0.1
    fc2_b = jax.random.normal(ks[5], (32,), jnp.float32) * 0.1
    fc3_w = jax.random.normal(ks[6], (8, 32), jnp.float32) * 0.1
    fc3_b = jax.random.normal(ks[7], (8,), jnp.float32) * 0.1
    return conv_w, conv_b, fc1_w, fc1_b, fc2_w, fc2_b, fc3_w, fc3_b


def pack_params(params):
    """One-time re-layout of the PyTorch-layout params for the kernel."""
    conv_w, conv_b, fc1_w, fc1_b, fc2_w, fc2_b, fc3_w, fc3_b = params
    cout, cin, kh, kw = conv_w.shape
    assert cin == 1 and kh == 3 and kw == 3
    # With a 1x1 spatial input and padding=1 only the kernel center tap sees data.
    wc = conv_w[:, 0, kh // 2, kw // 2].reshape(1, cout).astype(jnp.float32)
    bc = conv_b.reshape(1, cout).astype(jnp.float32)
    w1 = fc1_w.T.astype(jnp.float32)                 # (64, 64)
    b1 = fc1_b.reshape(1, -1).astype(jnp.float32)
    w2 = fc2_w.T.astype(jnp.float32)                 # (64, 32)
    b2 = fc2_b.reshape(1, -1).astype(jnp.float32)
    n_out, k3 = fc3_w.shape                          # (8, 32)
    npack = LANES // n_out                           # 16
    # w3s[j, :, 8j:8j+8] = fc3_w.T, zero elsewhere -> MXU places batch chunk j
    # into lane block j of the packed output tile.
    w3s = jnp.zeros((npack, k3, LANES), jnp.float32)
    w3t = fc3_w.T.astype(jnp.float32)                # (32, 8)
    for j in range(npack):
        w3s = w3s.at[j, :, j * n_out:(j + 1) * n_out].set(w3t)
    b3 = jnp.tile(fc3_b.reshape(1, n_out).astype(jnp.float32), (1, npack))  # (1,128)
    return wc, bc, w1, b1, w2, b2, w3s, b3


def model_forward(x_nchw, packed_params, tile_b=TILE_B):
    wc, bc, w1, b1, w2, b2, w3s, b3 = packed_params
    B, Cin, H, W = x_nchw.shape
    assert Cin == 1 and H == 1 and W == 1, (
        "Model's Linear(64,64) after flatten(1) forces conv output C*H*W == 64")
    assert tile_b % LANES == 0                # so tile_b//16 is a multiple of 8
    npack = w3s.shape[0]                      # 16
    n_out = LANES // npack                    # 8
    tb16 = tile_b // npack

    x_flat = x_nchw.reshape(B, 1).astype(jnp.float32)   # only the center tap matters
    n_tiles = pl.cdiv(B, tile_b)
    b_pad = n_tiles * tile_b
    if b_pad != B:
        x_flat = jnp.pad(x_flat, ((0, b_pad - B), (0, 0)))

    def resident(shape):
        # weights/biases: constant index_map -> stay resident in VMEM across steps
        nd = len(shape)
        return pl.BlockSpec(shape, lambda i, nd=nd: (0,) * nd)

    out_packed = pl.pallas_call(
        model_kernel,
        out_shape=jax.ShapeDtypeStruct((b_pad // npack, LANES), jnp.float32),
        grid=(n_tiles,),
        in_specs=[
            pl.BlockSpec((tile_b, 1), lambda i: (i, 0)),   # batch-tiled input
            resident(wc.shape), resident(bc.shape),
            resident(w1.shape), resident(b1.shape),
            resident(w2.shape), resident(b2.shape),
            resident(w3s.shape), resident(b3.shape),
        ],
        out_specs=pl.BlockSpec((tb16, LANES), lambda i: (i, 0)),
        compiler_params=pltpu.CompilerParams(
            dimension_semantics=("parallel",),             # megacore on v7x
            vmem_limit_bytes=32 * 1024 * 1024),            # safe on v5e/v6e/v7x
    )(x_flat, wc, bc, w1, b1, w2, b2, w3s, b3)

    # Un-pack: packed row (t*tb16 + r), lanes [8j, 8j+8)  <->  batch row
    # t*tile_b + j*tb16 + r.  Cheap reshape/transpose on the tiny (B, 8) result.
    out = (out_packed.reshape(n_tiles, tb16, npack, n_out)
           .transpose(0, 2, 1, 3)
           .reshape(b_pad, n_out))
    return out[:B]


def reference_forward(x_nchw, params):
    """Plain-JAX f32 reference mirroring the PyTorch ops exactly."""
    conv_w, conv_b, fc1_w, fc1_b, fc2_w, fc2_b, fc3_w, fc3_b = params
    with jax.default_matmul_precision("highest"):
        v1 = jax.lax.conv_general_dilated(
            x_nchw, conv_w, window_strides=(1, 1), padding=((1, 1), (1, 1)),
            dimension_numbers=("NCHW", "OIHW", "NCHW"))
        v1 = v1 + conv_b[None, :, None, None]
        v2 = jnp.tanh(v1)
        v3 = v2.reshape(v2.shape[0], -1)                  # flatten(1)
        v4 = jnp.tanh(v3 @ fc1_w.T + fc1_b)
        v5 = jnp.tanh(v4 @ fc2_w.T + fc2_b)
        v6 = jnp.tanh(v5 @ fc3_w.T + fc3_b)
    return v6


if __name__ == "__main__":
    key = jax.random.PRNGKey(0)
    pkey, xkey = jax.random.split(key)
    params = init_params(pkey)
    packed = pack_params(params)              # one-time weight re-layout

    # Small input consistent with the forward pass (Linear(64,64) after
    # flatten(1) forces H = W = 1).  B = 2200 with TILE_B = 1024 exercises
    # 3 grid steps (incl. a padded tail tile), so the "parallel" batch axis
    # has >1 step for v7x's two TensorCores.
    B = 2200
    x1 = jax.random.normal(xkey, (B, 1, 1, 1), jnp.float32)

    fwd = jax.jit(model_forward)
    out = jax.block_until_ready(fwd(x1, packed))
    ref = jax.block_until_ready(reference_forward(x1, params))

    assert out.shape == (B, 8), out.shape
    # All-f32 kernel; tolerance only covers MXU multi-pass rounding differences.
    max_err = jnp.max(jnp.abs(out - ref))
    assert jnp.allclose(out, ref, atol=1e-2, rtol=1e-2), f"max abs err {max_err}"
    print("KERNEL_OK")
</pallas_src>

<mosaic_0001>
module attributes {stable_mosaic.version = 11 : i64} {
  func.func @model_kernel(%arg0: i32, %arg1: memref<1024x1xf32, #tpu.memory_space<vmem>>, %arg2: memref<1x64xf32, #tpu.memory_space<vmem>>, %arg3: memref<1x64xf32, #tpu.memory_space<vmem>>, %arg4: memref<64x64xf32, #tpu.memory_space<vmem>>, %arg5: memref<1x64xf32, #tpu.memory_space<vmem>>, %arg6: memref<64x32xf32, #tpu.memory_space<vmem>>, %arg7: memref<1x32xf32, #tpu.memory_space<vmem>>, %arg8: memref<16x32x128xf32, #tpu.memory_space<vmem>>, %arg9: memref<1x128xf32, #tpu.memory_space<vmem>>, %arg10: memref<64x128xf32, #tpu.memory_space<vmem>>) attributes {dimension_semantics = [#tpu.dimension_semantics<parallel>], iteration_bounds = array<i64: 3>, scalar_prefetch = 0 : i64, scratch_operands = 0 : i64, tpu.core_type = #tpu.core_type<tc>, window_params = [{transform_indices = @transform_0, window_bounds = array<i64: 1024, 1>}, {pipeline_mode = #tpu.pipeline_mode<synchronous>, transform_indices = @transform_1, window_bounds = array<i64: 1, 64>}, {pipeline_mode = #tpu.pipeline_mode<synchronous>, transform_indices = @transform_2, window_bounds = array<i64: 1, 64>}, {pipeline_mode = #tpu.pipeline_mode<synchronous>, transform_indices = @transform_3, window_bounds = array<i64: 64, 64>}, {pipeline_mode = #tpu.pipeline_mode<synchronous>, transform_indices = @transform_4, window_bounds = array<i64: 1, 64>}, {pipeline_mode = #tpu.pipeline_mode<synchronous>, transform_indices = @transform_5, window_bounds = array<i64: 64, 32>}, {pipeline_mode = #tpu.pipeline_mode<synchronous>, transform_indices = @transform_6, window_bounds = array<i64: 1, 32>}, {pipeline_mode = #tpu.pipeline_mode<synchronous>, transform_indices = @transform_7, window_bounds = array<i64: 16, 32, 128>}, {pipeline_mode = #tpu.pipeline_mode<synchronous>, transform_indices = @transform_8, window_bounds = array<i64: 1, 128>}, {transform_indices = @transform_9, window_bounds = array<i64: 64, 128>}]} {
    %c0 = arith.constant 0 : index
    %c0_0 = arith.constant 0 : index
    %0 = vector.load %arg1[%c0, %c0_0] : memref<1024x1xf32, #tpu.memory_space<vmem>>, vector<1024x1xf32>
    %c0_1 = arith.constant 0 : index
    %c0_2 = arith.constant 0 : index
    %1 = vector.load %arg2[%c0_1, %c0_2] : memref<1x64xf32, #tpu.memory_space<vmem>>, vector<1x64xf32>
    %2 = vector.broadcast %0 : vector<1024x1xf32> to vector<1024x64xf32>
    %3 = vector.broadcast %1 : vector<1x64xf32> to vector<1024x64xf32>
    %4 = arith.mulf %2, %3 : vector<1024x64xf32>
    %c0_3 = arith.constant 0 : index
    %c0_4 = arith.constant 0 : index
    %5 = vector.load %arg3[%c0_3, %c0_4] : memref<1x64xf32, #tpu.memory_space<vmem>>, vector<1x64xf32>
    %6 = vector.broadcast %5 : vector<1x64xf32> to vector<1024x64xf32>
    %7 = arith.addf %4, %6 : vector<1024x64xf32>
    %8 = math.tanh %7 : vector<1024x64xf32>
    %c0_5 = arith.constant 0 : index
    %c0_6 = arith.constant 0 : index
    %9 = vector.load %arg4[%c0_5, %c0_6] : memref<64x64xf32, #tpu.memory_space<vmem>>, vector<64x64xf32>
    %cst = arith.constant dense<0.000000e+00> : vector<1024x64xf32>
    %10 = tpu.matmul %8, %9, %cst {dimension_numbers = #tpu.dot_dimension_numbers<[1], [0], [0], [1], [0, 0, 1, 1], [], []>} : vector<1024x64xf32>, vector<64x64xf32>, vector<1024x64xf32> -> vector<1024x64xf32>
    %c0_7 = arith.constant 0 : index
    %c0_8 = arith.constant 0 : index
    %11 = vector.load %arg5[%c0_7, %c0_8] : memref<1x64xf32, #tpu.memory_space<vmem>>, vector<1x64xf32>
    %12 = vector.broadcast %11 : vector<1x64xf32> to vector<1024x64xf32>
    %13 = arith.addf %10, %12 : vector<1024x64xf32>
    %14 = math.tanh %13 : vector<1024x64xf32>
    %c0_9 = arith.constant 0 : index
    %c0_10 = arith.constant 0 : index
    %15 = vector.load %arg6[%c0_9, %c0_10] : memref<64x32xf32, #tpu.memory_space<vmem>>, vector<64x32xf32>
    %cst_11 = arith.constant dense<0.000000e+00> : vector<1024x32xf32>
    %16 = tpu.matmul %14, %15, %cst_11 {dimension_numbers = #tpu.dot_dimension_numbers<[1], [0], [0], [1], [0, 0, 1, 1], [], []>} : vector<1024x64xf32>, vector<64x32xf32>, vector<1024x32xf32> -> vector<1024x32xf32>
    %c0_12 = arith.constant 0 : index
    %c0_13 = arith.constant 0 : index
    %17 = vector.load %arg7[%c0_12, %c0_13] : memref<1x32xf32, #tpu.memory_space<vmem>>, vector<1x32xf32>
    %18 = vector.broadcast %17 : vector<1x32xf32> to vector<1024x32xf32>
    %19 = arith.addf %16, %18 : vector<1024x32xf32>
    %20 = math.tanh %19 : vector<1024x32xf32>
    %cst_14 = arith.constant 0.000000e+00 : f32
    %21 = vector.broadcast %cst_14 : f32 to vector<64x128xf32>
    %22 = vector.extract_strided_slice %20 {offsets = [0, 0], sizes = [64, 32], strides = [1, 1]} : vector<1024x32xf32> to vector<64x32xf32>
    %c0_15 = arith.constant 0 : index
    %c0_16 = arith.constant 0 : index
    %c0_17 = arith.constant 0 : index
    %23 = vector.load %arg8[%c0_15, %c0_16, %c0_17] : memref<16x32x128xf32, #tpu.memory_space<vmem>>, vector<1x32x128xf32>
    %24 = vector.shape_cast %23 : vector<1x32x128xf32> to vector<32x128xf32>
    %cst_18 = arith.constant dense<0.000000e+00> : vector<64x128xf32>
    %25 = tpu.matmul %22, %24, %cst_18 {dimension_numbers = #tpu.dot_dimension_numbers<[1], [0], [0], [1], [0, 0, 1, 1], [], []>} : vector<64x32xf32>, vector<32x128xf32>, vector<64x128xf32> -> vector<64x128xf32>
    %26 = arith.addf %21, %25 : vector<64x128xf32>
    %27 = vector.extract_strided_slice %20 {offsets = [64, 0], sizes = [64, 32], strides = [1, 1]} : vector<1024x32xf32> to vector<64x32xf32>
    %c1 = arith.constant 1 : index
    %c0_19 = arith.constant 0 : index
    %c0_20 = arith.constant 0 : index
    %28 = vector.load %arg8[%c1, %c0_19, %c0_20] : memref<16x32x128xf32, #tpu.memory_space<vmem>>, vector<1x32x128xf32>
    %29 = vector.shape_cast %28 : vector<1x32x128xf32> to vector<32x128xf32>
    %cst_21 = arith.constant dense<0.000000e+00> : vector<64x128xf32>
    %30 = tpu.matmul %27, %29, %cst_21 {dimension_numbers = #tpu.dot_dimension_numbers<[1], [0], [0], [1], [0, 0, 1, 1], [], []>} : vector<64x32xf32>, vector<32x128xf32>, vector<64x128xf32> -> vector<64x128xf32>
    %31 = arith.addf %26, %30 : vector<64x128xf32>
    %32 = vector.extract_strided_slice %20 {offsets = [128, 0], sizes = [64, 32], strides = [1, 1]} : vector<1024x32xf32> to vector<64x32xf32>
    %c2 = arith.constant 2 : index
    %c0_22 = arith.constant 0 : index
    %c0_23 = arith.constant 0 : index
    %33 = vector.load %arg8[%c2, %c0_22, %c0_23] : memref<16x32x128xf32, #tpu.memory_space<vmem>>, vector<1x32x128xf32>
    %34 = vector.shape_cast %33 : vector<1x32x128xf32> to vector<32x128xf32>
    %cst_24 = arith.constant dense<0.000000e+00> : vector<64x128xf32>
    %35 = tpu.matmul %32, %34, %cst_24 {dimension_numbers = #tpu.dot_dimension_numbers<[1], [0], [0], [1], [0, 0, 1, 1], [], []>} : vector<64x32xf32>, vector<32x128xf32>, vector<64x128xf32> -> vector<64x128xf32>
    %36 = arith.addf %31, %35 : vector<64x128xf32>
    %37 = vector.extract_strided_slice %20 {offsets = [192, 0], sizes = [64, 32], strides = [1, 1]} : vector<1024x32xf32> to vector<64x32xf32>
    %c3 = arith.constant 3 : index
    %c0_25 = arith.constant 0 : index
    %c0_26 = arith.constant 0 : index
    %38 = vector.load %arg8[%c3, %c0_25, %c0_26] : memref<16x32x128xf32, #tpu.memory_space<vmem>>, vector<1x32x128xf32>
    %39 = vector.shape_cast %38 : vector<1x32x128xf32> to vector<32x128xf32>
    %cst_27 = arith.constant dense<0.000000e+00> : vector<64x128xf32>
    %40 = tpu.matmul %37, %39, %cst_27 {dimension_numbers = #tpu.dot_dimension_numbers<[1], [0], [0], [1], [0, 0, 1, 1], [], []>} : vector<64x32xf32>, vector<32x128xf32>, vector<64x128xf32> -> vector<64x128xf32>
    %41 = arith.addf %36, %40 : vector<64x128xf32>
    %42 = vector.extract_strided_slice %20 {offsets = [256, 0], sizes = [64, 32], strides = [1, 1]} : vector<1024x32xf32> to vector<64x32xf32>
    %c4 = arith.constant 4 : index
    %c0_28 = arith.constant 0 : index
    %c0_29 = arith.constant 0 : index
    %43 = vector.load %arg8[%c4, %c0_28, %c0_29] : memref<16x32x128xf32, #tpu.memory_space<vmem>>, vector<1x32x128xf32>
    %44 = vector.shape_cast %43 : vector<1x32x128xf32> to vector<32x128xf32>
    %cst_30 = arith.constant dense<0.000000e+00> : vector<64x128xf32>
    %45 = tpu.matmul %42, %44, %cst_30 {dimension_numbers = #tpu.dot_dimension_numbers<[1], [0], [0], [1], [0, 0, 1, 1], [], []>} : vector<64x32xf32>, vector<32x128xf32>, vector<64x128xf32> -> vector<64x128xf32>
    %46 = arith.addf %41, %45 : vector<64x128xf32>
    %47 = vector.extract_strided_slice %20 {offsets = [320, 0], sizes = [64, 32], strides = [1, 1]} : vector<1024x32xf32> to vector<64x32xf32>
    %c5 = arith.constant 5 : index
    %c0_31 = arith.constant 0 : index
    %c0_32 = arith.constant 0 : index
    %48 = vector.load %arg8[%c5, %c0_31, %c0_32] : memref<16x32x128xf32, #tpu.memory_space<vmem>>, vector<1x32x128xf32>
    %49 = vector.shape_cast %48 : vector<1x32x128xf32> to vector<32x128xf32>
    %cst_33 = arith.constant dense<0.000000e+00> : vector<64x128xf32>
    %50 = tpu.matmul %47, %49, %cst_33 {dimension_numbers = #tpu.dot_dimension_numbers<[1], [0], [0], [1], [0, 0, 1, 1], [], []>} : vector<64x32xf32>, vector<32x128xf32>, vector<64x128xf32> -> vector<64x128xf32>
    %51 = arith.addf %46, %50 : vector<64x128xf32>
    %52 = vector.extract_strided_slice %20 {offsets = [384, 0], sizes = [64, 32], strides = [1, 1]} : vector<1024x32xf32> to vector<64x32xf32>
    %c6 = arith.constant 6 : index
    %c0_34 = arith.constant 0 : index
    %c0_35 = arith.constant 0 : index
    %53 = vector.load %arg8[%c6, %c0_34, %c0_35] : memref<16x32x128xf32, #tpu.memory_space<vmem>>, vector<1x32x128xf32>
    %54 = vector.shape_cast %53 : vector<1x32x128xf32> to vector<32x128xf32>
    %cst_36 = arith.constant dense<0.000000e+00> : vector<64x128xf32>
    %55 = tpu.matmul %52, %54, %cst_36 {dimension_numbers = #tpu.dot_dimension_numbers<[1], [0], [0], [1], [0, 0, 1, 1], [], []>} : vector<64x32xf32>, vector<32x128xf32>, vector<64x128xf32> -> vector<64x128xf32>
    %56 = arith.addf %51, %55 : vector<64x128xf32>
    %57 = vector.extract_strided_slice %20 {offsets = [448, 0], sizes = [64, 32], strides = [1, 1]} : vector<1024x32xf32> to vector<64x32xf32>
    %c7 = arith.constant 7 : index
    %c0_37 = arith.constant 0 : index
    %c0_38 = arith.constant 0 : index
    %58 = vector.load %arg8[%c7, %c0_37, %c0_38] : memref<16x32x128xf32, #tpu.memory_space<vmem>>, vector<1x32x128xf32>
    %59 = vector.shape_cast %58 : vector<1x32x128xf32> to vector<32x128xf32>
    %cst_39 = arith.constant dense<0.000000e+00> : vector<64x128xf32>
    %60 = tpu.matmul %57, %59, %cst_39 {dimension_numbers = #tpu.dot_dimension_numbers<[1], [0], [0], [1], [0, 0, 1, 1], [], []>} : vector<64x32xf32>, vector<32x128xf32>, vector<64x128xf32> -> vector<64x128xf32>
    %61 = arith.addf %56, %60 : vector<64x128xf32>
    %62 = vector.extract_strided_slice %20 {offsets = [512, 0], sizes = [64, 32], strides = [1, 1]} : vector<1024x32xf32> to vector<64x32xf32>
    %c8 = arith.constant 8 : index
    %c0_40 = arith.constant 0 : index
    %c0_41 = arith.constant 0 : index
    %63 = vector.load %arg8[%c8, %c0_40, %c0_41] : memref<16x32x128xf32, #tpu.memory_space<vmem>>, vector<1x32x128xf32>
    %64 = vector.shape_cast %63 : vector<1x32x128xf32> to vector<32x128xf32>
    %cst_42 = arith.constant dense<0.000000e+00> : vector<64x128xf32>
    %65 = tpu.matmul %62, %64, %cst_42 {dimension_numbers = #tpu.dot_dimension_numbers<[1], [0], [0], [1], [0, 0, 1, 1], [], []>} : vector<64x32xf32>, vector<32x128xf32>, vector<64x128xf32> -> vector<64x128xf32>
    %66 = arith.addf %61, %65 : vector<64x128xf32>
    %67 = vector.extract_strided_slice %20 {offsets = [576, 0], sizes = [64, 32], strides = [1, 1]} : vector<1024x32xf32> to vector<64x32xf32>
    %c9 = arith.constant 9 : index
    %c0_43 = arith.constant 0 : index
    %c0_44 = arith.constant 0 : index
    %68 = vector.load %arg8[%c9, %c0_43, %c0_44] : memref<16x32x128xf32, #tpu.memory_space<vmem>>, vector<1x32x128xf32>
    %69 = vector.shape_cast %68 : vector<1x32x128xf32> to vector<32x128xf32>
    %cst_45 = arith.constant dense<0.000000e+00> : vector<64x128xf32>
    %70 = tpu.matmul %67, %69, %cst_45 {dimension_numbers = #tpu.dot_dimension_numbers<[1], [0], [0], [1], [0, 0, 1, 1], [], []>} : vector<64x32xf32>, vector<32x128xf32>, vector<64x128xf32> -> vector<64x128xf32>
    %71 = arith.addf %66, %70 : vector<64x128xf32>
    %72 = vector.extract_strided_slice %20 {offsets = [640, 0], sizes = [64, 32], strides = [1, 1]} : vector<1024x32xf32> to vector<64x32xf32>
    %c10 = arith.constant 10 : index
    %c0_46 = arith.constant 0 : index
    %c0_47 = arith.constant 0 : index
    %73 = vector.load %arg8[%c10, %c0_46, %c0_47] : memref<16x32x128xf32, #tpu.memory_space<vmem>>, vector<1x32x128xf32>
    %74 = vector.shape_cast %73 : vector<1x32x128xf32> to vector<32x128xf32>
    %cst_48 = arith.constant dense<0.000000e+00> : vector<64x128xf32>
    %75 = tpu.matmul %72, %74, %cst_48 {dimension_numbers = #tpu.dot_dimension_numbers<[1], [0], [0], [1], [0, 0, 1, 1], [], []>} : vector<64x32xf32>, vector<32x128xf32>, vector<64x128xf32> -> vector<64x128xf32>
    %76 = arith.addf %71, %75 : vector<64x128xf32>
    %77 = vector.extract_strided_slice %20 {offsets = [704, 0], sizes = [64, 32], strides = [1, 1]} : vector<1024x32xf32> to vector<64x32xf32>
    %c11 = arith.constant 11 : index
    %c0_49 = arith.constant 0 : index
    %c0_50 = arith.constant 0 : index
    %78 = vector.load %arg8[%c11, %c0_49, %c0_50] : memref<16x32x128xf32, #tpu.memory_space<vmem>>, vector<1x32x128xf32>
    %79 = vector.shape_cast %78 : vector<1x32x128xf32> to vector<32x128xf32>
    %cst_51 = arith.constant dense<0.000000e+00> : vector<64x128xf32>
    %80 = tpu.matmul %77, %79, %cst_51 {dimension_numbers = #tpu.dot_dimension_numbers<[1], [0], [0], [1], [0, 0, 1, 1], [], []>} : vector<64x32xf32>, vector<32x128xf32>, vector<64x128xf32> -> vector<64x128xf32>
    %81 = arith.addf %76, %80 : vector<64x128xf32>
    %82 = vector.extract_strided_slice %20 {offsets = [768, 0], sizes = [64, 32], strides = [1, 1]} : vector<1024x32xf32> to vector<64x32xf32>
    %c12 = arith.constant 12 : index
    %c0_52 = arith.constant 0 : index
    %c0_53 = arith.constant 0 : index
    %83 = vector.load %arg8[%c12, %c0_52, %c0_53] : memref<16x32x128xf32, #tpu.memory_space<vmem>>, vector<1x32x128xf32>
    %84 = vector.shape_cast %83 : vector<1x32x128xf32> to vector<32x128xf32>
    %cst_54 = arith.constant dense<0.000000e+00> : vector<64x128xf32>
    %85 = tpu.matmul %82, %84, %cst_54 {dimension_numbers = #tpu.dot_dimension_numbers<[1], [0], [0], [1], [0, 0, 1, 1], [], []>} : vector<64x32xf32>, vector<32x128xf32>, vector<64x128xf32> -> vector<64x128xf32>
    %86 = arith.addf %81, %85 : vector<64x128xf32>
    %87 = vector.extract_strided_slice %20 {offsets = [832, 0], sizes = [64, 32], strides = [1, 1]} : vector<1024x32xf32> to vector<64x32xf32>
    %c13 = arith.constant 13 : index
    %c0_55 = arith.constant 0 : index
    %c0_56 = arith.constant 0 : index
    %88 = vector.load %arg8[%c13, %c0_55, %c0_56] : memref<16x32x128xf32, #tpu.memory_space<vmem>>, vector<1x32x128xf32>
    %89 = vector.shape_cast %88 : vector<1x32x128xf32> to vector<32x128xf32>
    %cst_57 = arith.constant dense<0.000000e+00> : vector<64x128xf32>
    %90 = tpu.matmul %87, %89, %cst_57 {dimension_numbers = #tpu.dot_dimension_numbers<[1], [0], [0], [1], [0, 0, 1, 1], [], []>} : vector<64x32xf32>, vector<32x128xf32>, vector<64x128xf32> -> vector<64x128xf32>
    %91 = arith.addf %86, %90 : vector<64x128xf32>
    %92 = vector.extract_strided_slice %20 {offsets = [896, 0], sizes = [64, 32], strides = [1, 1]} : vector<1024x32xf32> to vector<64x32xf32>
    %c14 = arith.constant 14 : index
    %c0_58 = arith.constant 0 : index
    %c0_59 = arith.constant 0 : index
    %93 = vector.load %arg8[%c14, %c0_58, %c0_59] : memref<16x32x128xf32, #tpu.memory_space<vmem>>, vector<1x32x128xf32>
    %94 = vector.shape_cast %93 : vector<1x32x128xf32> to vector<32x128xf32>
    %cst_60 = arith.constant dense<0.000000e+00> : vector<64x128xf32>
    %95 = tpu.matmul %92, %94, %cst_60 {dimension_numbers = #tpu.dot_dimension_numbers<[1], [0], [0], [1], [0, 0, 1, 1], [], []>} : vector<64x32xf32>, vector<32x128xf32>, vector<64x128xf32> -> vector<64x128xf32>
    %96 = arith.addf %91, %95 : vector<64x128xf32>
    %97 = vector.extract_strided_slice %20 {offsets = [960, 0], sizes = [64, 32], strides = [1, 1]} : vector<1024x32xf32> to vector<64x32xf32>
    %c15 = arith.constant 15 : index
    %c0_61 = arith.constant 0 : index
    %c0_62 = arith.constant 0 : index
    %98 = vector.load %arg8[%c15, %c0_61, %c0_62] : memref<16x32x128xf32, #tpu.memory_space<vmem>>, vector<1x32x128xf32>
    %99 = vector.shape_cast %98 : vector<1x32x128xf32> to vector<32x128xf32>
    %cst_63 = arith.constant dense<0.000000e+00> : vector<64x128xf32>
    %100 = tpu.matmul %97, %99, %cst_63 {dimension_numbers = #tpu.dot_dimension_numbers<[1], [0], [0], [1], [0, 0, 1, 1], [], []>} : vector<64x32xf32>, vector<32x128xf32>, vector<64x128xf32> -> vector<64x128xf32>
    %101 = arith.addf %96, %100 : vector<64x128xf32>
    %c0_64 = arith.constant 0 : index
    %c0_65 = arith.constant 0 : index
    %102 = vector.load %arg9[%c0_64, %c0_65] : memref<1x128xf32, #tpu.memory_space<vmem>>, vector<1x128xf32>
    %103 = vector.broadcast %102 : vector<1x128xf32> to vector<64x128xf32>
    %104 = arith.addf %101, %103 : vector<64x128xf32>
    %105 = math.tanh %104 : vector<64x128xf32>
    %c0_66 = arith.constant 0 : index
    %c0_67 = arith.constant 0 : index
    %106 = vector.load %arg10[%c0_66, %c0_67] : memref<64x128xf32, #tpu.memory_space<vmem>>, vector<64x128xf32>
    tpu.vector_store %arg10[%c0_66, %c0_67], %105 {strides = array<i32>} : memref<64x128xf32, #tpu.memory_space<vmem>>, vector<64x128xf32>,
    return
  }
  func.func @transform_0(%arg0: i32) -> (i32, i32) {
    %c0_i32 = arith.constant 0 : i32
    %c0_i32_0 = arith.constant 0 : i32
    return %arg0, %c0_i32 : i32, i32
  }
  func.func @transform_1(%arg0: i32) -> (i32, i32) {
    %c0_i32 = arith.constant 0 : i32
    %c0_i32_0 = arith.constant 0 : i32
    %c0_i32_1 = arith.constant 0 : i32
    return %c0_i32, %c0_i32_0 : i32, i32
  }
  func.func @transform_2(%arg0: i32) -> (i32, i32) {
    %c0_i32 = arith.constant 0 : i32
    %c0_i32_0 = arith.constant 0 : i32
    %c0_i32_1 = arith.constant 0 : i32
    return %c0_i32, %c0_i32_0 : i32, i32
  }
  func.func @transform_3(%arg0: i32) -> (i32, i32) {
    %c0_i32 = arith.constant 0 : i32
    %c0_i32_0 = arith.constant 0 : i32
    %c0_i32_1 = arith.constant 0 : i32
    return %c0_i32, %c0_i32_0 : i32, i32
  }
  func.func @transform_4(%arg0: i32) -> (i32, i32) {
    %c0_i32 = arith.constant 0 : i32
    %c0_i32_0 = arith.constant 0 : i32
    %c0_i32_1 = arith.constant 0 : i32
    return %c0_i32, %c0_i32_0 : i32, i32
  }
  func.func @transform_5(%arg0: i32) -> (i32, i32) {
    %c0_i32 = arith.constant 0 : i32
    %c0_i32_0 = arith.constant 0 : i32
    %c0_i32_1 = arith.constant 0 : i32
    return %c0_i32, %c0_i32_0 : i32, i32
  }
  func.func @transform_6(%arg0: i32) -> (i32, i32) {
    %c0_i32 = arith.constant 0 : i32
    %c0_i32_0 = arith.constant 0 : i32
    %c0_i32_1 = arith.constant 0 : i32
    return %c0_i32, %c0_i32_0 : i32, i32
  }
  func.func @transform_7(%arg0: i32) -> (i32, i32, i32) {
    %c0_i32 = arith.constant 0 : i32
    %c0_i32_0 = arith.constant 0 : i32
    %c0_i32_1 = arith.constant 0 : i32
    %c0_i32_2 = arith.constant 0 : i32
    return %c0_i32, %c0_i32_0, %c0_i32_1 : i32, i32, i32
  }
  func.func @transform_8(%arg0: i32) -> (i32, i32) {
    %c0_i32 = arith.constant 0 : i32
    %c0_i32_0 = arith.constant 0 : i32
    %c0_i32_1 = arith.constant 0 : i32
    return %c0_i32, %c0_i32_0 : i32, i32
  }
  func.func @transform_9(%arg0: i32) -> (i32, i32) {
    %c0_i32 = arith.constant 0 : i32
    %c0_i32_0 = arith.constant 0 : i32
    return %arg0, %c0_i32 : i32, i32
  }
}

</mosaic_0001>

<bundles_post_ra>
// kernel: model_forward.1
= control target key start
LH: loop header
LB: loop body
LE: loop exit
PB: predicated region body
PF: predicated region fallthrough
CT: control target
= control target key end

     0   :  { %s9116_s30 = smov 0   ;;  %s10791_s0 = inlined_call_operand.vmem [shape: f32[3072,1], index: 0, kind: input, shape index: {}]   ;;  %s10792_s1 = inlined_call_operand.vmem [shape: f32[1,64], index: 1, kind: input, shape index: {}]   ;;  %s10793_s2 = inlined_call_operand.vmem [shape: f32[1,64], index: 2, kind: input, shape index: {}]   ;;  %s10794_s3 = inlined_call_operand.vmem [shape: f32[64,64], index: 3, kind: input, shape index: {}]   ;;  %s10795_s4 = inlined_call_operand.vmem [shape: f32[1,64], index: 4, kind: input, shape index: {}]   ;;  %s10796_s5 = inlined_call_operand.vmem [shape: f32[64,32], index: 5, kind: input, shape index: {}]   ;;  %s10797_s6 = inlined_call_operand.vmem [shape: f32[1,32], index: 6, kind: input, shape index: {}]   ;;  %s10798_s7 = inlined_call_operand.vmem [shape: f32[16,32,128], index: 7, kind: input, shape index: {}]   ;;  %s10799_s8 = inlined_call_operand.vmem [shape: f32[1,128], index: 8, kind: input, shape index: {}]   ;;  %s10800_s9 = inlined_call_operand.vmem [shape: f32[192,128], index: 9, kind: output, shape index: {}]  }
   0x1 LB: > { %s6310_s10 = sadd.s32 4294967295, %s9063_s30   ;;  %p6314_p0 = scmp.ge.s32.totalorder %s9063_s30, 1  ;;  %s9063_s30 = sphi %s9116_s30, %s19_s30  }
   0x2   : > { %p288_p1 = scmp.lt.s32.totalorder %s9063_s30, 4 }
   0x4   : > { %p289_p2 = pnand %p6314_p0, %p288_p1 }
   0x5   : > { %s6315_s11 = sshll.u32 (!%p289_p2), %s6310_s10, 7  ;;  %v9065_v0 = vmov (!%p289_p2), 0   ;;  %v1502_v15 = vld [vmem:[%s10794_s3] sm:$0xff] (!%p289_p2)  ;;  %v1503_v16 = vld [vmem:[%s10794_s3 + $0x8] sm:$0xff] (!%p289_p2)  ;;  %v1504_v18 = vld [vmem:[%s10794_s3 + $0x10] sm:$0xff] (!%p289_p2)  ;;  %vm1517_vm0 = vcmask (!%p289_p2), 523264  }
   0x6   : > { %292 = sbr.rel (%p289_p2) target bundleno = 1140 (0x474), region = 56  ;;  %8268 = vset.pattern.permute.xlu1 (!%p289_p2), %v9065_v0  ;;  %8267 = vset.pattern.permute.xlu0 (!%p289_p2), %v9065_v0  ;;  %p325_p3 = scmp.lt.s32.totalorder (!%p289_p2), %s6315_s11, 383  ;;  %v7970_v17 = vpack.c.bf16 (!%p289_p2), %v1503_v16, %v1502_v15  ;;  %v1505_v19 = vld [vmem:[%s10794_s3 + $0x18] sm:$0xff] (!%p289_p2)  ;;  %v1506_v21 = vld [vmem:[%s10794_s3 + $0x20] sm:$0xff] (!%p289_p2)  ;;  %v1507_v22 = vld [vmem:[%s10794_s3 + $0x28] sm:$0xff] (!%p289_p2)  ;;  %vm3976_vm1 = vcmask (!%p289_p2), 261120  }
   0x7   : > { %v7974_v20 = vpack.c.bf16 (!%p289_p2), %v1505_v19, %v1504_v18  ;;  %v7978_v25 = vpack.c.bf16 (!%p289_p2), %v1507_v22, %v1506_v21  ;;  %v1508_v26 = vld [vmem:[%s10794_s3 + $0x30] sm:$0xff] (!%p289_p2)  ;;  %v1509_v27 = vld [vmem:[%s10794_s3 + $0x38] sm:$0xff] (!%p289_p2)  ;;  %v9229_v16 = vld [vmem:[%s10793_s2] ss:$0 sm:$0xff] (!%p289_p2)  ;;  %s6317_s22 = sshll.u32 (!%p289_p2), %s6310_s10, 3 }
   0x8   : > { %7971 = vmatprep.subr.bf16.mxu0 (!%p289_p2), %v7970_v17  ;;  %8130 = vmatprep.subr.bf16.mxu1 (!%p289_p2), %v7970_v17  ;;  %v7982_v30 = vpack.c.bf16 (!%p289_p2), %v1509_v27, %v1508_v26  ;;  %p331_p4 = scmp.lt.s32.totalorder (!%p289_p2), %s6317_s22, 23 }
   0x9   : > { %7973 = vmatpush3.bf16.msra.mxu0 (!%p289_p2), %v7970_v17  ;;  %8134 = vmatpush3.bf16.msra.mxu1 (!%p289_p2), %v7970_v17 }
   0xa   : > { %7975 = vmatprep.subr.bf16.mxu0 (!%p289_p2), %v7974_v20  ;;  %8131 = vmatprep.subr.bf16.mxu1 (!%p289_p2), %v7974_v20 }
   0xd   : > { %s10802_s11 = smov (!%p325_p3, %s6315_s11), 383  ;;  %7977 = vmatpush3.bf16.msra.mxu0 %v7974_v20  ;;  %8135 = vmatpush3.bf16.msra.mxu1 %v7974_v20  ;;  %s10804_s22 = smov (!%p331_p4, %s6317_s22), 23 }
   0xe   : > { %s6316_s12 = sshll.u32 %s10802_s11, 3  ;;  %7979 = vmatprep.subr.bf16.mxu0 %v7978_v25  ;;  %8132 = vmatprep.subr.bf16.mxu1 %v7978_v25  ;;  %s6318_s25 = sshll.u32 %s10804_s22, 3 }
   0xf   : > { %s9129_s15 = scalar_lea.vmem %s10791_s0, %s6316_s12  ;;  %s334_s27 = scalar_lea.vmem %s10800_s9, %s6318_s25 }
  0x10   : > { %v338_v1 = vld [vmem:[%s9129_s15 + $0x10] sm:$0xff]  ;;  %v336_v2 = vld [vmem:[%s9129_s15] sm:$0xff]  ;;  %v339_v3 = vld [vmem:[%s9129_s15 + $0x18] sm:$0xff] }
  0x11   : > { %477 = vperm.xlu1 %8268, %v338_v1   ;;  %467 = vperm.xlu0 %8267, %v336_v2   ;;  %v337_v4 = vld [vmem:[%s9129_s15 + $0x8] sm:$0xff]  ;;  %v340_v6 = vld [vmem:[%s9129_s15 + $0x20] sm:$0xff]  ;;  %v343_v7 = vld [vmem:[%s9129_s15 + $0x38] sm:$0xff] }
  0x12   : > { %v341_v5 = vld [vmem:[%s9129_s15 + $0x28] sm:$0xff]  ;;  %v342_v8 = vld [vmem:[%s9129_s15 + $0x30] sm:$0xff]  ;;  %v344_v10 = vld [vmem:[%s9129_s15 + $0x40] sm:$0xff]  ;;  %7981 = vmatpush3.bf16.msra.mxu0 %v7978_v25  ;;  %8136 = vmatpush3.bf16.msra.mxu1 %v7978_v25 }
  0x13   : > { %v345_v9 = vld [vmem:[%s9129_s15 + $0x48] sm:$0xff]  ;;  %v347_v11 = vld [vmem:[%s9129_s15 + $0x58] sm:$0xff]  ;;  %v346_v12 = vld [vmem:[%s9129_s15 + $0x50] sm:$0xff]  ;;  %7983 = vmatprep.subr.bf16.mxu0 %v7982_v30  ;;  %8133 = vmatprep.subr.bf16.mxu1 %v7982_v30 }
  0x14   : > { %v349_v13 = vld [vmem:[%s9129_s15 + $0x68] sm:$0xff]  ;;  %v348_v14 = vld [vmem:[%s9129_s15 + $0x60] sm:$0xff]  ;;  %v351_v23 = vld [vmem:[%s9129_s15 + $0x78] sm:$0xff] }
  0x15   : > { %482 = vperm.xlu1 %8268, %v339_v3   ;;  %472 = vperm.xlu0 %8267, %v337_v4   ;;  %v350_v24 = vld [vmem:[%s9129_s15 + $0x70] sm:$0xff]  ;;  %v353_v28 = vld [vmem:[%s9129_s15 + $0x88] sm:$0xff]  ;;  %v352_v29 = vld [vmem:[%s9129_s15 + $0x80] sm:$0xff] }
  0x16   : > { %v355_v31 = vld [vmem:[%s9129_s15 + $0x98] sm:$0xff]  ;;  %v354_v32 = vld [vmem:[%s9129_s15 + $0x90] sm:$0xff]  ;;  %v357_v33 = vld [vmem:[%s9129_s15 + $0xa8] sm:$0xff]  ;;  %7985 = vmatpush3.bf16.msra.mxu0 %v7982_v30  ;;  %8137 = vmatpush3.bf16.msra.mxu1 %v7982_v30 }
  0x17   : > { %v356_v34 = vld [vmem:[%s9129_s15 + $0xa0] sm:$0xff]  ;;  %v359_v35 = vld [vmem:[%s9129_s15 + $0xb8] sm:$0xff]  ;;  %v358_v36 = vld [vmem:[%s9129_s15 + $0xb0] sm:$0xff] }
  0x18   : > { %v361_v37 = vld [vmem:[%s9129_s15 + $0xc8] sm:$0xff]  ;;  %v360_v38 = vld [vmem:[%s9129_s15 + $0xc0] sm:$0xff]  ;;  %v363_v39 = vld [vmem:[%s9129_s15 + $0xd8] sm:$0xff] }
  0x19   : > { %492 = vperm.xlu1 %8268, %v341_v5   ;;  %487 = vperm.xlu0 %8267, %v340_v6   ;;  %v362_v40 = vld [vmem:[%s9129_s15 + $0xd0] sm:$0xff]  ;;  %v365_v41 = vld [vmem:[%s9129_s15 + $0xe8] sm:$0xff]  ;;  %v364_v42 = vld [vmem:[%s9129_s15 + $0xe0] sm:$0xff] }
  0x1a   : > { %v367_v43 = vld [vmem:[%s9129_s15 + $0xf8] sm:$0xff]  ;;  %v366_v44 = vld [vmem:[%s9129_s15 + $0xf0] sm:$0xff]  ;;  %v369_v45 = vld [vmem:[%s9129_s15 + $0x108] sm:$0xff] }
  0x1b   : > { %v368_v46 = vld [vmem:[%s9129_s15 + $0x100] sm:$0xff]  ;;  %v371_v47 = vld [vmem:[%s9129_s15 + $0x118] sm:$0xff]  ;;  %v370_v48 = vld [vmem:[%s9129_s15 + $0x110] sm:$0xff] }
  0x1c   : > { %v373_v49 = vld [vmem:[%s9129_s15 + $0x128] sm:$0xff]  ;;  %v372_v50 = vld [vmem:[%s9129_s15 + $0x120] sm:$0xff]  ;;  %v375_v51 = vld [vmem:[%s9129_s15 + $0x138] sm:$0xff] }
  0x1d   : > { %502 = vperm.xlu1 %8268, %v343_v7   ;;  %497 = vperm.xlu0 %8267, %v342_v8   ;;  %v374_v52 = vld [vmem:[%s9129_s15 + $0x130] sm:$0xff]  ;;  %v377_v53 = vld [vmem:[%s9129_s15 + $0x148] sm:$0xff]  ;;  %v376_v54 = vld [vmem:[%s9129_s15 + $0x140] sm:$0xff] }
  0x1e   : > { %v378_v55 = vld [vmem:[%s9129_s15 + $0x150] sm:$0xff]  ;;  %v400_v56 = vld [vmem:[%s9129_s15 + $0x200] sm:$0xff]  ;;  %v379_v57 = vld [vmem:[%s9129_s15 + $0x158] sm:$0xff] }
  0x1f   : > { %v401_v58 = vld [vmem:[%s9129_s15 + $0x208] sm:$0xff]  ;;  %v380_v59 = vld [vmem:[%s9129_s15 + $0x160] sm:$0xff]  ;;  %v402_v60 = vld [vmem:[%s9129_s15 + $0x210] sm:$0xff] }
  0x20   : > { %v381_v61 = vld [vmem:[%s9129_s15 + $0x168] sm:$0xff]  ;;  %v403_v62 = vld [vmem:[%s9129_s15 + $0x218] sm:$0xff]  ;;  %v382_v63 = vld [vmem:[%s9129_s15 + $0x170] sm:$0xff] }
  0x21   : > { %512 = vperm.xlu1 %8268, %v345_v9   ;;  %507 = vperm.xlu0 %8267, %v344_v10   ;;  %v404_v0 = vld [vmem:[%s9129_s15 + $0x220] sm:$0xff]  ;;  %v383_v1 = vld [vmem:[%s9129_s15 + $0x178] sm:$0xff]  ;;  %v405_v2 = vld [vmem:[%s9129_s15 + $0x228] sm:$0xff] }
  0x22   : > { %v384_v3 = vld [vmem:[%s9129_s15 + $0x180] sm:$0xff]  ;;  %v406_v4 = vld [vmem:[%s9129_s15 + $0x230] sm:$0xff]  ;;  %v385_v5 = vld [vmem:[%s9129_s15 + $0x188] sm:$0xff] }
  0x23   : > { %v407_v6 = vld [vmem:[%s9129_s15 + $0x238] sm:$0xff]  ;;  %v386_v7 = vld [vmem:[%s9129_s15 + $0x190] sm:$0xff]  ;;  %v408_v8 = vld [vmem:[%s9129_s15 + $0x240] sm:$0xff] }
  0x24   : > { %v387_v9 = vld [vmem:[%s9129_s15 + $0x198] sm:$0xff]  ;;  %v409_v10 = vld [vmem:[%s9129_s15 + $0x248] sm:$0xff]  ;;  %v390_v20 = vld [vmem:[%s9129_s15 + $0x1b0] sm:$0xff] }
  0x25   : > { %522 = vperm.xlu1 %8268, %v347_v11   ;;  %517 = vperm.xlu0 %8267, %v346_v12   ;;  %v388_v11 = vld [vmem:[%s9129_s15 + $0x1a0] sm:$0xff]  ;;  %v410_v12 = vld [vmem:[%s9129_s15 + $0x250] sm:$0xff]  ;;  %v411_v15 = vld [vmem:[%s9129_s15 + $0x258] sm:$0xff] }
  0x26   : > { %v412_v21 = vld [vmem:[%s9129_s15 + $0x260] sm:$0xff] }
  0x29   : > { %532 = vperm.xlu1 %8268, %v349_v13   ;;  %527 = vperm.xlu0 %8267, %v348_v14   ;;  %v9222_v13 = vld [vmem:[%s10792_s1] ss:$0 sm:$0xff]  ;;  %v389_v14 = vld [vmem:[%s9129_s15 + $0x1a8] sm:$0xff] }
  0x2d   : > { %542 = vperm.xlu1 %8268, %v351_v23   ;;  %537 = vperm.xlu0 %8267, %v350_v24  }
  0x31   : > { %552 = vperm.xlu1 %8268, %v353_v28   ;;  %547 = vperm.xlu0 %8267, %v352_v29   ;;  %v391_v28 = vld [vmem:[%s9129_s15 + $0x1b8] sm:$0xff]  ;;  %v413_v29 = vld [vmem:[%s9129_s15 + $0x268] sm:$0xff] }
  0x35   : > { %562 = vperm.xlu1 %8268, %v355_v31   ;;  %557 = vperm.xlu0 %8267, %v354_v32  }
  0x39   : > { %572 = vperm.xlu1 %8268, %v357_v33   ;;  %567 = vperm.xlu0 %8267, %v356_v34  }
  0x3d   : > { %582 = vperm.xlu1 %8268, %v359_v35   ;;  %577 = vperm.xlu0 %8267, %v358_v36  }
  0x41   : > { %592 = vperm.xlu1 %8268, %v361_v37   ;;  %587 = vperm.xlu0 %8267, %v360_v38   ;;  %v392_v37 = vld [vmem:[%s9129_s15 + $0x1c0] sm:$0xff]  ;;  %v414_v38 = vld [vmem:[%s9129_s15 + $0x270] sm:$0xff] }
  0x45   : > { %602 = vperm.xlu1 %8268, %v363_v39   ;;  %597 = vperm.xlu0 %8267, %v362_v40  }
  0x49   : > { %612 = vperm.xlu1 %8268, %v365_v41   ;;  %607 = vperm.xlu0 %8267, %v364_v42  }
  0x4d   : > { %622 = vperm.xlu1 %8268, %v367_v43   ;;  %617 = vperm.xlu0 %8267, %v366_v44  }
  0x51   : > { %632 = vperm.xlu1 %8268, %v369_v45   ;;  %627 = vperm.xlu0 %8267, %v368_v46   ;;  %v393_v45 = vld [vmem:[%s9129_s15 + $0x1c8] sm:$0xff] }
  0x55   : > { %642 = vperm.xlu1 %8268, %v371_v47   ;;  %637 = vperm.xlu0 %8267, %v370_v48   ;;  %v415_v47 = vld [vmem:[%s9129_s15 + $0x278] sm:$0xff] }
  0x59   : > { %652 = vperm.xlu1 %8268, %v373_v49   ;;  %647 = vperm.xlu0 %8267, %v372_v50  }
  0x5d   : > { %662 = vperm.xlu1 %8268, %v375_v51   ;;  %657 = vperm.xlu0 %8267, %v374_v52  }
  0x61   : > { %672 = vperm.xlu1 %8268, %v377_v53   ;;  %667 = vperm.xlu0 %8267, %v376_v54   ;;  %v394_v54 = vld [vmem:[%s9129_s15 + $0x1d0] sm:$0xff] }
  0x65   : > { %677 = vperm.xlu1 %8268, %v378_v55   ;;  %787 = vperm.xlu0 %8267, %v400_v56   ;;  %v2735_v55 = vld [vmem:[%s10796_s5] sm:$0xff]  ;;  %v2736_v56 = vld [vmem:[%s10796_s5 + $0x8] sm:$0xff] }
  0x69   : > { %682 = vperm.xlu1 %8268, %v379_v57   ;;  %792 = vperm.xlu0 %8267, %v401_v58   ;;  %v416_v58 = vld [vmem:[%s9129_s15 + $0x280] sm:$0xff] }
  0x6d   : > { %687 = vperm.xlu1 %8268, %v380_v59   ;;  %797 = vperm.xlu0 %8267, %v402_v60   ;;  %v9267_v59 = vpack.c.bf16 %v2736_v56, %v2735_v55  ;;  %v423_v55 = vld [vmem:[%s9129_s15 + $0x2b8] sm:$0xff] }
  0x6f   : > { %7987 = vmatprep.subr.bf16.mxu1 %v9267_v59 }
  0x71   : > { %692 = vperm.xlu1 %8268, %v381_v61   ;;  %802 = vperm.xlu0 %8267, %v403_v62  }
  0x75   : > { %697 = vperm.xlu1 %8268, %v382_v63   ;;  %807 = vperm.xlu0 %8267, %v404_v0  }
  0x79   : > { %702 = vperm.xlu1 %8268, %v383_v1   ;;  %812 = vperm.xlu0 %8267, %v405_v2  }
  0x7d   : > { %707 = vperm.xlu1 %8268, %v384_v3   ;;  %817 = vperm.xlu0 %8267, %v406_v4   ;;  %v395_v3 = vld [vmem:[%s9129_s15 + $0x1d8] sm:$0xff] }
  0x81   : > { %712 = vperm.xlu1 %8268, %v385_v5   ;;  %822 = vperm.xlu0 %8267, %v407_v6   ;;  %v417_v6 = vld [vmem:[%s9129_s15 + $0x288] sm:$0xff] }
  0x85   : > { %717 = vperm.xlu1 %8268, %v386_v7   ;;  %827 = vperm.xlu0 %8267, %v408_v8  }
  0x89   : > { %722 = vperm.xlu1 %8268, %v387_v9   ;;  %832 = vperm.xlu0 %8267, %v409_v10  }
  0x8d   : > { %727 = vperm.xlu1 %8268, %v388_v11   ;;  %837 = vperm.xlu0 %8267, %v410_v12  }
  0x90   : > { %v478_v17 = vpop.permute.xlu1 %477  ;;  %v468_v18 = vpop.permute.xlu0 %467 }
  0x91   : > { %v1111_v19 = vmul.f32 %v9222_v13, %v468_v18  ;;  %732 = vperm.xlu1 %8268, %v389_v14   ;;  %842 = vperm.xlu0 %8267, %v411_v15   ;;  %v1113_v22 = vmul.f32 %v9222_v13, %v478_v17  ;;  %v396_v14 = vld [vmem:[%s9129_s15 + $0x1e0] sm:$0xff]  ;;  %v418_v18 = vld [vmem:[%s9129_s15 + $0x290] sm:$0xff] }
  0x93   : > { %v1246_v23 = vadd.f32 %v9229_v16, %v1111_v19  ;;  %v1248_v30 = vadd.f32 %v9229_v16, %v1113_v22 }
  0x94   : > { %v483_v24 = vpop.permute.xlu1 %482  ;;  %v473_v25 = vpop.permute.xlu0 %472 }
  0x95   : > { %v1114_v26 = vmul.f32 %v9222_v13, %v483_v24  ;;  %v1112_v27 = vmul.f32 %v9222_v13, %v473_v25  ;;  %737 = vperm.xlu1 %8268, %v390_v20   ;;  %847 = vperm.xlu0 %8267, %v412_v21   ;;  %8269 = vtanh.f32 %v1246_v23  ;;  %v397_v25 = vld [vmem:[%s9129_s15 + $0x1e8] sm:$0xff] }
  0x97   : > { %v1247_v31 = vadd.f32 %v9229_v16, %v1112_v27  ;;  %v1249_v34 = vadd.f32 %v9229_v16, %v1114_v26 }
  0x98   : > { %v493_v32 = vpop.permute.xlu1 %492  ;;  %v488_v33 = vpop.permute.xlu0 %487 }
  0x99   : > { %v1116_v35 = vmul.f32 %v9222_v13, %v493_v32  ;;  %v1115_v36 = vmul.f32 %v9222_v13, %v488_v33  ;;  %742 = vperm.xlu1 %8268, %v391_v28   ;;  %852 = vperm.xlu0 %8267, %v413_v29   ;;  %8271 = vtanh.f32 %v1247_v31  ;;  %v419_v28 = vld [vmem:[%s9129_s15 + $0x298] sm:$0xff] }
  0x9a   : > { %8273 = vtanh.f32 %v1248_v30 }
  0x9b   : > { %v1250_v39 = vadd.f32 %v9229_v16, %v1115_v36  ;;  %8275 = vtanh.f32 %v1249_v34  ;;  %v1251_v42 = vadd.f32 %v9229_v16, %v1116_v35  ;;  %v398_v35 = vld [vmem:[%s9129_s15 + $0x1f0] sm:$0xff] }
  0x9c   : > { %v503_v40 = vpop.permute.xlu1 %502  ;;  %v498_v41 = vpop.permute.xlu0 %497 }
  0x9d   : > { %v1118_v43 = vmul.f32 %v9222_v13, %v503_v40  ;;  %v1117_v44 = vmul.f32 %v9222_v13, %v498_v41  ;;  %747 = vperm.xlu1 %8268, %v392_v37   ;;  %857 = vperm.xlu0 %8267, %v414_v38   ;;  %8277 = vtanh.f32 %v1250_v39  ;;  %v420_v38 = vld [vmem:[%s9129_s15 + $0x2a0] sm:$0xff] }
  0x9e   : > { %8279 = vtanh.f32 %v1251_v42 }
  0x9f   : > { %v1252_v46 = vadd.f32 %v9229_v16, %v1117_v44  ;;  %v8270_v48 = vpop.eup %8269  ;;  %v1253_v51 = vadd.f32 %v9229_v16, %v1118_v43 }
  0xa0   : > { %v513_v49 = vpop.permute.xlu1 %512  ;;  %v508_v50 = vpop.permute.xlu0 %507  ;;  %7250 = vmatprep.mubr.msk.f32.mxu0 %vm1517_vm0, %v8270_v48  ;;  %v421_v48 = vld [vmem:[%s9129_s15 + $0x2a8] sm:$0xff] }
  0xa1   : > { %v1120_v52 = vmul.f32 %v9222_v13, %v513_v49  ;;  %v1119_v53 = vmul.f32 %v9222_v13, %v508_v50  ;;  %752 = vperm.xlu1 %8268, %v393_v45   ;;  %8281 = vtanh.f32 %v1252_v46  ;;  %862 = vperm.xlu0 %8267, %v415_v47   ;;  %v399_v45 = vld [vmem:[%s9129_s15 + $0x1f8] sm:$0xff] }
  0xa2   : > { %8283 = vtanh.f32 %v1253_v51 }
  0xa3   : > { %v1254_v57 = vadd.f32 %v9229_v16, %v1119_v53  ;;  %v8272_v60 = vpop.eup %8271  ;;  %v1255_v0 = vadd.f32 %v9229_v16, %v1120_v52 }
  0xa4   : > { %v523_v61 = vpop.permute.xlu1 %522  ;;  %v518_v62 = vpop.permute.xlu0 %517  ;;  %7251 = vmatmul.mubr.msk.f32.vlgmr.msra.gmra.mrb[0].mxu0 %vm1517_vm0, %v8272_v60 }
  0xa5   : > { %v8274_v63 = vpop.eup %8273  ;;  %v1122_v1 = vmul.f32 %v9222_v13, %v523_v61  ;;  %v1121_v2 = vmul.f32 %v9222_v13, %v518_v62  ;;  %757 = vperm.xlu1 %8268, %v394_v54   ;;  %8285 = vtanh.f32 %v1254_v57  ;;  %867 = vperm.xlu0 %8267, %v416_v58   ;;  %v422_v58 = vld [vmem:[%s9129_s15 + $0x2b0] sm:$0xff] }
  0xa6   : > { %7253 = vmatprep.mubr.msk.f32.mxu0 %vm1517_vm0, %v8274_v63  ;;  %v8276_v4 = vpop.eup %8275  ;;  %8287 = vtanh.f32 %v1255_v0 }
  0xa7   : > { %v1256_v5 = vadd.f32 %v9229_v16, %v1121_v2  ;;  %v8278_v7 = vpop.eup %8277  ;;  %v1257_v10 = vadd.f32 %v9229_v16, %v1122_v1  ;;  %v425_v2 = vld [vmem:[%s9129_s15 + $0x2c8] sm:$0xff] }
  0xa8   : > { %v533_v8 = vpop.permute.xlu1 %532  ;;  %v528_v9 = vpop.permute.xlu0 %527  ;;  %7254 = vmatmul.mubr.msk.f32.gmra.mrb[2].mxu0 %vm1517_vm0, %v8276_v4 }
  0xa9   : > { %v1124_v11 = vmul.f32 %v9222_v13, %v533_v8  ;;  %v1123_v12 = vmul.f32 %v9222_v13, %v528_v9  ;;  %762 = vperm.xlu1 %8268, %v395_v3   ;;  %8289 = vtanh.f32 %v1256_v5  ;;  %872 = vperm.xlu0 %8267, %v417_v6   ;;  %v8280_v15 = vpop.eup %8279  ;;  %v424_v5 = vld [vmem:[%s9129_s15 + $0x2c0] sm:$0xff] }
  0xaa   : > { %7256 = vmatprep.mubr.msk.f32.mxu0 %vm1517_vm0, %v8278_v7  ;;  %8291 = vtanh.f32 %v1257_v10 }
  0xab   : > { %v1258_v17 = vadd.f32 %v9229_v16, %v1123_v12  ;;  %v8282_v19 = vpop.eup %8281  ;;  %v1259_v22 = vadd.f32 %v9229_v16, %v1124_v11  ;;  %v427_v12 = vld [vmem:[%s9129_s15 + $0x2d8] sm:$0xff] }
  0xac   : > { %v543_v20 = vpop.permute.xlu1 %542  ;;  %v538_v21 = vpop.permute.xlu0 %537  ;;  %7257 = vmatmul.mubr.msk.f32.gmra.mrb[4].mxu0 %vm1517_vm0, %v8280_v15 }
  0xad   : > { %v1126_v23 = vmul.f32 %v9222_v13, %v543_v20  ;;  %v1125_v24 = vmul.f32 %v9222_v13, %v538_v21  ;;  %767 = vperm.xlu1 %8268, %v396_v14   ;;  %8293 = vtanh.f32 %v1258_v17  ;;  %877 = vperm.xlu0 %8267, %v418_v18   ;;  %v8284_v26 = vpop.eup %8283  ;;  %v426_v17 = vld [vmem:[%s9129_s15 + $0x2d0] sm:$0xff] }
  0xae   : > { %7259 = vmatprep.mubr.msk.f32.mxu0 %vm1517_vm0, %v8282_v19  ;;  %8295 = vtanh.f32 %v1259_v22 }
  0xaf   : > { %v1260_v27 = vadd.f32 %v9229_v16, %v1125_v24  ;;  %v8286_v29 = vpop.eup %8285  ;;  %v1261_v32 = vadd.f32 %v9229_v16, %v1126_v23  ;;  %v429_v24 = vld [vmem:[%s9129_s15 + $0x2e8] sm:$0xff] }
  0xb0   : > { %v553_v30 = vpop.permute.xlu1 %552  ;;  %v548_v31 = vpop.permute.xlu0 %547  ;;  %7260 = vmatmul.mubr.msk.f32.gmra.mrb[6].mxu0 %vm1517_vm0, %v8284_v26 }
  0xb1   : > { %v1128_v33 = vmul.f32 %v9222_v13, %v553_v30  ;;  %v1127_v34 = vmul.f32 %v9222_v13, %v548_v31  ;;  %772 = vperm.xlu1 %8268, %v397_v25   ;;  %8297 = vtanh.f32 %v1260_v27  ;;  %882 = vperm.xlu0 %8267, %v419_v28   ;;  %v8288_v36 = vpop.eup %8287  ;;  %v428_v27 = vld [vmem:[%s9129_s15 + $0x2e0] sm:$0xff] }
  0xb2   : > { %7262 = vmatprep.mubr.msk.f32.mxu0 %vm1517_vm0, %v8286_v29  ;;  %8299 = vtanh.f32 %v1261_v32 }
  0xb3   : > { %v1262_v37 = vadd.f32 %v9229_v16, %v1127_v34  ;;  %v8290_v39 = vpop.eup %8289  ;;  %v1263_v42 = vadd.f32 %v9229_v16, %v1128_v33  ;;  %v431_v34 = vld [vmem:[%s9129_s15 + $0x2f8] sm:$0xff] }
  0xb4   : > { %v563_v40 = vpop.permute.xlu1 %562  ;;  %v558_v41 = vpop.permute.xlu0 %557  ;;  %7263 = vmatmul.mubr.msk.f32.gmra.mrb[8].mxu0 %vm1517_vm0, %v8288_v36 }
  0xb5   : > { %v1130_v43 = vmul.f32 %v9222_v13, %v563_v40  ;;  %v1129_v44 = vmul.f32 %v9222_v13, %v558_v41  ;;  %777 = vperm.xlu1 %8268, %v398_v35   ;;  %8301 = vtanh.f32 %v1262_v37  ;;  %887 = vperm.xlu0 %8267, %v420_v38   ;;  %v8292_v46 = vpop.eup %8291  ;;  %v430_v37 = vld [vmem:[%s9129_s15 + $0x2f0] sm:$0xff] }
  0xb6   : > { %7265 = vmatprep.mubr.msk.f32.mxu0 %vm1517_vm0, %v8290_v39  ;;  %8303 = vtanh.f32 %v1263_v42 }
  0xb7   : > { %v1264_v47 = vadd.f32 %v9229_v16, %v1129_v44  ;;  %v8294_v49 = vpop.eup %8293  ;;  %v1265_v52 = vadd.f32 %v9229_v16, %v1130_v43  ;;  %v433_v44 = vld [vmem:[%s9129_s15 + $0x308] sm:$0xff] }
  0xb8   : > { %v573_v50 = vpop.permute.xlu1 %572  ;;  %v568_v51 = vpop.permute.xlu0 %567  ;;  %7266 = vmatmul.mubr.msk.f32.gmra.mrb[10].mxu0 %vm1517_vm0, %v8292_v46 }
  0xb9   : > { %v1132_v53 = vmul.f32 %v9222_v13, %v573_v50  ;;  %v1131_v54 = vmul.f32 %v9222_v13, %v568_v51  ;;  %782 = vperm.xlu1 %8268, %v399_v45   ;;  %8305 = vtanh.f32 %v1264_v47  ;;  %892 = vperm.xlu0 %8267, %v421_v48   ;;  %v8296_v56 = vpop.eup %8295  ;;  %v432_v47 = vld [vmem:[%s9129_s15 + $0x300] sm:$0xff] }
  0xba   : > { %7268 = vmatprep.mubr.msk.f32.mxu0 %vm1517_vm0, %v8294_v49  ;;  %8307 = vtanh.f32 %v1265_v52 }
  0xbb   : > { %v1266_v57 = vadd.f32 %v9229_v16, %v1131_v54  ;;  %v8298_v60 = vpop.eup %8297  ;;  %v1267_v63 = vadd.f32 %v9229_v16, %v1132_v53  ;;  %v435_v54 = vld [vmem:[%s9129_s15 + $0x318] sm:$0xff] }
  0xbc   : > { %v583_v61 = vpop.permute.xlu1 %582  ;;  %v578_v62 = vpop.permute.xlu0 %577  ;;  %7269 = vmatmul.mubr.msk.f32.gmra.mrb[12].mxu0 %vm1517_vm0, %v8296_v56 }
  0xbd   : > { %v1134_v0 = vmul.f32 %v9222_v13, %v583_v61  ;;  %v1133_v1 = vmul.f32 %v9222_v13, %v578_v62  ;;  %902 = vperm.xlu1 %8268, %v423_v55   ;;  %8309 = vtanh.f32 %v1266_v57  ;;  %897 = vperm.xlu0 %8267, %v422_v58   ;;  %v8300_v3 = vpop.eup %8299  ;;  %v434_v57 = vld [vmem:[%s9129_s15 + $0x310] sm:$0xff] }
  0xbe   : > { %7271 = vmatprep.mubr.msk.f32.mxu0 %vm1517_vm0, %v8298_v60  ;;  %8311 = vtanh.f32 %v1267_v63 }
  0xbf   : > { %v1268_v4 = vadd.f32 %v9229_v16, %v1133_v1  ;;  %v8302_v6 = vpop.eup %8301  ;;  %v1269_v9 = vadd.f32 %v9229_v16, %v1134_v0  ;;  %v437_v1 = vld [vmem:[%s9129_s15 + $0x328] sm:$0xff] }
  0xc0   : > { %v593_v7 = vpop.permute.xlu1 %592  ;;  %v588_v8 = vpop.permute.xlu0 %587  ;;  %7272 = vmatmul.mubr.msk.f32.gmra.mrb[14].mxu0 %vm1517_vm0, %v8300_v3 }
  0xc1   : > { %v1136_v10 = vmul.f32 %v9222_v13, %v593_v7  ;;  %v1135_v11 = vmul.f32 %v9222_v13, %v588_v8  ;;  %912 = vperm.xlu1 %8268, %v425_v2   ;;  %8313 = vtanh.f32 %v1268_v4  ;;  %907 = vperm.xlu0 %8267, %v424_v5   ;;  %v8304_v14 = vpop.eup %8303  ;;  %v436_v4 = vld [vmem:[%s9129_s15 + $0x320] sm:$0xff] }
  0xc2   : > { %7274 = vmatprep.mubr.msk.f32.mxu0 %vm1517_vm0, %v8302_v6  ;;  %8315 = vtanh.f32 %v1269_v9 }
  0xc3   : > { %v1270_v15 = vadd.f32 %v9229_v16, %v1135_v11  ;;  %v8306_v18 = vpop.eup %8305  ;;  %v1271_v21 = vadd.f32 %v9229_v16, %v1136_v10  ;;  %v439_v11 = vld [vmem:[%s9129_s15 + $0x338] sm:$0xff] }
  0xc4   : > { %v603_v19 = vpop.permute.xlu1 %602  ;;  %v598_v20 = vpop.permute.xlu0 %597  ;;  %7275 = vmatmul.mubr.msk.f32.gmra.mrb[16].mxu0 %vm1517_vm0, %v8304_v14 }
  0xc5   : > { %v1138_v22 = vmul.f32 %v9222_v13, %v603_v19  ;;  %v1137_v23 = vmul.f32 %v9222_v13, %v598_v20  ;;  %922 = vperm.xlu1 %8268, %v427_v12   ;;  %8317 = vtanh.f32 %v1270_v15  ;;  %917 = vperm.xlu0 %8267, %v426_v17   ;;  %v8308_v25 = vpop.eup %8307  ;;  %v438_v15 = vld [vmem:[%s9129_s15 + $0x330] sm:$0xff] }
  0xc6   : > { %7277 = vmatprep.mubr.msk.f32.mxu0 %vm1517_vm0, %v8306_v18  ;;  %8319 = vtanh.f32 %v1271_v21 }
  0xc7   : > { %v1272_v26 = vadd.f32 %v9229_v16, %v1137_v23  ;;  %v8310_v28 = vpop.eup %8309  ;;  %v1273_v31 = vadd.f32 %v9229_v16, %v1138_v22  ;;  %v441_v23 = vld [vmem:[%s9129_s15 + $0x348] sm:$0xff] }
  0xc8   : > { %v613_v29 = vpop.permute.xlu1 %612  ;;  %v608_v30 = vpop.permute.xlu0 %607  ;;  %7278 = vmatmul.mubr.msk.f32.gmra.mrb[18].mxu0 %vm1517_vm0, %v8308_v25 }
  0xc9   : > { %v1140_v32 = vmul.f32 %v9222_v13, %v613_v29  ;;  %v1139_v33 = vmul.f32 %v9222_v13, %v608_v30  ;;  %932 = vperm.xlu1 %8268, %v429_v24   ;;  %8321 = vtanh.f32 %v1272_v26  ;;  %927 = vperm.xlu0 %8267, %v428_v27   ;;  %v8312_v35 = vpop.eup %8311  ;;  %v440_v26 = vld [vmem:[%s9129_s15 + $0x340] sm:$0xff] }
  0xca   : > { %7280 = vmatprep.mubr.msk.f32.mxu0 %vm1517_vm0, %v8310_v28  ;;  %8323 = vtanh.f32 %v1273_v31 }
  0xcb   : > { %v1274_v36 = vadd.f32 %v9229_v16, %v1139_v33  ;;  %v8314_v38 = vpop.eup %8313  ;;  %v1275_v41 = vadd.f32 %v9229_v16, %v1140_v32  ;;  %v443_v33 = vld [vmem:[%s9129_s15 + $0x358] sm:$0xff] }
  0xcc   : > { %v623_v39 = vpop.permute.xlu1 %622  ;;  %v618_v40 = vpop.permute.xlu0 %617  ;;  %7281 = vmatmul.mubr.msk.f32.gmra.mrb[20].mxu0 %vm1517_vm0, %v8312_v35 }
  0xcd   : > { %v1142_v42 = vmul.f32 %v9222_v13, %v623_v39  ;;  %v1141_v43 = vmul.f32 %v9222_v13, %v618_v40  ;;  %942 = vperm.xlu1 %8268, %v431_v34   ;;  %8325 = vtanh.f32 %v1274_v36  ;;  %937 = vperm.xlu0 %8267, %v430_v37   ;;  %v8316_v45 = vpop.eup %8315  ;;  %v442_v36 = vld [vmem:[%s9129_s15 + $0x350] sm:$0xff] }
  0xce   : > { %7283 = vmatprep.mubr.msk.f32.mxu0 %vm1517_vm0, %v8314_v38  ;;  %8327 = vtanh.f32 %v1275_v41 }
  0xcf   : > { %v1276_v46 = vadd.f32 %v9229_v16, %v1141_v43  ;;  %v8318_v48 = vpop.eup %8317  ;;  %v1277_v51 = vadd.f32 %v9229_v16, %v1142_v42  ;;  %v445_v43 = vld [vmem:[%s9129_s15 + $0x368] sm:$0xff] }
  0xd0   : > { %v633_v49 = vpop.permute.xlu1 %632  ;;  %v628_v50 = vpop.permute.xlu0 %627  ;;  %7284 = vmatmul.mubr.msk.f32.gmra.mrb[22].mxu0 %vm1517_vm0, %v8316_v45 }
  0xd1   : > { %v1144_v52 = vmul.f32 %v9222_v13, %v633_v49  ;;  %v1143_v53 = vmul.f32 %v9222_v13, %v628_v50  ;;  %952 = vperm.xlu1 %8268, %v433_v44   ;;  %8329 = vtanh.f32 %v1276_v46  ;;  %947 = vperm.xlu0 %8267, %v432_v47   ;;  %v8320_v55 = vpop.eup %8319  ;;  %v444_v47 = vld [vmem:[%s9129_s15 + $0x360] sm:$0xff] }
  0xd2   : > { %7286 = vmatprep.mubr.msk.f32.mxu0 %vm1517_vm0, %v8318_v48  ;;  %8331 = vtanh.f32 %v1277_v51 }
  0xd3   : > { %v1278_v56 = vadd.f32 %v9229_v16, %v1143_v53  ;;  %v8322_v58 = vpop.eup %8321  ;;  %v1279_v62 = vadd.f32 %v9229_v16, %v1144_v52  ;;  %v447_v53 = vld [vmem:[%s9129_s15 + $0x378] sm:$0xff] }
  0xd4   : > { %v643_v60 = vpop.permute.xlu1 %642  ;;  %v638_v61 = vpop.permute.xlu0 %637  ;;  %7287 = vmatmul.mubr.msk.f32.gmra.mrb[24].mxu0 %vm1517_vm0, %v8320_v55 }
  0xd5   : > { %v1146_v63 = vmul.f32 %v9222_v13, %v643_v60  ;;  %v1145_v0 = vmul.f32 %v9222_v13, %v638_v61  ;;  %962 = vperm.xlu1 %8268, %v435_v54   ;;  %8333 = vtanh.f32 %v1278_v56  ;;  %957 = vperm.xlu0 %8267, %v434_v57   ;;  %v8324_v2 = vpop.eup %8323  ;;  %v446_v57 = vld [vmem:[%s9129_s15 + $0x370] sm:$0xff] }
  0xd6   : > { %7289 = vmatprep.mubr.msk.f32.mxu0 %vm1517_vm0, %v8322_v58  ;;  %8335 = vtanh.f32 %v1279_v62 }
  0xd7   : > { %v1280_v3 = vadd.f32 %v9229_v16, %v1145_v0  ;;  %v8326_v5 = vpop.eup %8325  ;;  %v1281_v8 = vadd.f32 %v9229_v16, %v1146_v63  ;;  %v449_v0 = vld [vmem:[%s9129_s15 + $0x388] sm:$0xff] }
  0xd8   : > { %v653_v6 = vpop.permute.xlu1 %652  ;;  %v648_v7 = vpop.permute.xlu0 %647  ;;  %7290 = vmatmul.mubr.msk.f32.gmra.mrb[26].mxu0 %vm1517_vm0, %v8324_v2 }
  0xd9   : > { %v1148_v9 = vmul.f32 %v9222_v13, %v653_v6  ;;  %v1147_v10 = vmul.f32 %v9222_v13, %v648_v7  ;;  %972 = vperm.xlu1 %8268, %v437_v1   ;;  %8337 = vtanh.f32 %v1280_v3  ;;  %967 = vperm.xlu0 %8267, %v436_v4   ;;  %v8328_v12 = vpop.eup %8327  ;;  %v448_v4 = vld [vmem:[%s9129_s15 + $0x380] sm:$0xff] }
  0xda   : > { %7292 = vmatprep.mubr.msk.f32.mxu0 %vm1517_vm0, %v8326_v5  ;;  %8339 = vtanh.f32 %v1281_v8 }
  0xdb   : > { %v1282_v14 = vadd.f32 %v9229_v16, %v1147_v10  ;;  %v8330_v17 = vpop.eup %8329  ;;  %v1283_v20 = vadd.f32 %v9229_v16, %v1148_v9 }
  0xdc   : > { %v663_v18 = vpop.permute.xlu1 %662  ;;  %v658_v19 = vpop.permute.xlu0 %657  ;;  %7293 = vmatmul.mubr.msk.f32.gmra.mrb[28].mxu0 %vm1517_vm0, %v8328_v12 }
  0xdd   : > { %v1150_v21 = vmul.f32 %v9222_v13, %v663_v18  ;;  %v1149_v22 = vmul.f32 %v9222_v13, %v658_v19  ;;  %982 = vperm.xlu1 %8268, %v439_v11   ;;  %8341 = vtanh.f32 %v1282_v14  ;;  %977 = vperm.xlu0 %8267, %v438_v15   ;;  %v8332_v24 = vpop.eup %8331  ;;  %v451_v15 = vld [vmem:[%s9129_s15 + $0x398] sm:$0xff] }
  0xde   : > { %7295 = vmatprep.mubr.msk.f32.mxu0 %vm1517_vm0, %v8330_v17  ;;  %8343 = vtanh.f32 %v1283_v20  ;;  %v450_v17 = vld [vmem:[%s9129_s15 + $0x390] sm:$0xff] }
  0xdf   : > { %v1284_v25 = vadd.f32 %v9229_v16, %v1149_v22  ;;  %v8334_v27 = vpop.eup %8333  ;;  %v1285_v30 = vadd.f32 %v9229_v16, %v1150_v21 }
  0xe0   : > { %v673_v28 = vpop.permute.xlu1 %672  ;;  %v668_v29 = vpop.permute.xlu0 %667  ;;  %7296 = vmatmul.mubr.msk.f32.gmra.mrb[30].mxu0 %vm1517_vm0, %v8332_v24  ;;  %v2738_v24 = vld [vmem:[%s10796_s5 + $0x18] sm:$0xff] }
  0xe1   : > { %v1152_v31 = vmul.f32 %v9222_v13, %v673_v28  ;;  %v1151_v32 = vmul.f32 %v9222_v13, %v668_v29  ;;  %992 = vperm.xlu1 %8268, %v441_v23   ;;  %8345 = vtanh.f32 %v1284_v25  ;;  %987 = vperm.xlu0 %8267, %v440_v26   ;;  %v8336_v34 = vpop.eup %8335  ;;  %v2737_v23 = vld [vmem:[%s10796_s5 + $0x10] sm:$0xff]  ;;  %v453_v28 = vld [vmem:[%s9129_s15 + $0x3a8] sm:$0xff]  ;;  %v452_v29 = vld [vmem:[%s9129_s15 + $0x3a0] sm:$0xff] }
  0xe2   : > { %7298 = vmatprep.mubr.msk.f32.mxu0 %vm1517_vm0, %v8334_v27  ;;  %8347 = vtanh.f32 %v1285_v30 }
  0xe3   : > { %v1286_v35 = vadd.f32 %v9229_v16, %v1151_v32  ;;  %v8338_v37 = vpop.eup %8337  ;;  %v1287_v38 = vadd.f32 %v9229_v16, %v1152_v31 }
  0xe4   : > { %v678_v39 = vpop.permute.xlu1 %677  ;;  %v788_v40 = vpop.permute.xlu0 %787  ;;  %7299 = vmatmul.mubr.msk.f32.gmra.mrb[32].mxu0 %vm1517_vm0, %v8336_v34 }
  0xe5   : > { %v1153_v41 = vmul.f32 %v9222_v13, %v678_v39  ;;  %v1175_v42 = vmul.f32 %v9222_v13, %v788_v40  ;;  %1002 = vperm.xlu1 %8268, %v443_v33   ;;  %8349 = vtanh.f32 %v1286_v35  ;;  %997 = vperm.xlu0 %8267, %v442_v36   ;;  %v8340_v44 = vpop.eup %8339  ;;  %v7990_v33 = vpack.c.bf16 %v2738_v24, %v2737_v23  ;;  %v2739_v36 = vld [vmem:[%s10796_s5 + $0x20] sm:$0xff]  ;;  %v463_v23 = vld [vmem:[%s9129_s15 + $0x3f8] sm:$0xff]  ;;  %v462_v24 = vld [vmem:[%s9129_s15 + $0x3f0] sm:$0xff] }
  0xe6   : > { %7301 = vmatprep.mubr.msk.f32.mxu0 %vm1517_vm0, %v8338_v37  ;;  %8351 = vtanh.f32 %v1287_v38  ;;  %v2740_v37 = vld [vmem:[%s10796_s5 + $0x28] sm:$0xff] }
  0xe7   : > { %v1288_v45 = vadd.f32 %v9229_v16, %v1153_v41  ;;  %v1310_v46 = vadd.f32 %v9229_v16, %v1175_v42  ;;  %v8342_v48 = vpop.eup %8341  ;;  %v455_v41 = vld [vmem:[%s9129_s15 + $0x3b8] sm:$0xff]  ;;  %v454_v42 = vld [vmem:[%s9129_s15 + $0x3b0] sm:$0xff] }
  0xe8   : > { %v683_v49 = vpop.permute.xlu1 %682  ;;  %v793_v50 = vpop.permute.xlu0 %792  ;;  %7302 = vmatmul.mubr.msk.f32.gmra.mrb[34].mxu0 %vm1517_vm0, %v8340_v44 }
  0xe9   : > { %8353 = vtanh.f32 %v1288_v45  ;;  %v1154_v51 = vmul.f32 %v9222_v13, %v683_v49  ;;  %v1176_v52 = vmul.f32 %v9222_v13, %v793_v50  ;;  %1012 = vperm.xlu1 %8268, %v445_v43   ;;  %1007 = vperm.xlu0 %8267, %v444_v47   ;;  %v8344_v54 = vpop.eup %8343 }
  0xea   : > { %8355 = vtanh.f32 %v1310_v46  ;;  %7304 = vmatprep.mubr.msk.f32.mxu0 %vm1517_vm0, %v8342_v48  ;;  %v7994_v46 = vpack.c.bf16 %v2740_v37, %v2739_v36 }
  0xeb   : > { %v1289_v55 = vadd.f32 %v9229_v16, %v1154_v51  ;;  %v1311_v56 = vadd.f32 %v9229_v16, %v1176_v52  ;;  %v8346_v58 = vpop.eup %8345  ;;  %v457_v51 = vld [vmem:[%s9129_s15 + $0x3c8] sm:$0xff]  ;;  %v456_v52 = vld [vmem:[%s9129_s15 + $0x3c0] sm:$0xff] }
  0xec   : > { %v688_v60 = vpop.permute.xlu1 %687  ;;  %v798_v61 = vpop.permute.xlu0 %797  ;;  %7305 = vmatmul.mubr.msk.f32.gmra.mrb[36].mxu0 %vm1517_vm0, %v8344_v54 }
  0xed   : > { %8357 = vtanh.f32 %v1289_v55  ;;  %v1155_v62 = vmul.f32 %v9222_v13, %v688_v60  ;;  %v1177_v63 = vmul.f32 %v9222_v13, %v798_v61  ;;  %1022 = vperm.xlu1 %8268, %v447_v53   ;;  %1017 = vperm.xlu0 %8267, %v446_v57   ;;  %v8348_v1 = vpop.eup %8347 }
  0xee   : > { %8359 = vtanh.f32 %v1311_v56  ;;  %7307 = vmatprep.mubr.msk.f32.mxu0 %vm1517_vm0, %v8346_v58 }
  0xef   : > { %v1290_v2 = vadd.f32 %v9229_v16, %v1155_v62  ;;  %v1312_v3 = vadd.f32 %v9229_v16, %v1177_v63  ;;  %v8350_v5 = vpop.eup %8349  ;;  %v459_v62 = vld [vmem:[%s9129_s15 + $0x3d8] sm:$0xff]  ;;  %v458_v63 = vld [vmem:[%s9129_s15 + $0x3d0] sm:$0xff] }
  0xf0   : > { %v693_v6 = vpop.permute.xlu1 %692  ;;  %v803_v7 = vpop.permute.xlu0 %802  ;;  %7308 = vmatmul.mubr.msk.f32.gmra.mrb[38].mxu0 %vm1517_vm0, %v8348_v1 }
  0xf1   : > { %8361 = vtanh.f32 %v1290_v2  ;;  %v1156_v8 = vmul.f32 %v9222_v13, %v693_v6  ;;  %v1178_v9 = vmul.f32 %v9222_v13, %v803_v7  ;;  %1032 = vperm.xlu1 %8268, %v449_v0   ;;  %v8352_v10 = vpop.eup %8351  ;;  %1027 = vperm.xlu0 %8267, %v448_v4   ;;  %v2742_v6 = vld [vmem:[%s10796_s5 + $0x38] sm:$0xff] }
  0xf2   : > { %8363 = vtanh.f32 %v1312_v3  ;;  %7310 = vmatprep.mubr.msk.f32.mxu0 %vm1517_vm0, %v8350_v5  ;;  %v2741_v5 = vld [vmem:[%s10796_s5 + $0x30] sm:$0xff] }
  0xf3   : > { %v8354_v11 = vpop.eup %8353  ;;  %v1291_v12 = vadd.f32 %v9229_v16, %v1156_v8  ;;  %v1313_v14 = vadd.f32 %v9229_v16, %v1178_v9 }
  0xf4   : > { %v8356_v18 = vpop.eup %8355  ;;  %v698_v19 = vpop.permute.xlu1 %697  ;;  %7311 = vmatmul.mubr.msk.f32.gmra.mrb[40].mxu0 %vm1517_vm0, %v8352_v10  ;;  %v461_v10 = vld [vmem:[%s9129_s15 + $0x3e8] sm:$0xff] }
  0xf5   : > { %v808_v20 = vpop.permute.xlu0 %807  ;;  %8365 = vtanh.f32 %v1291_v12  ;;  %v1157_v21 = vmul.f32 %v9222_v13, %v698_v19  ;;  %7346 = vmatprep.mubr.msk.f32.mxu1 %vm1517_vm0, %v8356_v18  ;;  %1042 = vperm.xlu1 %8268, %v451_v15   ;;  %v7998_v12 = vpack.c.bf16 %v2742_v6, %v2741_v5 }
  0xf6   : > { %v1179_v22 = vmul.f32 %v9222_v13, %v808_v20  ;;  %8367 = vtanh.f32 %v1313_v14  ;;  %1037 = vperm.xlu0 %8267, %v450_v17   ;;  %7313 = vmatprep.mubr.msk.f32.mxu0 %vm1517_vm0, %v8354_v11  ;;  %v460_v11 = vld [vmem:[%s9129_s15 + $0x3e0] sm:$0xff] }
  0xf7   : > { %v8358_v25 = vpop.eup %8357  ;;  %v1292_v26 = vadd.f32 %v9229_v16, %v1157_v21 }
  0xf8   : > { %v1314_v27 = vadd.f32 %v9229_v16, %v1179_v22  ;;  %v8360_v30 = vpop.eup %8359  ;;  %v703_v31 = vpop.permute.xlu1 %702  ;;  %7314 = vmatmul.mubr.msk.f32.gmra.mrb[42].mxu0 %vm1517_vm0, %v8358_v25 }
  0xf9   : > { %v813_v32 = vpop.permute.xlu0 %812  ;;  %8369 = vtanh.f32 %v1292_v26  ;;  %v1158_v34 = vmul.f32 %v9222_v13, %v703_v31  ;;  %7347 = vmatmul.mubr.msk.f32.vlgmr.msra.gmra.mrb[0].mxu1 %vm1517_vm0, %v8360_v30  ;;  %1052 = vperm.xlu1 %8268, %v453_v28  }
  0xfa   : > { %v1180_v35 = vmul.f32 %v9222_v13, %v813_v32  ;;  %8371 = vtanh.f32 %v1314_v27  ;;  %1047 = vperm.xlu0 %8267, %v452_v29   ;;  %7989 = vmatpush3.bf16.msra.mxu1 %v9267_v59 }
  0xfb   : > { %v8362_v38 = vpop.eup %8361  ;;  %v1293_v39 = vadd.f32 %v9229_v16, %v1158_v34  ;;  %7991 = vmatprep.subr.bf16.mxu1 %v7990_v33 }
  0xfc   : > { %v1315_v40 = vadd.f32 %v9229_v16, %v1180_v35  ;;  %v8364_v43 = vpop.eup %8363  ;;  %v708_v44 = vpop.permute.xlu1 %707  ;;  %7316 = vmatprep.mubr.msk.f32.mxu0 %vm1517_vm0, %v8362_v38 }
  0xfd   : > { %v818_v45 = vpop.permute.xlu0 %817  ;;  %8373 = vtanh.f32 %v1293_v39  ;;  %v1159_v47 = vmul.f32 %v9222_v13, %v708_v44  ;;  %7349 = vmatprep.mubr.msk.f32.mxu1 %vm1517_vm0, %v8364_v43  ;;  %1062 = vperm.xlu1 %8268, %v455_v41  }
  0xfe   : > { %v1181_v48 = vmul.f32 %v9222_v13, %v818_v45  ;;  %8375 = vtanh.f32 %v1315_v40  ;;  %1057 = vperm.xlu0 %8267, %v454_v42   ;;  %7993 = vmatpush3.bf16.msra.mxu1 %v7990_v33 }
  0xff   : > { %v8366_v59 = vpop.eup %8365  ;;  %v1294_v49 = vadd.f32 %v9229_v16, %v1159_v47  ;;  %7995 = vmatprep.subr.bf16.mxu1 %v7994_v46 }
 0x100   : > { %v1316_v50 = vadd.f32 %v9229_v16, %v1181_v48  ;;  %v8368_v53 = vpop.eup %8367  ;;  %v713_v54 = vpop.permute.xlu1 %712  ;;  %7317 = vmatmul.mubr.msk.f32.gmra.mrb[44].mxu0 %vm1517_vm0, %v8366_v59 }
 0x101   : > { %v823_v55 = vpop.permute.xlu0 %822  ;;  %8377 = vtanh.f32 %v1294_v49  ;;  %v1160_v56 = vmul.f32 %v9222_v13, %v713_v54  ;;  %7350 = vmatmul.mubr.msk.f32.gmra.mrb[2].mxu1 %vm1517_vm0, %v8368_v53  ;;  %1072 = vperm.xlu1 %8268, %v457_v51  }
 0x102   : > { %v1182_v57 = vmul.f32 %v9222_v13, %v823_v55  ;;  %8379 = vtanh.f32 %v1316_v50  ;;  %1067 = vperm.xlu0 %8267, %v456_v52   ;;  %7997 = vmatpush3.bf16.msra.mxu1 %v7994_v46 }
 0x103   : > { %v8370_v58 = vpop.eup %8369  ;;  %v1295_v60 = vadd.f32 %v9229_v16, %v1160_v56  ;;  %7999 = vmatprep.subr.bf16.mxu1 %v7998_v12 }
 0x104   : > { %v1317_v61 = vadd.f32 %v9229_v16, %v1182_v57  ;;  %v8372_v0 = vpop.eup %8371  ;;  %v718_v1 = vpop.permute.xlu1 %717  ;;  %7319 = vmatprep.mubr.msk.f32.mxu0 %vm1517_vm0, %v8370_v58 }
 0x105   : > { %v828_v2 = vpop.permute.xlu0 %827  ;;  %8381 = vtanh.f32 %v1295_v60  ;;  %v1161_v3 = vmul.f32 %v9222_v13, %v718_v1  ;;  %7352 = vmatprep.mubr.msk.f32.mxu1 %vm1517_vm0, %v8372_v0  ;;  %1082 = vperm.xlu1 %8268, %v459_v62  }
 0x106   : > { %v1183_v4 = vmul.f32 %v9222_v13, %v828_v2  ;;  %8383 = vtanh.f32 %v1317_v61  ;;  %1077 = vperm.xlu0 %8267, %v458_v63   ;;  %8001 = vmatpush3.bf16.msra.mxu1 %v7998_v12 }
 0x107   : > { %v8374_v7 = vpop.eup %8373  ;;  %v1296_v8 = vadd.f32 %v9229_v16, %v1161_v3 }
 0x108   : > { %v1318_v9 = vadd.f32 %v9229_v16, %v1183_v4  ;;  %v8376_v14 = vpop.eup %8375  ;;  %v723_v15 = vpop.permute.xlu1 %722  ;;  %7320 = vmatmul.mubr.msk.f32.gmra.mrb[46].mxu0 %vm1517_vm0, %v8374_v7 }
 0x109   : > { %v833_v17 = vpop.permute.xlu0 %832  ;;  %8385 = vtanh.f32 %v1296_v8  ;;  %v1162_v18 = vmul.f32 %v9222_v13, %v723_v15  ;;  %7353 = vmatmul.mubr.msk.f32.gmra.mrb[4].mxu1 %vm1517_vm0, %v8376_v14  ;;  %1092 = vperm.xlu1 %8268, %v461_v10  }
 0x10a   : > { %v1184_v19 = vmul.f32 %v9222_v13, %v833_v17  ;;  %8387 = vtanh.f32 %v1318_v9  ;;  %1087 = vperm.xlu0 %8267, %v460_v11  }
 0x10b   : > { %v8378_v20 = vpop.eup %8377  ;;  %v1297_v21 = vadd.f32 %v9229_v16, %v1162_v18 }
 0x10c   : > { %v1319_v22 = vadd.f32 %v9229_v16, %v1184_v19  ;;  %v8380_v25 = vpop.eup %8379  ;;  %v728_v26 = vpop.permute.xlu1 %727  ;;  %7322 = vmatprep.mubr.msk.f32.mxu0 %vm1517_vm0, %v8378_v20  ;;  %v9506_v16 = vld [vmem:[%s10793_s2] ss:$0 sm:$0xff] }
 0x10d   : > { %v838_v27 = vpop.permute.xlu0 %837  ;;  %8389 = vtanh.f32 %v1297_v21  ;;  %v1163_v28 = vmul.f32 %v9222_v13, %v728_v26  ;;  %7355 = vmatprep.mubr.msk.f32.mxu1 %vm1517_vm0, %v8380_v25  ;;  %1102 = vperm.xlu1 %8268, %v463_v23  }
 0x10e   : > { %v1185_v29 = vmul.f32 %v9222_v13, %v838_v27  ;;  %8391 = vtanh.f32 %v1319_v22  ;;  %1097 = vperm.xlu0 %8267, %v462_v24   ;;  %v9514_v13 = vld [vmem:[%s10792_s1] ss:$0 sm:$0xff] }
 0x10f   : > { %v8382_v30 = vpop.eup %8381  ;;  %v1298_v31 = vadd.f32 %v9506_v16, %v1163_v28 }
 0x110   : > { %v1320_v32 = vadd.f32 %v9506_v16, %v1185_v29  ;;  %v8384_v33 = vpop.eup %8383  ;;  %v733_v34 = vpop.permute.xlu1 %732  ;;  %7323 = vmatmul.mubr.msk.f32.gmra.mrb[48].mxu0 %vm1517_vm0, %v8382_v30 }
 0x111   : > { %v843_v35 = vpop.permute.xlu0 %842  ;;  %8393 = vtanh.f32 %v1298_v31  ;;  %v1164_v36 = vmul.f32 %v9514_v13, %v733_v34  ;;  %7356 = vmatmul.mubr.msk.f32.gmra.mrb[6].mxu1 %vm1517_vm0, %v8384_v33 }
 0x112   : > { %v1186_v37 = vmul.f32 %v9514_v13, %v843_v35  ;;  %8395 = vtanh.f32 %v1320_v32 }
 0x113   : > { %v8386_v38 = vpop.eup %8385  ;;  %v1299_v39 = vadd.f32 %v9506_v16, %v1164_v36 }
 0x114   : > { %v1321_v40 = vadd.f32 %v9506_v16, %v1186_v37  ;;  %v8388_v41 = vpop.eup %8387  ;;  %v738_v42 = vpop.permute.xlu1 %737  ;;  %7325 = vmatprep.mubr.msk.f32.mxu0 %vm1517_vm0, %v8386_v38 }
 0x115   : > { %v848_v43 = vpop.permute.xlu0 %847  ;;  %8397 = vtanh.f32 %v1299_v39  ;;  %v1165_v44 = vmul.f32 %v9514_v13, %v738_v42  ;;  %7358 = vmatprep.mubr.msk.f32.mxu1 %vm1517_vm0, %v8388_v41 }
 0x116   : > { %v1187_v45 = vmul.f32 %v9514_v13, %v848_v43  ;;  %8399 = vtanh.f32 %v1321_v40 }
 0x117   : > { %v8390_v46 = vpop.eup %8389  ;;  %v1300_v47 = vadd.f32 %v9506_v16, %v1165_v44 }
 0x118   : > { %v1322_v48 = vadd.f32 %v9506_v16, %v1187_v45  ;;  %v8392_v59 = vpop.eup %8391  ;;  %v743_v49 = vpop.permute.xlu1 %742  ;;  %7326 = vmatmul.mubr.msk.f32.gmra.mrb[50].mxu0 %vm1517_vm0, %v8390_v46 }
 0x119   : > { %v853_v50 = vpop.permute.xlu0 %852  ;;  %8401 = vtanh.f32 %v1300_v47  ;;  %v1166_v51 = vmul.f32 %v9514_v13, %v743_v49  ;;  %7359 = vmatmul.mubr.msk.f32.gmra.mrb[8].mxu1 %vm1517_vm0, %v8392_v59 }
 0x11a   : > { %v1188_v52 = vmul.f32 %v9514_v13, %v853_v50  ;;  %8403 = vtanh.f32 %v1322_v48 }
 0x11b   : > { %v8394_v53 = vpop.eup %8393  ;;  %v1301_v54 = vadd.f32 %v9506_v16, %v1166_v51 }
 0x11c   : > { %v1323_v55 = vadd.f32 %v9506_v16, %v1188_v52  ;;  %v8396_v56 = vpop.eup %8395  ;;  %v748_v57 = vpop.permute.xlu1 %747  ;;  %7328 = vmatprep.mubr.msk.f32.mxu0 %vm1517_vm0, %v8394_v53 }
 0x11d   : > { %v858_v58 = vpop.permute.xlu0 %857  ;;  %8405 = vtanh.f32 %v1301_v54  ;;  %v1167_v60 = vmul.f32 %v9514_v13, %v748_v57  ;;  %7361 = vmatprep.mubr.msk.f32.mxu1 %vm1517_vm0, %v8396_v56 }
 0x11e   : > { %v1189_v61 = vmul.f32 %v9514_v13, %v858_v58  ;;  %8407 = vtanh.f32 %v1323_v55 }
 0x11f   : > { %v8398_v62 = vpop.eup %8397  ;;  %v1302_v63 = vadd.f32 %v9506_v16, %v1167_v60 }
 0x120   : > { %v1324_v0 = vadd.f32 %v9506_v16, %v1189_v61  ;;  %v8400_v1 = vpop.eup %8399  ;;  %v753_v2 = vpop.permute.xlu1 %752  ;;  %7329 = vmatmul.mubr.msk.f32.gmra.mrb[52].mxu0 %vm1517_vm0, %v8398_v62 }
 0x121   : > { %8409 = vtanh.f32 %v1302_v63  ;;  %v1168_v3 = vmul.f32 %v9514_v13, %v753_v2  ;;  %7362 = vmatmul.mubr.msk.f32.gmra.mrb[10].mxu1 %vm1517_vm0, %v8400_v1  ;;  %v863_v4 = vpop.permute.xlu0 %862 }
 0x122   : > { %8411 = vtanh.f32 %v1324_v0  ;;  %v1190_v5 = vmul.f32 %v9514_v13, %v863_v4 }
 0x123   : > { %v8402_v6 = vpop.eup %8401  ;;  %v1303_v7 = vadd.f32 %v9506_v16, %v1168_v3 }
 0x124   : > { %v8404_v8 = vpop.eup %8403  ;;  %v1325_v9 = vadd.f32 %v9506_v16, %v1190_v5  ;;  %v758_v10 = vpop.permute.xlu1 %757  ;;  %7331 = vmatprep.mubr.msk.f32.mxu0 %vm1517_vm0, %v8402_v6 }
 0x125   : > { %8413 = vtanh.f32 %v1303_v7  ;;  %v1169_v11 = vmul.f32 %v9514_v13, %v758_v10  ;;  %7364 = vmatprep.mubr.msk.f32.mxu1 %vm1517_vm0, %v8404_v8  ;;  %v868_v12 = vpop.permute.xlu0 %867 }
 0x126   : > { %8415 = vtanh.f32 %v1325_v9  ;;  %v1191_v14 = vmul.f32 %v9514_v13, %v868_v12 }
 0x127   : > { %v8406_v15 = vpop.eup %8405  ;;  %v1304_v17 = vadd.f32 %v9506_v16, %v1169_v11 }
 0x128   : > { %v8408_v18 = vpop.eup %8407  ;;  %v1326_v19 = vadd.f32 %v9506_v16, %v1191_v14  ;;  %v763_v20 = vpop.permute.xlu1 %762  ;;  %7332 = vmatmul.mubr.msk.f32.gmra.mrb[54].mxu0 %vm1517_vm0, %v8406_v15 }
 0x129   : > { %8417 = vtanh.f32 %v1304_v17  ;;  %v1170_v21 = vmul.f32 %v9514_v13, %v763_v20  ;;  %7365 = vmatmul.mubr.msk.f32.gmra.mrb[12].mxu1 %vm1517_vm0, %v8408_v18  ;;  %v873_v22 = vpop.permute.xlu0 %872 }
 0x12a   : > { %8419 = vtanh.f32 %v1326_v19  ;;  %v1192_v23 = vmul.f32 %v9514_v13, %v873_v22 }
 0x12b   : > { %v8410_v24 = vpop.eup %8409  ;;  %v1305_v25 = vadd.f32 %v9506_v16, %v1170_v21 }
 0x12c   : > { %v8412_v26 = vpop.eup %8411  ;;  %v1327_v27 = vadd.f32 %v9506_v16, %v1192_v23  ;;  %v768_v28 = vpop.permute.xlu1 %767  ;;  %7334 = vmatprep.mubr.msk.f32.mxu0 %vm1517_vm0, %v8410_v24 }
 0x12d   : > { %8421 = vtanh.f32 %v1305_v25  ;;  %v1171_v29 = vmul.f32 %v9514_v13, %v768_v28  ;;  %7367 = vmatprep.mubr.msk.f32.mxu1 %vm1517_vm0, %v8412_v26  ;;  %v878_v30 = vpop.permute.xlu0 %877 }
 0x12e   : > { %8423 = vtanh.f32 %v1327_v27  ;;  %v1193_v31 = vmul.f32 %v9514_v13, %v878_v30 }
 0x12f   : > { %v8414_v32 = vpop.eup %8413  ;;  %v1306_v33 = vadd.f32 %v9506_v16, %v1171_v29 }
 0x130   : > { %v8416_v34 = vpop.eup %8415  ;;  %v1328_v35 = vadd.f32 %v9506_v16, %v1193_v31  ;;  %v773_v36 = vpop.permute.xlu1 %772  ;;  %7335 = vmatmul.mubr.msk.f32.gmra.mrb[56].mxu0 %vm1517_vm0, %v8414_v32 }
 0x131   : > { %8425 = vtanh.f32 %v1306_v33  ;;  %v1172_v37 = vmul.f32 %v9514_v13, %v773_v36  ;;  %7368 = vmatmul.mubr.msk.f32.gmra.mrb[14].mxu1 %vm1517_vm0, %v8416_v34  ;;  %v883_v38 = vpop.permute.xlu0 %882 }
 0x132   : > { %8427 = vtanh.f32 %v1328_v35  ;;  %v1194_v39 = vmul.f32 %v9514_v13, %v883_v38 }
 0x133   : > { %v8418_v40 = vpop.eup %8417  ;;  %v1307_v41 = vadd.f32 %v9506_v16, %v1172_v37 }
 0x134   : > { %v8420_v42 = vpop.eup %8419  ;;  %v1329_v43 = vadd.f32 %v9506_v16, %v1194_v39  ;;  %v778_v44 = vpop.permute.xlu1 %777  ;;  %7337 = vmatprep.mubr.msk.f32.mxu0 %vm1517_vm0, %v8418_v40 }
 0x135   : > { %8429 = vtanh.f32 %v1307_v41  ;;  %v1173_v45 = vmul.f32 %v9514_v13, %v778_v44  ;;  %7370 = vmatprep.mubr.msk.f32.mxu1 %vm1517_vm0, %v8420_v42  ;;  %v888_v46 = vpop.permute.xlu0 %887 }
 0x136   : > { %8431 = vtanh.f32 %v1329_v43  ;;  %v1195_v47 = vmul.f32 %v9514_v13, %v888_v46 }
 0x137   : > { %v8422_v48 = vpop.eup %8421  ;;  %v1308_v59 = vadd.f32 %v9506_v16, %v1173_v45 }
 0x138   : > { %v8424_v49 = vpop.eup %8423  ;;  %v1330_v50 = vadd.f32 %v9506_v16, %v1195_v47  ;;  %v783_v51 = vpop.permute.xlu1 %782  ;;  %7338 = vmatmul.mubr.msk.f32.gmra.mrb[58].mxu0 %vm1517_vm0, %v8422_v48 }
 0x139   : > { %8433 = vtanh.f32 %v1308_v59  ;;  %v1174_v52 = vmul.f32 %v9514_v13, %v783_v51  ;;  %7371 = vmatmul.mubr.msk.f32.gmra.mrb[16].mxu1 %vm1517_vm0, %v8424_v49  ;;  %v893_v53 = vpop.permute.xlu0 %892 }
 0x13a   : > { %8435 = vtanh.f32 %v1330_v50  ;;  %v1196_v54 = vmul.f32 %v9514_v13, %v893_v53 }
 0x13b   : > { %v8426_v55 = vpop.eup %8425  ;;  %v1309_v56 = vadd.f32 %v9506_v16, %v1174_v52 }
 0x13c   : > { %v8428_v57 = vpop.eup %8427  ;;  %v1331_v58 = vadd.f32 %v9506_v16, %v1196_v54  ;;  %v903_v60 = vpop.permute.xlu1 %902  ;;  %7340 = vmatprep.mubr.msk.f32.mxu0 %vm1517_vm0, %v8426_v55 }
 0x13d   : > { %8437 = vtanh.f32 %v1309_v56  ;;  %v1198_v61 = vmul.f32 %v9514_v13, %v903_v60  ;;  %7373 = vmatprep.mubr.msk.f32.mxu1 %vm1517_vm0, %v8428_v57  ;;  %v898_v62 = vpop.permute.xlu0 %897 }
 0x13e   : > { %8439 = vtanh.f32 %v1331_v58  ;;  %v1197_v63 = vmul.f32 %v9514_v13, %v898_v62 }
 0x13f   : > { %v8430_v0 = vpop.eup %8429  ;;  %v1333_v1 = vadd.f32 %v9506_v16, %v1198_v61 }
 0x140   : > { %v8432_v2 = vpop.eup %8431  ;;  %v1332_v3 = vadd.f32 %v9506_v16, %v1197_v63  ;;  %v913_v4 = vpop.permute.xlu1 %912  ;;  %7341 = vmatmul.mubr.msk.f32.gmra.mrb[60].mxu0 %vm1517_vm0, %v8430_v0 }
 0x141   : > { %8441 = vtanh.f32 %v1333_v1  ;;  %v1200_v5 = vmul.f32 %v9514_v13, %v913_v4  ;;  %7374 = vmatmul.mubr.msk.f32.gmra.mrb[18].mxu1 %vm1517_vm0, %v8432_v2  ;;  %v908_v6 = vpop.permute.xlu0 %907 }
 0x142   : > { %8443 = vtanh.f32 %v1332_v3  ;;  %v1199_v7 = vmul.f32 %v9514_v13, %v908_v6 }
 0x143   : > { %v8434_v8 = vpop.eup %8433  ;;  %v1335_v9 = vadd.f32 %v9506_v16, %v1200_v5 }
 0x144   : > { %v8436_v10 = vpop.eup %8435  ;;  %v1334_v11 = vadd.f32 %v9506_v16, %v1199_v7  ;;  %v923_v12 = vpop.permute.xlu1 %922  ;;  %7343 = vmatprep.mubr.msk.f32.mxu0 %vm1517_vm0, %v8434_v8 }
 0x145   : > { %8445 = vtanh.f32 %v1335_v9  ;;  %v1202_v14 = vmul.f32 %v9514_v13, %v923_v12  ;;  %7376 = vmatprep.mubr.msk.f32.mxu1 %vm1517_vm0, %v8436_v10  ;;  %v918_v15 = vpop.permute.xlu0 %917 }
 0x146   : > { %8447 = vtanh.f32 %v1334_v11  ;;  %v1201_v17 = vmul.f32 %v9514_v13, %v918_v15 }
 0x147   : > { %v8438_v18 = vpop.eup %8437  ;;  %v1337_v19 = vadd.f32 %v9506_v16, %v1202_v14 }
 0x148   : > { %v8440_v20 = vpop.eup %8439  ;;  %v1336_v21 = vadd.f32 %v9506_v16, %v1201_v17  ;;  %v933_v22 = vpop.permute.xlu1 %932  ;;  %7344 = vmatmul.mubr.msk.f32.gmra.mrb[62].mxu0 %vm1517_vm0, %v8438_v18 }
 0x149   : > { %8449 = vtanh.f32 %v1337_v19  ;;  %v1204_v23 = vmul.f32 %v9514_v13, %v933_v22  ;;  %7377 = vmatmul.mubr.msk.f32.gmra.mrb[20].mxu1 %vm1517_vm0, %v8440_v20  ;;  %v928_v24 = vpop.permute.xlu0 %927 }
 0x14a   : > { %8451 = vtanh.f32 %v1336_v21  ;;  %v1203_v25 = vmul.f32 %v9514_v13, %v928_v24 }
 0x14b   : > { %v8442_v26 = vpop.eup %8441  ;;  %v1339_v27 = vadd.f32 %v9506_v16, %v1204_v23 }
 0x14c   : > { %v8444_v28 = vpop.eup %8443  ;;  %v1338_v29 = vadd.f32 %v9506_v16, %v1203_v25  ;;  %v943_v30 = vpop.permute.xlu1 %942 }
 0x14d   : > { %8453 = vtanh.f32 %v1339_v27  ;;  %v1206_v31 = vmul.f32 %v9514_v13, %v943_v30  ;;  %7379 = vmatprep.mubr.msk.f32.mxu1 %vm1517_vm0, %v8444_v28  ;;  %v938_v32 = vpop.permute.xlu0 %937 }
 0x14e   : > { %8455 = vtanh.f32 %v1338_v29  ;;  %v1205_v33 = vmul.f32 %v9514_v13, %v938_v32  ;;  %7380 = vmatmul.mubr.msk.f32.gmra.mrb[22].mxu1 %vm1517_vm0, %v8442_v26 }
 0x14f   : > { %v8446_v34 = vpop.eup %8445  ;;  %v1341_v35 = vadd.f32 %v9506_v16, %v1206_v31 }
 0x150   : > { %v8448_v36 = vpop.eup %8447  ;;  %v1340_v37 = vadd.f32 %v9506_v16, %v1205_v33  ;;  %v953_v38 = vpop.permute.xlu1 %952 }
 0x151   : > { %8457 = vtanh.f32 %v1341_v35  ;;  %v1208_v39 = vmul.f32 %v9514_v13, %v953_v38  ;;  %7382 = vmatprep.mubr.msk.f32.mxu1 %vm1517_vm0, %v8448_v36  ;;  %v948_v40 = vpop.permute.xlu0 %947 }
 0x152   : > { %8459 = vtanh.f32 %v1340_v37  ;;  %v1207_v41 = vmul.f32 %v9514_v13, %v948_v40  ;;  %7383 = vmatmul.mubr.msk.f32.gmra.mrb[24].mxu1 %vm1517_vm0, %v8446_v34 }
 0x153   : > { %v8450_v42 = vpop.eup %8449  ;;  %v1343_v43 = vadd.f32 %v9506_v16, %v1208_v39 }
 0x154   : > { %v8452_v44 = vpop.eup %8451  ;;  %v1342_v45 = vadd.f32 %v9506_v16, %v1207_v41  ;;  %v963_v46 = vpop.permute.xlu1 %962 }
 0x155   : > { %8461 = vtanh.f32 %v1343_v43  ;;  %v1210_v47 = vmul.f32 %v9514_v13, %v963_v46  ;;  %7385 = vmatprep.mubr.msk.f32.mxu1 %vm1517_vm0, %v8452_v44  ;;  %v958_v48 = vpop.permute.xlu0 %957 }
 0x156   : > { %8463 = vtanh.f32 %v1342_v45  ;;  %v1209_v59 = vmul.f32 %v9514_v13, %v958_v48  ;;  %7386 = vmatmul.mubr.msk.f32.gmra.mrb[26].mxu1 %vm1517_vm0, %v8450_v42 }
 0x157   : > { %v8454_v49 = vpop.eup %8453  ;;  %v1345_v50 = vadd.f32 %v9506_v16, %v1210_v47 }
 0x158   : > { %v8456_v51 = vpop.eup %8455  ;;  %v1344_v52 = vadd.f32 %v9506_v16, %v1209_v59  ;;  %v973_v53 = vpop.permute.xlu1 %972 }
 0x159   : > { %8465 = vtanh.f32 %v1345_v50  ;;  %v1212_v54 = vmul.f32 %v9514_v13, %v973_v53  ;;  %7388 = vmatprep.mubr.msk.f32.mxu1 %vm1517_vm0, %v8456_v51  ;;  %v968_v55 = vpop.permute.xlu0 %967 }
 0x15a   : > { %8467 = vtanh.f32 %v1344_v52  ;;  %v1211_v56 = vmul.f32 %v9514_v13, %v968_v55  ;;  %7389 = vmatmul.mubr.msk.f32.gmra.mrb[28].mxu1 %vm1517_vm0, %v8454_v49 }
 0x15b   : > { %v8458_v57 = vpop.eup %8457  ;;  %v1347_v58 = vadd.f32 %v9506_v16, %v1212_v54 }
 0x15c   : > { %v8460_v60 = vpop.eup %8459  ;;  %v1346_v61 = vadd.f32 %v9506_v16, %v1211_v56  ;;  %v983_v62 = vpop.permute.xlu1 %982 }
 0x15d   : > { %8469 = vtanh.f32 %v1347_v58  ;;  %v1214_v63 = vmul.f32 %v9514_v13, %v983_v62  ;;  %7391 = vmatprep.mubr.msk.f32.mxu1 %vm1517_vm0, %v8460_v60  ;;  %v978_v0 = vpop.permute.xlu0 %977 }
 0x15e   : > { %8471 = vtanh.f32 %v1346_v61  ;;  %v1213_v1 = vmul.f32 %v9514_v13, %v978_v0  ;;  %7392 = vmatmul.mubr.msk.f32.gmra.mrb[30].mxu1 %vm1517_vm0, %v8458_v57 }
 0x15f   : > { %v8462_v2 = vpop.eup %8461  ;;  %v1349_v3 = vadd.f32 %v9506_v16, %v1214_v63 }
 0x160   : > { %v8464_v4 = vpop.eup %8463  ;;  %v1348_v5 = vadd.f32 %v9506_v16, %v1213_v1  ;;  %v993_v6 = vpop.permute.xlu1 %992 }
 0x161   : > { %8473 = vtanh.f32 %v1349_v3  ;;  %v1216_v7 = vmul.f32 %v9514_v13, %v993_v6  ;;  %7394 = vmatprep.mubr.msk.f32.mxu1 %vm1517_vm0, %v8464_v4  ;;  %v988_v8 = vpop.permute.xlu0 %987 }
 0x162   : > { %8475 = vtanh.f32 %v1348_v5  ;;  %v1215_v9 = vmul.f32 %v9514_v13, %v988_v8  ;;  %7395 = vmatmul.mubr.msk.f32.gmra.mrb[32].mxu1 %vm1517_vm0, %v8462_v2 }
 0x163   : > { %v8466_v10 = vpop.eup %8465  ;;  %v1351_v11 = vadd.f32 %v9506_v16, %v1216_v7 }
 0x164   : > { %v8468_v12 = vpop.eup %8467  ;;  %v1350_v14 = vadd.f32 %v9506_v16, %v1215_v9  ;;  %v1003_v15 = vpop.permute.xlu1 %1002 }
 0x165   : > { %8477 = vtanh.f32 %v1351_v11  ;;  %v1218_v17 = vmul.f32 %v9514_v13, %v1003_v15  ;;  %7397 = vmatprep.mubr.msk.f32.mxu1 %vm1517_vm0, %v8468_v12  ;;  %v998_v18 = vpop.permute.xlu0 %997 }
 0x166   : > { %8479 = vtanh.f32 %v1350_v14  ;;  %v1217_v19 = vmul.f32 %v9514_v13, %v998_v18  ;;  %7398 = vmatmul.mubr.msk.f32.gmra.mrb[34].mxu1 %vm1517_vm0, %v8466_v10 }
 0x167   : > { %v8470_v20 = vpop.eup %8469  ;;  %v1353_v21 = vadd.f32 %v9506_v16, %v1218_v17 }
 0x168   : > { %v8472_v22 = vpop.eup %8471  ;;  %v1352_v23 = vadd.f32 %v9506_v16, %v1217_v19  ;;  %v1013_v24 = vpop.permute.xlu1 %1012 }
 0x169   : > { %8481 = vtanh.f32 %v1353_v21  ;;  %v1220_v25 = vmul.f32 %v9514_v13, %v1013_v24  ;;  %7400 = vmatprep.mubr.msk.f32.mxu1 %vm1517_vm0, %v8472_v22  ;;  %v1008_v26 = vpop.permute.xlu0 %1007 }
 0x16a   : > { %8483 = vtanh.f32 %v1352_v23  ;;  %v1219_v27 = vmul.f32 %v9514_v13, %v1008_v26  ;;  %7401 = vmatmul.mubr.msk.f32.gmra.mrb[36].mxu1 %vm1517_vm0, %v8470_v20 }
 0x16b   : > { %v8474_v28 = vpop.eup %8473  ;;  %v1355_v29 = vadd.f32 %v9506_v16, %v1220_v25 }
 0x16c   : > { %v8476_v30 = vpop.eup %8475  ;;  %v1354_v31 = vadd.f32 %v9506_v16, %v1219_v27  ;;  %v1023_v32 = vpop.permute.xlu1 %1022 }
 0x16d   : > { %8485 = vtanh.f32 %v1355_v29  ;;  %v1222_v33 = vmul.f32 %v9514_v13, %v1023_v32  ;;  %7403 = vmatprep.mubr.msk.f32.mxu1 %vm1517_vm0, %v8476_v30  ;;  %v1018_v34 = vpop.permute.xlu0 %1017 }
 0x16e   : > { %8487 = vtanh.f32 %v1354_v31  ;;  %v1221_v35 = vmul.f32 %v9514_v13, %v1018_v34  ;;  %7404 = vmatmul.mubr.msk.f32.gmra.mrb[38].mxu1 %vm1517_vm0, %v8474_v28 }
 0x16f   : > { %v8478_v36 = vpop.eup %8477  ;;  %v1357_v37 = vadd.f32 %v9506_v16, %v1222_v33 }
 0x170   : > { %v8480_v38 = vpop.eup %8479  ;;  %v1356_v39 = vadd.f32 %v9506_v16, %v1221_v35  ;;  %v1033_v40 = vpop.permute.xlu1 %1032 }
 0x171   : > { %8489 = vtanh.f32 %v1357_v37  ;;  %v1224_v41 = vmul.f32 %v9514_v13, %v1033_v40  ;;  %7406 = vmatprep.mubr.msk.f32.mxu1 %vm1517_vm0, %v8480_v38  ;;  %v1028_v42 = vpop.permute.xlu0 %1027 }
 0x172   : > { %8491 = vtanh.f32 %v1356_v39  ;;  %v1223_v43 = vmul.f32 %v9514_v13, %v1028_v42  ;;  %7407 = vmatmul.mubr.msk.f32.gmra.mrb[40].mxu1 %vm1517_vm0, %v8478_v36 }
 0x173   : > { %v8482_v44 = vpop.eup %8481  ;;  %v1359_v45 = vadd.f32 %v9506_v16, %v1224_v41 }
 0x174   : > { %v8484_v46 = vpop.eup %8483  ;;  %v1358_v47 = vadd.f32 %v9506_v16, %v1223_v43  ;;  %v1043_v48 = vpop.permute.xlu1 %1042 }
 0x175   : > { %8493 = vtanh.f32 %v1359_v45  ;;  %7409 = vmatprep.mubr.msk.f32.mxu1 %vm1517_vm0, %v8484_v46  ;;  %v1038_v59 = vpop.permute.xlu0 %1037  ;;  %v1226_v49 = vmul.f32 %v9514_v13, %v1043_v48 }
 0x176   : > { %8495 = vtanh.f32 %v1358_v47  ;;  %v1225_v50 = vmul.f32 %v9514_v13, %v1038_v59  ;;  %7410 = vmatmul.mubr.msk.f32.gmra.mrb[42].mxu1 %vm1517_vm0, %v8482_v44  ;;  %v9728_v47 = vld [vmem:[%s10795_s4] ss:$0 sm:$0xff] }
 0x177   : > { %v8486_v51 = vpop.eup %8485  ;;  %v1361_v53 = vadd.f32 %v9506_v16, %v1226_v49  ;;  %v9671_v55 = vpop.f32.mrb[0].mxu0 }
 0x178   : > { %v8488_v52 = vpop.eup %8487  ;;  %v1360_v54 = vadd.f32 %v9506_v16, %v1225_v50  ;;  %v1053_v56 = vpop.permute.xlu1 %1052 }
 0x179   : > { %v9673_v57 = vpop.f32.mrb[1].mxu0  ;;  %7412 = vmatprep.mubr.msk.f32.mxu1 %vm1517_vm0, %v8488_v52  ;;  %8497 = vtanh.f32 %v1361_v53  ;;  %v1228_v58 = vmul.f32 %v9514_v13, %v1053_v56  ;;  %v1048_v60 = vpop.permute.xlu0 %1047 }
 0x17a   : > { %7413 = vmatmul.mubr.msk.f32.gmra.mrb[44].mxu1 %vm1517_vm0, %v8486_v51  ;;  %8499 = vtanh.f32 %v1360_v54  ;;  %v1227_v62 = vmul.f32 %v9514_v13, %v1048_v60  ;;  %v1969_v54 = vadd.f32 %v9728_v47, %v9673_v57  ;;  %v1974_v60 = vadd.f32 %v9671_v55, %v9728_v47  ;;  %v6580_v55 = vld [vmem:[%s10798_s7 + $0x28] sm:$0xff] }
 0x17b   : > { %v8490_v61 = vpop.eup %8489  ;;  %v1363_v0 = vadd.f32 %v9506_v16, %v1228_v58  ;;  %v9680_v1 = vpop.f32.mrb[2].mxu0 }
 0x17c   : > { %v8492_v63 = vpop.eup %8491  ;;  %v1362_v2 = vadd.f32 %v9506_v16, %v1227_v62  ;;  %v1063_v3 = vpop.permute.xlu1 %1062 }
 0x17d   : > { %v9683_v4 = vpop.f32.mrb[3].mxu0  ;;  %7415 = vmatprep.mubr.msk.f32.mxu1 %vm1517_vm0, %v8492_v63  ;;  %8501 = vtanh.f32 %v1363_v0  ;;  %v1230_v5 = vmul.f32 %v9514_v13, %v1063_v3  ;;  %v1058_v6 = vpop.permute.xlu0 %1057  ;;  %v6579_v63 = vld [vmem:[%s10798_s7 + $0x20] sm:$0xff] }
 0x17e   : > { %7416 = vmatmul.mubr.msk.f32.gmra.mrb[46].mxu1 %vm1517_vm0, %v8490_v61  ;;  %8503 = vtanh.f32 %v1362_v2  ;;  %v1229_v8 = vmul.f32 %v9514_v13, %v1058_v6  ;;  %v1979_v57 = vadd.f32 %v9728_v47, %v9683_v4  ;;  %v1984_v2 = vadd.f32 %v9680_v1, %v9728_v47 }
 0x17f   : > { %v8494_v7 = vpop.eup %8493  ;;  %v1365_v10 = vadd.f32 %v9506_v16, %v1230_v5  ;;  %v9690_v11 = vpop.f32.mrb[4].mxu0  ;;  %v8002_v4 = vpack.c.bf16 %v6580_v55, %v6579_v63 }
 0x180   : > { %v8496_v9 = vpop.eup %8495  ;;  %v1364_v12 = vadd.f32 %v9506_v16, %v1229_v8  ;;  %v1073_v14 = vpop.permute.xlu1 %1072  ;;  %v1994_v1 = vadd.f32 %v9690_v11, %v9728_v47 }
 0x181   : > { %v9693_v15 = vpop.f32.mrb[5].mxu0  ;;  %7418 = vmatprep.mubr.msk.f32.mxu1 %vm1517_vm0, %v8496_v9  ;;  %8505 = vtanh.f32 %v1365_v10  ;;  %v1232_v17 = vmul.f32 %v9514_v13, %v1073_v14  ;;  %v1068_v18 = vpop.permute.xlu0 %1067  ;;  %8003 = vmatprep.subr.bf16.mxu0 %v8002_v4 }
 0x182   : > { %7419 = vmatmul.mubr.msk.f32.gmra.mrb[48].mxu1 %vm1517_vm0, %v8494_v7  ;;  %8507 = vtanh.f32 %v1364_v12  ;;  %v1231_v19 = vmul.f32 %v9514_v13, %v1068_v18  ;;  %v1989_v6 = vadd.f32 %v9728_v47, %v9693_v15  ;;  %8005 = vmatpush3.bf16.msra.mxu0 %v8002_v4 }
 0x183   : > { %v8498_v20 = vpop.eup %8497  ;;  %v1367_v21 = vadd.f32 %v9506_v16, %v1232_v17  ;;  %v9700_v22 = vpop.f32.mrb[6].mxu0 }
 0x184   : > { %v8500_v23 = vpop.eup %8499  ;;  %v1366_v24 = vadd.f32 %v9506_v16, %v1231_v19  ;;  %v1083_v25 = vpop.permute.xlu1 %1082  ;;  %v2004_v17 = vadd.f32 %v9700_v22, %v9728_v47 }
 0x185   : > { %v9703_v26 = vpop.f32.mrb[7].mxu0  ;;  %8509 = vtanh.f32 %v1367_v21  ;;  %v1234_v27 = vmul.f32 %v9514_v13, %v1083_v25  ;;  %7421 = vmatprep.mubr.msk.f32.mxu1 %vm1517_vm0, %v8500_v23  ;;  %v1078_v28 = vpop.permute.xlu0 %1077 }
 0x186   : > { %8511 = vtanh.f32 %v1366_v24  ;;  %v1233_v29 = vmul.f32 %v9514_v13, %v1078_v28  ;;  %7422 = vmatmul.mubr.msk.f32.gmra.mrb[50].mxu1 %vm1517_vm0, %v8498_v20  ;;  %v1999_v12 = vadd.f32 %v9728_v47, %v9703_v26 }
 0x187   : > { %v8502_v30 = vpop.eup %8501  ;;  %v1369_v31 = vadd.f32 %v9506_v16, %v1234_v27  ;;  %v9710_v32 = vpop.f32.mrb[8].mxu0 }
 0x188   : > { %v8504_v33 = vpop.eup %8503  ;;  %v1368_v34 = vadd.f32 %v9506_v16, %v1233_v29  ;;  %v1093_v35 = vpop.permute.xlu1 %1092  ;;  %v2014_v23 = vadd.f32 %v9710_v32, %v9728_v47 }
 0x189   : > { %v9713_v36 = vpop.f32.mrb[9].mxu0  ;;  %8513 = vtanh.f32 %v1369_v31  ;;  %v1236_v37 = vmul.f32 %v9514_v13, %v1093_v35  ;;  %7424 = vmatprep.mubr.msk.f32.mxu1 %vm1517_vm0, %v8504_v33  ;;  %v1088_v38 = vpop.permute.xlu0 %1087 }
 0x18a   : > { %8515 = vtanh.f32 %v1368_v34  ;;  %v1235_v39 = vmul.f32 %v9514_v13, %v1088_v38  ;;  %7425 = vmatmul.mubr.msk.f32.gmra.mrb[52].mxu1 %vm1517_vm0, %v8502_v30  ;;  %v2009_v18 = vadd.f32 %v9728_v47, %v9713_v36 }
 0x18b   : > { %v8506_v40 = vpop.eup %8505  ;;  %v1371_v41 = vadd.f32 %v9506_v16, %v1236_v37  ;;  %v9720_v42 = vpop.f32.mrb[10].mxu0 }
 0x18c   : > { %v8508_v43 = vpop.eup %8507  ;;  %v1370_v44 = vadd.f32 %v9506_v16, %v1235_v39  ;;  %v1103_v45 = vpop.permute.xlu1 %1102  ;;  %v2024_v28 = vadd.f32 %v9720_v42, %v9728_v47 }
 0x18d   : > { %v9723_v46 = vpop.f32.mrb[11].mxu0  ;;  %8517 = vtanh.f32 %v1371_v41  ;;  %v1238_v48 = vmul.f32 %v9514_v13, %v1103_v45  ;;  %7427 = vmatprep.mubr.msk.f32.mxu1 %vm1517_vm0, %v8508_v43  ;;  %v1098_v59 = vpop.permute.xlu0 %1097 }
 0x18e   : > { %8519 = vtanh.f32 %v1370_v44  ;;  %v1237_v49 = vmul.f32 %v9514_v13, %v1098_v59  ;;  %7428 = vmatmul.mubr.msk.f32.gmra.mrb[54].mxu1 %vm1517_vm0, %v8506_v40  ;;  %v2019_v24 = vadd.f32 %v9728_v47, %v9723_v46 }
 0x18f   : > { %v8510_v50 = vpop.eup %8509  ;;  %v1373_v51 = vadd.f32 %v9506_v16, %v1238_v48  ;;  %v9735_v52 = vpop.f32.mrb[12].mxu0 }
 0x190   : > { %v8512_v53 = vpop.eup %8511  ;;  %v1372_v56 = vadd.f32 %v9506_v16, %v1237_v49  ;;  %v9740_v58 = vpop.f32.mrb[13].mxu0  ;;  %v2034_v34 = vadd.f32 %v9735_v52, %v9728_v47 }
 0x191   : > { %8521 = vtanh.f32 %v1373_v51  ;;  %7430 = vmatprep.mubr.msk.f32.mxu1 %vm1517_vm0, %v8512_v53  ;;  %v2029_v30 = vadd.f32 %v9728_v47, %v9740_v58 }
 0x192   : > { %8523 = vtanh.f32 %v1372_v56  ;;  %7431 = vmatmul.mubr.msk.f32.gmra.mrb[56].mxu1 %vm1517_vm0, %v8510_v50 }
 0x193   : > { %v8514_v13 = vpop.eup %8513  ;;  %v9746_v61 = vpop.f32.mrb[14].mxu0  ;;  %8525 = vtanh.f32 %v1969_v54 }
 0x194   : > { %v8516_v62 = vpop.eup %8515  ;;  %v9750_v16 = vpop.f32.mrb[15].mxu0  ;;  %8527 = vtanh.f32 %v1974_v60  ;;  %v2044_v40 = vadd.f32 %v9746_v61, %v9728_v47 }
 0x195   : > { %7433 = vmatprep.mubr.msk.f32.mxu1 %vm1517_vm0, %v8516_v62  ;;  %8529 = vtanh.f32 %v1979_v57  ;;  %v2039_v36 = vadd.f32 %v9728_v47, %v9750_v16 }
 0x196   : > { %7434 = vmatmul.mubr.msk.f32.gmra.mrb[58].mxu1 %vm1517_vm0, %v8514_v13  ;;  %8531 = vtanh.f32 %v1984_v2 }
 0x197   : > { %v8518_v0 = vpop.eup %8517  ;;  %v9762_v3 = vpop.f32.mrb[16].mxu0  ;;  %8533 = vtanh.f32 %v1989_v6 }
 0x198   : > { %v8520_v5 = vpop.eup %8519  ;;  %v2048_v7 = vpop.f32.mrb[17].mxu0  ;;  %8535 = vtanh.f32 %v1994_v1  ;;  %v2054_v46 = vadd.f32 %v9762_v3, %v9728_v47 }
 0x199   : > { %7436 = vmatprep.mubr.msk.f32.mxu1 %vm1517_vm0, %v8520_v5  ;;  %8537 = vtanh.f32 %v1999_v12  ;;  %v2049_v42 = vadd.f32 %v9728_v47, %v2048_v7 }
 0x19a   : > { %7437 = vmatmul.mubr.msk.f32.gmra.mrb[60].mxu1 %vm1517_vm0, %v8518_v0  ;;  %8539 = vtanh.f32 %v2004_v17 }
 0x19b   : > { %v8522_v8 = vpop.eup %8521  ;;  %v9770_v9 = vpop.f32.mrb[18].mxu0  ;;  %8541 = vtanh.f32 %v2009_v18 }
 0x19c   : > { %v8524_v10 = vpop.eup %8523  ;;  %v2058_v14 = vpop.f32.mrb[19].mxu0  ;;  %8543 = vtanh.f32 %v2014_v23  ;;  %v2064_v52 = vadd.f32 %v9770_v9, %v9728_v47 }
 0x19d   : > { %7439 = vmatprep.mubr.msk.f32.mxu1 %vm1517_vm0, %v8524_v10  ;;  %v8526_v15 = vpop.eup %8525  ;;  %8545 = vtanh.f32 %v2019_v24  ;;  %v2059_v59 = vadd.f32 %v9728_v47, %v2058_v14 }
 0x19e   : > { %7440 = vmatmul.mubr.msk.f32.gmra.mrb[62].mxu1 %vm1517_vm0, %v8522_v8  ;;  %v8528_v20 = vpop.eup %8527  ;;  %8547 = vtanh.f32 %v2024_v28 }
 0x19f   : > { %7458 = vmatprep.mubr.msk.f32.mxu1 %vm1517_vm0, %v8526_v15  ;;  %v9779_v11 = vpop.f32.mrb[20].mxu0  ;;  %v8530_v21 = vpop.eup %8529  ;;  %8549 = vtanh.f32 %v2029_v30 }
 0x1a0   : > { %v2068_v19 = vpop.f32.mrb[21].mxu0  ;;  %v8532_v26 = vpop.eup %8531  ;;  %8551 = vtanh.f32 %v2034_v34  ;;  %v2074_v60 = vadd.f32 %v9779_v11, %v9728_v47 }
 0x1a1   : > { %v8534_v27 = vpop.eup %8533  ;;  %8553 = vtanh.f32 %v2039_v36  ;;  %v2069_v54 = vadd.f32 %v9728_v47, %v2068_v19 }
 0x1a2   : > { %7459 = vmatmul.mubr.msk.f32.vlgmr.msra.gmra.mrb[64].mxu1 %vm1517_vm0, %v8528_v20  ;;  %v8536_v32 = vpop.eup %8535  ;;  %8555 = vtanh.f32 %v2044_v40 }
 0x1a3   : > { %7461 = vmatprep.mubr.msk.f32.mxu1 %vm1517_vm0, %v8530_v21  ;;  %v9787_v22 = vpop.f32.mrb[22].mxu0  ;;  %v8538_v33 = vpop.eup %8537  ;;  %8557 = vtanh.f32 %v2049_v42 }
 0x1a4   : > { %v2078_v25 = vpop.f32.mrb[23].mxu0  ;;  %v8540_v38 = vpop.eup %8539  ;;  %8559 = vtanh.f32 %v2054_v46  ;;  %v2084_v55 = vadd.f32 %v9787_v22, %v9728_v47 }
 0x1a5   : > { %v8542_v39 = vpop.eup %8541  ;;  %8561 = vtanh.f32 %v2059_v59  ;;  %v2079_v62 = vadd.f32 %v9728_v47, %v2078_v25 }
 0x1a6   : > { %7462 = vmatmul.mubr.msk.f32.gmra.mrb[66].mxu1 %vm1517_vm0, %v8532_v26  ;;  %v8544_v44 = vpop.eup %8543  ;;  %8563 = vtanh.f32 %v2064_v52 }
 0x1a7   : > { %7464 = vmatprep.mubr.msk.f32.mxu1 %vm1517_vm0, %v8534_v27  ;;  %v9795_v29 = vpop.f32.mrb[24].mxu0  ;;  %v8546_v45 = vpop.eup %8545  ;;  %8565 = vtanh.f32 %v2069_v54 }
 0x1a8   : > { %v2088_v31 = vpop.f32.mrb[25].mxu0  ;;  %v8548_v50 = vpop.eup %8547  ;;  %8567 = vtanh.f32 %v2074_v60  ;;  %v2094_v6 = vadd.f32 %v9795_v29, %v9728_v47 }
 0x1a9   : > { %v8550_v51 = vpop.eup %8549  ;;  %8569 = vtanh.f32 %v2079_v62  ;;  %v2089_v2 = vadd.f32 %v9728_v47, %v2088_v31 }
 0x1aa   : > { %7465 = vmatmul.mubr.msk.f32.gmra.mrb[68].mxu1 %vm1517_vm0, %v8536_v32  ;;  %v8552_v58 = vpop.eup %8551  ;;  %8571 = vtanh.f32 %v2084_v55 }
 0x1ab   : > { %7467 = vmatprep.mubr.msk.f32.mxu1 %vm1517_vm0, %v8538_v33  ;;  %v9803_v35 = vpop.f32.mrb[26].mxu0  ;;  %v8554_v13 = vpop.eup %8553  ;;  %8573 = vtanh.f32 %v2089_v2 }
 0x1ac   : > { %v2098_v37 = vpop.f32.mrb[27].mxu0  ;;  %v8556_v16 = vpop.eup %8555  ;;  %8575 = vtanh.f32 %v2094_v6  ;;  %v2104_v12 = vadd.f32 %v9803_v35, %v9728_v47 }
 0x1ad   : > { %v8558_v63 = vpop.eup %8557  ;;  %v2099_v8 = vadd.f32 %v9728_v47, %v2098_v37  ;;  %v6581_v37 = vld [vmem:[%s10798_s7 + $0x30] sm:$0xff] }
 0x1ae   : > { %7468 = vmatmul.mubr.msk.f32.gmra.mrb[70].mxu1 %vm1517_vm0, %v8540_v38  ;;  %v8560_v4 = vpop.eup %8559  ;;  %v6582_v38 = vld [vmem:[%s10798_s7 + $0x38] sm:$0xff] }
 0x1af   : > { %7470 = vmatprep.mubr.msk.f32.mxu1 %vm1517_vm0, %v8542_v39  ;;  %v9811_v41 = vpop.f32.mrb[28].mxu0  ;;  %v8562_v5 = vpop.eup %8561  ;;  %8577 = vtanh.f32 %v2099_v8  ;;  %v8006_v40 = vpack.c.bf16 %v6582_v38, %v6581_v37 }
 0x1b0   : > { %v2108_v43 = vpop.f32.mrb[29].mxu0  ;;  %v8564_v9 = vpop.eup %8563  ;;  %8579 = vtanh.f32 %v2104_v12  ;;  %v2114_v19 = vadd.f32 %v9811_v41, %v9728_v47 }
 0x1b1   : > { %v8566_v10 = vpop.eup %8565  ;;  %v2109_v15 = vadd.f32 %v9728_v47, %v2108_v43  ;;  %8007 = vmatprep.subr.bf16.mxu0 %v8006_v40 }
 0x1b2   : > { %7471 = vmatmul.mubr.msk.f32.gmra.mrb[72].mxu1 %vm1517_vm0, %v8544_v44  ;;  %v8568_v11 = vpop.eup %8567  ;;  %8009 = vmatpush3.bf16.msra.mxu0 %v8006_v40 }
 0x1b3   : > { %7473 = vmatprep.mubr.msk.f32.mxu1 %vm1517_vm0, %v8546_v45  ;;  %v9818_v48 = vpop.f32.mrb[30].mxu0  ;;  %v8570_v18 = vpop.eup %8569  ;;  %8581 = vtanh.f32 %v2109_v15 }
 0x1b4   : > { %v2118_v49 = vpop.f32.mrb[31].mxu0  ;;  %v8572_v25 = vpop.eup %8571  ;;  %8583 = vtanh.f32 %v2114_v19  ;;  %v2124_v27 = vadd.f32 %v9818_v48, %v9728_v47 }
 0x1b5   : > { %v2119_v23 = vadd.f32 %v9728_v47, %v2118_v49  ;;  %v8574_v26 = vpop.eup %8573 }
 0x1b6   : > { %7474 = vmatmul.mubr.msk.f32.gmra.mrb[74].mxu1 %vm1517_vm0, %v8548_v50  ;;  %v8576_v29 = vpop.eup %8575 }
 0x1b7   : > { %7476 = vmatprep.mubr.msk.f32.mxu1 %vm1517_vm0, %v8550_v51  ;;  %v9825_v53 = vpop.f32.mrb[32].mxu0  ;;  %8585 = vtanh.f32 %v2119_v23 }
 0x1b8   : > { %v2128_v56 = vpop.f32.mrb[33].mxu0  ;;  %8587 = vtanh.f32 %v2124_v27  ;;  %v2134_v32 = vadd.f32 %v9825_v53, %v9728_v47 }
 0x1b9   : > { %v2129_v28 = vadd.f32 %v9728_v47, %v2128_v56  ;;  %v8578_v30 = vpop.eup %8577 }
 0x1ba   : > { %7477 = vmatmul.mubr.msk.f32.gmra.mrb[76].mxu1 %vm1517_vm0, %v8552_v58  ;;  %v8580_v39 = vpop.eup %8579 }
 0x1bb   : > { %7479 = vmatprep.mubr.msk.f32.mxu1 %vm1517_vm0, %v8554_v13  ;;  %v9832_v61 = vpop.f32.mrb[34].mxu0  ;;  %8589 = vtanh.f32 %v2129_v28 }
 0x1bc   : > { %v2138_v57 = vpop.f32.mrb[35].mxu0  ;;  %8591 = vtanh.f32 %v2134_v32  ;;  %v2144_v42 = vadd.f32 %v9832_v61, %v9728_v47 }
 0x1bd   : > { %v2139_v35 = vadd.f32 %v9728_v47, %v2138_v57  ;;  %v8582_v41 = vpop.eup %8581 }
 0x1be   : > { %7480 = vmatmul.mubr.msk.f32.gmra.mrb[78].mxu1 %vm1517_vm0, %v8556_v16  ;;  %v8584_v44 = vpop.eup %8583 }
 0x1bf   : > { %7482 = vmatprep.mubr.msk.f32.mxu1 %vm1517_vm0, %v8558_v63  ;;  %v9839_v0 = vpop.f32.mrb[36].mxu0  ;;  %8593 = vtanh.f32 %v2139_v35 }
 0x1c0   : > { %v9842_v3 = vpop.f32.mrb[37].mxu0  ;;  %8595 = vtanh.f32 %v2144_v42  ;;  %v2154_v48 = vadd.f32 %v9839_v0, %v9728_v47 }
 0x1c1   : > { %v2149_v43 = vadd.f32 %v9728_v47, %v9842_v3  ;;  %v8586_v45 = vpop.eup %8585 }
 0x1c2   : > { %7483 = vmatmul.mubr.msk.f32.gmra.mrb[80].mxu1 %vm1517_vm0, %v8560_v4  ;;  %v8588_v52 = vpop.eup %8587 }
 0x1c3   : > { %7485 = vmatprep.mubr.msk.f32.mxu1 %vm1517_vm0, %v8562_v5  ;;  %v9848_v7 = vpop.f32.mrb[38].mxu0  ;;  %8597 = vtanh.f32 %v2149_v43 }
 0x1c4   : > { %v9851_v1 = vpop.f32.mrb[39].mxu0  ;;  %8599 = vtanh.f32 %v2154_v48  ;;  %v2164_v54 = vadd.f32 %v9848_v7, %v9728_v47 }
 0x1c5   : > { %v2159_v50 = vadd.f32 %v9728_v47, %v9851_v1  ;;  %v8590_v53 = vpop.eup %8589 }
 0x1c6   : > { %7486 = vmatmul.mubr.msk.f32.gmra.mrb[82].mxu1 %vm1517_vm0, %v8564_v9  ;;  %v8592_v58 = vpop.eup %8591 }
 0x1c7   : > { %7488 = vmatprep.mubr.msk.f32.mxu1 %vm1517_vm0, %v8566_v10  ;;  %v9857_v14 = vpop.f32.mrb[40].mxu0  ;;  %8601 = vtanh.f32 %v2159_v50 }
 0x1c8   : > { %v9860_v17 = vpop.f32.mrb[41].mxu0  ;;  %8603 = vtanh.f32 %v2164_v54  ;;  %v2174_v61 = vadd.f32 %v9857_v14, %v9728_v47 }
 0x1c9   : > { %v2169_v56 = vadd.f32 %v9728_v47, %v9860_v17  ;;  %v8594_v13 = vpop.eup %8593 }
 0x1ca   : > { %7489 = vmatmul.mubr.msk.f32.gmra.mrb[84].mxu1 %vm1517_vm0, %v8568_v11  ;;  %v8596_v55 = vpop.eup %8595 }
 0x1cb   : > { %7491 = vmatprep.mubr.msk.f32.mxu1 %vm1517_vm0, %v8570_v18  ;;  %v9866_v20 = vpop.f32.mrb[42].mxu0  ;;  %8605 = vtanh.f32 %v2169_v56 }
 0x1cc   : > { %v9868_v21 = vpop.f32.mrb[0].mxu1  ;;  %v9871_v22 = vpop.f32.mrb[43].mxu0  ;;  %8607 = vtanh.f32 %v2174_v61  ;;  %v2184_v2 = vadd.f32 %v9866_v20, %v9728_v47 }
 0x1cd   : > { %v9873_v24 = vpop.f32.mrb[1].mxu1  ;;  %v2179_v16 = vadd.f32 %v9728_v47, %v9871_v22  ;;  %v8598_v0 = vpop.eup %8597 }
 0x1ce   : > { %7492 = vmatmul.mubr.msk.f32.gmra.mrb[86].mxu1 %vm1517_vm0, %v8572_v25  ;;  %v8600_v4 = vpop.eup %8599 }
 0x1cf   : > { %7494 = vmatprep.mubr.msk.f32.mxu1 %vm1517_vm0, %v8574_v26  ;;  %8609 = vtanh.f32 %v2179_v16 }
 0x1d0   : > { %8611 = vtanh.f32 %v2184_v2 }
 0x1d1   : > { %v8602_v5 = vpop.eup %8601 }
 0x1d2   : > { %7495 = vmatmul.mubr.msk.f32.gmra.mrb[88].mxu1 %vm1517_vm0, %v8576_v29  ;;  %v8604_v12 = vpop.eup %8603 }
 0x1d3   : > { %v9881_v31 = vpop.f32.mrb[44].mxu0  ;;  %7497 = vmatprep.mubr.msk.f32.mxu1 %vm1517_vm0, %v8578_v30 }
 0x1d4   : > { %v9886_v33 = vpop.f32.mrb[2].mxu1  ;;  %v2188_v34 = vpop.f32.mrb[45].mxu0  ;;  %v2194_v7 = vadd.f32 %v9881_v31, %v9728_v47 }
 0x1d5   : > { %v9889_v36 = vpop.f32.mrb[3].mxu1  ;;  %v2189_v3 = vadd.f32 %v9728_v47, %v2188_v34  ;;  %v8606_v14 = vpop.eup %8605 }
 0x1d6   : > { %7498 = vmatmul.mubr.msk.f32.gmra.mrb[90].mxu1 %vm1517_vm0, %v8580_v39  ;;  %v8608_v11 = vpop.eup %8607 }
 0x1d7   : > { %7500 = vmatprep.mubr.msk.f32.mxu1 %vm1517_vm0, %v8582_v41  ;;  %8613 = vtanh.f32 %v2189_v3 }
 0x1d8   : > { %8615 = vtanh.f32 %v2194_v7 }
 0x1d9   : > { %v8610_v18 = vpop.eup %8609 }
 0x1da   : > { %7501 = vmatmul.mubr.msk.f32.gmra.mrb[92].mxu1 %vm1517_vm0, %v8584_v44  ;;  %v8612_v27 = vpop.eup %8611 }
 0x1db   : > { %v7321_v46 = vpop.f32.mrb[46].mxu0  ;;  %7503 = vmatprep.mubr.msk.f32.mxu1 %vm1517_vm0, %v8586_v45 }
 0x1dc   : > { %v9907_v59 = vpop.f32.mrb[4].mxu1  ;;  %v2198_v49 = vpop.f32.mrb[47].mxu0  ;;  %v2204_v15 = vadd.f32 %v7321_v46, %v9728_v47 }
 0x1dd   : > { %v9911_v51 = vpop.f32.mrb[5].mxu1  ;;  %v2199_v9 = vadd.f32 %v9728_v47, %v2198_v49 }
 0x1de   : > { %7504 = vmatmul.mubr.msk.f32.gmra.mrb[94].mxu1 %vm1517_vm0, %v8588_v52 }
 0x1df   : > { %7506 = vmatprep.mubr.msk.f32.mxu1 %vm1517_vm0, %v8590_v53  ;;  %8617 = vtanh.f32 %v2199_v9 }
 0x1e0   : > { %8619 = vtanh.f32 %v2204_v15  ;;  %v3968_v15 = vld [vmem:[%s10798_s7 + $0x8] sm:$0xff] }
 0x1e1   : > { %v8614_v28 = vpop.eup %8613 }
 0x1e2   : > { %7507 = vmatmul.mubr.msk.f32.gmra.mrb[96].mxu1 %vm1517_vm0, %v8592_v58  ;;  %v8616_v31 = vpop.eup %8615 }
 0x1e3   : > { %v7324_v60 = vpop.f32.mrb[48].mxu0  ;;  %7509 = vmatprep.mubr.msk.f32.mxu1 %vm1517_vm0, %v8594_v13 }
 0x1e4   : > { %v9923_v62 = vpop.f32.mrb[6].mxu1  ;;  %v2208_v57 = vpop.f32.mrb[49].mxu0  ;;  %v2214_v20 = vadd.f32 %v7324_v60, %v9728_v47 }
 0x1e5   : > { %v9927_v63 = vpop.f32.mrb[7].mxu1  ;;  %v2209_v17 = vadd.f32 %v9728_v47, %v2208_v57 }
 0x1e6   : > { %7510 = vmatmul.mubr.msk.f32.gmra.mrb[98].mxu1 %vm1517_vm0, %v8596_v55 }
 0x1e7   : > { %7512 = vmatprep.mubr.msk.f32.mxu1 %vm1517_vm0, %v8598_v0  ;;  %8621 = vtanh.f32 %v2209_v17 }
 0x1e8   : > { %8623 = vtanh.f32 %v2214_v20 }
 0x1e9   : > { %v8618_v32 = vpop.eup %8617 }
 0x1ea   : > { %7513 = vmatmul.mubr.msk.f32.gmra.mrb[100].mxu1 %vm1517_vm0, %v8600_v4  ;;  %v8620_v41 = vpop.eup %8619 }
 0x1eb   : > { %v7327_v6 = vpop.f32.mrb[50].mxu0  ;;  %7515 = vmatprep.mubr.msk.f32.mxu1 %vm1517_vm0, %v8602_v5 }
 0x1ec   : > { %v9938_v8 = vpop.f32.mrb[8].mxu1  ;;  %v2218_v1 = vpop.f32.mrb[51].mxu0  ;;  %v2224_v29 = vadd.f32 %v7327_v6, %v9728_v47 }
 0x1ed   : > { %v9941_v10 = vpop.f32.mrb[9].mxu1  ;;  %v2219_v25 = vadd.f32 %v9728_v47, %v2218_v1 }
 0x1ee   : > { %7516 = vmatmul.mubr.msk.f32.gmra.mrb[102].mxu1 %vm1517_vm0, %v8604_v12 }
 0x1ef   : > { %7518 = vmatprep.mubr.msk.f32.mxu1 %vm1517_vm0, %v8606_v14  ;;  %8625 = vtanh.f32 %v2219_v25  ;;  %v3967_v14 = vld [vmem:[%s10798_s7] sm:$0xff] }
 0x1f0   : > { %8627 = vtanh.f32 %v2224_v29  ;;  %v10003_v17 = vpack.c.bf16 %v3968_v15, %v3967_v14  ;;  %v2289_v29 = vadd.f32 %v9728_v47, %v9873_v24  ;;  %v2304_v24 = vadd.f32 %v9886_v33, %v9728_v47 }
 0x1f1   : > { %v8622_v42 = vpop.eup %8621 }
 0x1f2   : > { %7519 = vmatmul.mubr.msk.f32.gmra.mrb[104].mxu1 %vm1517_vm0, %v8608_v11  ;;  %v8624_v44 = vpop.eup %8623  ;;  %8011 = vmatprep.subr.bf16.mxu0 %v10003_v17 }
 0x1f3   : > { %v7330_v19 = vpop.f32.mrb[52].mxu0  ;;  %7521 = vmatprep.mubr.msk.f32.mxu1 %vm1517_vm0, %v8610_v18 }
 0x1f4   : > { %v9950_v23 = vpop.f32.mrb[10].mxu1  ;;  %v2228_v22 = vpop.f32.mrb[53].mxu0  ;;  %v2234_v34 = vadd.f32 %v7330_v19, %v9728_v47 }
 0x1f5   : > { %v9953_v26 = vpop.f32.mrb[11].mxu1  ;;  %v2229_v30 = vadd.f32 %v9728_v47, %v2228_v22 }
 0x1f6   : > { %7522 = vmatmul.mubr.msk.f32.gmra.mrb[106].mxu1 %vm1517_vm0, %v8612_v27 }
 0x1f7   : > { %7524 = vmatprep.mubr.msk.f32.mxu1 %vm1517_vm0, %v8614_v28  ;;  %8629 = vtanh.f32 %v2229_v30  ;;  %v2294_v30 = vadd.f32 %v9868_v21, %v9728_v47 }
 0x1f8   : > { %8631 = vtanh.f32 %v2234_v34  ;;  %v2299_v34 = vadd.f32 %v9728_v47, %v9889_v36  ;;  %v2314_v36 = vadd.f32 %v9907_v59, %v9728_v47 }
 0x1f9   : > { %v8626_v45 = vpop.eup %8625 }
 0x1fa   : > { %7525 = vmatmul.mubr.msk.f32.gmra.mrb[108].mxu1 %vm1517_vm0, %v8616_v31  ;;  %v8628_v54 = vpop.eup %8627 }
 0x1fb   : > { %v7333_v35 = vpop.f32.mrb[54].mxu0  ;;  %7527 = vmatprep.mubr.msk.f32.mxu1 %vm1517_vm0, %v8618_v32 }
 0x1fc   : > { %v9962_v37 = vpop.f32.mrb[12].mxu1  ;;  %v2238_v38 = vpop.f32.mrb[55].mxu0  ;;  %v2244_v43 = vadd.f32 %v7333_v35, %v9728_v47 }
 0x1fd   : > { %v2239_v39 = vadd.f32 %v9728_v47, %v2238_v38  ;;  %v9965_v40 = vpop.f32.mrb[13].mxu1 }
 0x1fe   : > { %7528 = vmatmul.mubr.msk.f32.gmra.mrb[110].mxu1 %vm1517_vm0, %v8620_v41 }
 0x1ff   : > { %8633 = vtanh.f32 %v2239_v39  ;;  %7530 = vmatprep.mubr.msk.f32.mxu1 %vm1517_vm0, %v8622_v42  ;;  %v2309_v39 = vadd.f32 %v9728_v47, %v9911_v51  ;;  %v2324_v51 = vadd.f32 %v9923_v62, %v9728_v47  ;;  %v2339_v62 = vadd.f32 %v9728_v47, %v9953_v26 }
 0x200   : > { %8635 = vtanh.f32 %v2244_v43 }
 0x201   : > { %v8630_v56 = vpop.eup %8629 }
 0x202   : > { %7531 = vmatmul.mubr.msk.f32.gmra.mrb[112].mxu1 %vm1517_vm0, %v8624_v44  ;;  %v8632_v58 = vpop.eup %8631  ;;  %v2319_v44 = vadd.f32 %v9728_v47, %v9927_v63  ;;  %v2329_v63 = vadd.f32 %v9728_v47, %v9941_v10 }
 0x203   : > { %v7336_v46 = vpop.f32.mrb[56].mxu0  ;;  %7533 = vmatprep.mubr.msk.f32.mxu1 %vm1517_vm0, %v8626_v45 }
 0x204   : > { %v9972_v48 = vpop.f32.mrb[14].mxu1  ;;  %v2248_v49 = vpop.f32.mrb[57].mxu0  ;;  %v2254_v50 = vadd.f32 %v7336_v46, %v9728_v47 }
 0x205   : > { %v2249_v52 = vadd.f32 %v9728_v47, %v2248_v49  ;;  %v9976_v53 = vpop.f32.mrb[15].mxu1 }
 0x206   : > { %7534 = vmatmul.mubr.msk.f32.gmra.mrb[114].mxu1 %vm1517_vm0, %v8628_v54  ;;  %v2334_v54 = vadd.f32 %v9938_v8, %v9728_v47  ;;  %v2349_v8 = vadd.f32 %v9728_v47, %v9965_v40 }
 0x207   : > { %8637 = vtanh.f32 %v2249_v52  ;;  %7536 = vmatprep.mubr.msk.f32.mxu1 %vm1517_vm0, %v8630_v56 }
 0x208   : > { %8639 = vtanh.f32 %v2254_v50 }
 0x209   : > { %v8634_v13 = vpop.eup %8633 }
 0x20a   : > { %7537 = vmatmul.mubr.msk.f32.gmra.mrb[116].mxu1 %vm1517_vm0, %v8632_v58  ;;  %v8636_v2 = vpop.eup %8635 }
 0x20b   : > { %v7339_v60 = vpop.f32.mrb[58].mxu0  ;;  %7539 = vmatprep.mubr.msk.f32.mxu1 %vm1517_vm0, %v8634_v13 }
 0x20c   : > { %v9982_v61 = vpop.f32.mrb[16].mxu1  ;;  %v2258_v57 = vpop.f32.mrb[59].mxu0  ;;  %v2264_v16 = vadd.f32 %v7339_v60, %v9728_v47  ;;  %v2344_v60 = vadd.f32 %v9950_v23, %v9728_v47  ;;  %v2359_v23 = vadd.f32 %v9728_v47, %v9976_v53 }
 0x20d   : > { %v2259_v55 = vadd.f32 %v9728_v47, %v2258_v57  ;;  %v9986_v0 = vpop.f32.mrb[17].mxu1  ;;  %v2374_v15 = vadd.f32 %v9982_v61, %v9728_v47 }
 0x20e   : > { %7540 = vmatmul.mubr.msk.f32.gmra.mrb[118].mxu1 %vm1517_vm0, %v8636_v2  ;;  %v2354_v2 = vadd.f32 %v9962_v37, %v9728_v47  ;;  %v2369_v37 = vadd.f32 %v9728_v47, %v9986_v0 }
 0x20f   : > { %8641 = vtanh.f32 %v2259_v55 }
 0x210   : > { %8643 = vtanh.f32 %v2264_v16 }
 0x211   : > { %v8638_v3 = vpop.eup %8637 }
 0x212   : > { %v8640_v4 = vpop.eup %8639  ;;  %7542 = vmatprep.mubr.msk.f32.mxu1 %vm1517_vm0, %v8638_v3 }
 0x213   : > { %v7342_v5 = vpop.f32.mrb[60].mxu0  ;;  %7543 = vmatmul.mubr.msk.f32.gmra.mrb[120].mxu1 %vm1517_vm0, %v8640_v4 }
 0x214   : > { %v9990_v6 = vpop.f32.mrb[18].mxu1  ;;  %v2268_v7 = vpop.f32.mrb[61].mxu0  ;;  %v2274_v1 = vadd.f32 %v7342_v5, %v9728_v47 }
 0x215   : > { %v2269_v9 = vadd.f32 %v9728_v47, %v2268_v7  ;;  %v9995_v12 = vpop.f32.mrb[19].mxu1  ;;  %v2364_v7 = vadd.f32 %v9972_v48, %v9728_v47 }
 0x216   : > { %v2379_v48 = vadd.f32 %v9728_v47, %v9995_v12 }
 0x217   : > { %8645 = vtanh.f32 %v2269_v9 }
 0x218   : > { %8647 = vtanh.f32 %v2274_v1 }
 0x219   : > { %v8642_v11 = vpop.eup %8641 }
 0x21a   : > { %v8644_v18 = vpop.eup %8643  ;;  %7545 = vmatprep.mubr.msk.f32.mxu1 %vm1517_vm0, %v8642_v11 }
 0x21b   : > { %v7345_v19 = vpop.f32.mrb[62].mxu0  ;;  %7546 = vmatmul.mubr.msk.f32.gmra.mrb[122].mxu1 %vm1517_vm0, %v8644_v18 }
 0x21c   : > { %v10007_v20 = vpop.f32.mrb[20].mxu1  ;;  %v2278_v22 = vpop.f32.mrb[63].mxu0  ;;  %v2284_v25 = vadd.f32 %v7345_v19, %v9728_v47 }
 0x21d   : > { %v2279_v27 = vadd.f32 %v9728_v47, %v2278_v22  ;;  %v10012_v28 = vpop.f32.mrb[21].mxu1  ;;  %v2384_v22 = vadd.f32 %v9990_v6, %v9728_v47 }
 0x21e   : > { %v2389_v61 = vadd.f32 %v9728_v47, %v10012_v28 }
 0x21f   : > { %8649 = vtanh.f32 %v2279_v27 }
 0x220   : > { %8651 = vtanh.f32 %v2284_v25 }
 0x221   : > { %v10018_v31 = vpop.f32.mrb[22].mxu1  ;;  %v8646_v32 = vpop.eup %8645  ;;  %8653 = vtanh.f32 %v2289_v29 }
 0x222   : > { %v10022_v35 = vpop.f32.mrb[23].mxu1  ;;  %v8648_v38 = vpop.eup %8647  ;;  %7548 = vmatprep.mubr.msk.f32.mxu1 %vm1517_vm0, %v8646_v32  ;;  %8655 = vtanh.f32 %v2294_v30  ;;  %v2394_v30 = vadd.f32 %v10007_v20, %v9728_v47 }
 0x223   : > { %7549 = vmatmul.mubr.msk.f32.gmra.mrb[124].mxu1 %vm1517_vm0, %v8648_v38  ;;  %8657 = vtanh.f32 %v2299_v34  ;;  %v2399_v6 = vadd.f32 %v9728_v47, %v10022_v35 }
 0x224   : > { %8659 = vtanh.f32 %v2304_v24  ;;  %v2404_v24 = vadd.f32 %v10018_v31, %v9728_v47 }
 0x225   : > { %v10028_v21 = vpop.f32.mrb[24].mxu1  ;;  %8661 = vtanh.f32 %v2309_v39 }
 0x226   : > { %v10032_v41 = vpop.f32.mrb[25].mxu1  ;;  %8663 = vtanh.f32 %v2314_v36 }
 0x227   : > { %8665 = vtanh.f32 %v2319_v44  ;;  %v2409_v20 = vadd.f32 %v9728_v47, %v10032_v41  ;;  %v2414_v44 = vadd.f32 %v10028_v21, %v9728_v47 }
 0x228   : > { %8667 = vtanh.f32 %v2324_v51 }
 0x229   : > { %v10036_v42 = vpop.f32.mrb[26].mxu1  ;;  %v8650_v43 = vpop.eup %8649  ;;  %8669 = vtanh.f32 %v2329_v63 }
 0x22a   : > { %v10040_v33 = vpop.f32.mrb[27].mxu1  ;;  %v8652_v45 = vpop.eup %8651  ;;  %7551 = vmatprep.mubr.msk.f32.mxu1 %vm1517_vm0, %v8650_v43  ;;  %8671 = vtanh.f32 %v2334_v54  ;;  %v2424_v63 = vadd.f32 %v10036_v42, %v9728_v47 }
 0x22b   : > { %v8654_v46 = vpop.eup %8653  ;;  %7552 = vmatmul.mubr.msk.f32.gmra.mrb[126].mxu1 %vm1517_vm0, %v8652_v45  ;;  %8673 = vtanh.f32 %v2339_v62  ;;  %v2419_v31 = vadd.f32 %v9728_v47, %v10040_v33 }
 0x22c   : > { %7554 = vmatprep.mubr.msk.f32.mxu1 %vm1517_vm0, %v8654_v46  ;;  %v8656_v50 = vpop.eup %8655  ;;  %8675 = vtanh.f32 %v2344_v60 }
 0x22d   : > { %v10046_v59 = vpop.f32.mrb[28].mxu1  ;;  %v8658_v52 = vpop.eup %8657  ;;  %8677 = vtanh.f32 %v2349_v8  ;;  %v10167_v8 = vld [vmem:[%s10795_s4] ss:$0 sm:$0xff] }
 0x22e   : > { %v10051_v49 = vpop.f32.mrb[29].mxu1  ;;  %v8660_v10 = vpop.eup %8659  ;;  %8679 = vtanh.f32 %v2354_v2  ;;  %v2434_v62 = vadd.f32 %v10046_v59, %v9728_v47 }
 0x22f   : > { %7555 = vmatmul.mubr.msk.f32.gmra.mrb[128].mxu1 %vm1517_vm0, %v8656_v50  ;;  %v8662_v13 = vpop.eup %8661  ;;  %8681 = vtanh.f32 %v2359_v23  ;;  %v2429_v21 = vadd.f32 %v9728_v47, %v10051_v49 }
 0x230   : > { %7557 = vmatprep.mubr.msk.f32.mxu1 %vm1517_vm0, %v8658_v52  ;;  %v8664_v26 = vpop.eup %8663  ;;  %8683 = vtanh.f32 %v2364_v7 }
 0x231   : > { %v10056_v56 = vpop.f32.mrb[30].mxu1  ;;  %v8666_v55 = vpop.eup %8665  ;;  %8685 = vtanh.f32 %v2369_v37 }
 0x232   : > { %v10061_v58 = vpop.f32.mrb[31].mxu1  ;;  %v8668_v40 = vpop.eup %8667  ;;  %8687 = vtanh.f32 %v2374_v15  ;;  %v2444_v59 = vadd.f32 %v10167_v8, %v10056_v56 }
 0x233   : > { %7558 = vmatmul.mubr.msk.f32.gmra.mrb[130].mxu1 %vm1517_vm0, %v8660_v10  ;;  %v8670_v5 = vpop.eup %8669  ;;  %8689 = vtanh.f32 %v2379_v48  ;;  %v2439_v42 = vadd.f32 %v9728_v47, %v10061_v58 }
 0x234   : > { %7560 = vmatprep.mubr.msk.f32.mxu1 %vm1517_vm0, %v8662_v13  ;;  %v8672_v53 = vpop.eup %8671  ;;  %8691 = vtanh.f32 %v2384_v22 }
 0x235   : > { %v10066_v57 = vpop.f32.mrb[32].mxu1  ;;  %v8674_v14 = vpop.eup %8673  ;;  %8693 = vtanh.f32 %v2389_v61 }
 0x236   : > { %v10071_v16 = vpop.f32.mrb[33].mxu1  ;;  %v8676_v0 = vpop.eup %8675  ;;  %8695 = vtanh.f32 %v2394_v30  ;;  %v2454_v23 = vadd.f32 %v10167_v8, %v10066_v57 }
 0x237   : > { %7561 = vmatmul.mubr.msk.f32.gmra.mrb[132].mxu1 %vm1517_vm0, %v8664_v26  ;;  %v8678_v19 = vpop.eup %8677  ;;  %8697 = vtanh.f32 %v2399_v6  ;;  %v2449_v47 = vadd.f32 %v10167_v8, %v10071_v16 }
 0x238   : > { %7563 = vmatprep.mubr.msk.f32.mxu1 %vm1517_vm0, %v8666_v55  ;;  %v8680_v12 = vpop.eup %8679  ;;  %8699 = vtanh.f32 %v2404_v24 }
 0x239   : > { %v10076_v3 = vpop.f32.mrb[34].mxu1  ;;  %v8682_v29 = vpop.eup %8681  ;;  %8701 = vtanh.f32 %v2409_v20 }
 0x23a   : > { %v10081_v4 = vpop.f32.mrb[35].mxu1  ;;  %v8684_v28 = vpop.eup %8683  ;;  %8703 = vtanh.f32 %v2414_v44  ;;  %v2464_v37 = vadd.f32 %v10167_v8, %v10076_v3 }
 0x23b   : > { %7564 = vmatmul.mubr.msk.f32.gmra.mrb[134].mxu1 %vm1517_vm0, %v8668_v40  ;;  %v8686_v38 = vpop.eup %8685  ;;  %8705 = vtanh.f32 %v2419_v31  ;;  %v2459_v56 = vadd.f32 %v10167_v8, %v10081_v4 }
 0x23c   : > { %7566 = vmatprep.mubr.msk.f32.mxu1 %vm1517_vm0, %v8670_v5  ;;  %v8688_v35 = vpop.eup %8687  ;;  %8707 = vtanh.f32 %v2424_v63 }
 0x23d   : > { %v10086_v1 = vpop.f32.mrb[36].mxu1  ;;  %v8690_v43 = vpop.eup %8689  ;;  %8709 = vtanh.f32 %v2429_v21 }
 0x23e   : > { %v10091_v9 = vpop.f32.mrb[37].mxu1  ;;  %v8692_v41 = vpop.eup %8691  ;;  %8711 = vtanh.f32 %v2434_v62  ;;  %v2474_v48 = vadd.f32 %v10167_v8, %v10086_v1 }
 0x23f   : > { %7567 = vmatmul.mubr.msk.f32.gmra.mrb[136].mxu1 %vm1517_vm0, %v8672_v53  ;;  %v8694_v51 = vpop.eup %8693  ;;  %8713 = vtanh.f32 %v2439_v42  ;;  %v2469_v57 = vadd.f32 %v10167_v8, %v10091_v9 }
 0x240   : > { %7569 = vmatprep.mubr.msk.f32.mxu1 %vm1517_vm0, %v8674_v14  ;;  %v8696_v33 = vpop.eup %8695  ;;  %8715 = vtanh.f32 %v2444_v59 }
 0x241   : > { %v10096_v11 = vpop.f32.mrb[38].mxu1  ;;  %v8698_v54 = vpop.eup %8697  ;;  %8717 = vtanh.f32 %v2449_v47 }
 0x242   : > { %v10101_v18 = vpop.f32.mrb[39].mxu1  ;;  %v8700_v13 = vpop.eup %8699  ;;  %8719 = vtanh.f32 %v2454_v23  ;;  %v2484_v61 = vadd.f32 %v10167_v8, %v10096_v11 }
 0x243   : > { %7570 = vmatmul.mubr.msk.f32.gmra.mrb[138].mxu1 %vm1517_vm0, %v8676_v0  ;;  %v8702_v60 = vpop.eup %8701  ;;  %8721 = vtanh.f32 %v2459_v56  ;;  %v2479_v3 = vadd.f32 %v10167_v8, %v10101_v18 }
 0x244   : > { %7572 = vmatprep.mubr.msk.f32.mxu1 %vm1517_vm0, %v8678_v19  ;;  %v8704_v26 = vpop.eup %8703  ;;  %8723 = vtanh.f32 %v2464_v37 }
 0x245   : > { %v10106_v25 = vpop.f32.mrb[40].mxu1  ;;  %v8706_v2 = vpop.eup %8705  ;;  %8725 = vtanh.f32 %v2469_v57 }
 0x246   : > { %v10111_v27 = vpop.f32.mrb[41].mxu1  ;;  %v8708_v16 = vpop.eup %8707  ;;  %8727 = vtanh.f32 %v2474_v48  ;;  %v2494_v6 = vadd.f32 %v10167_v8, %v10106_v25 }
 0x247   : > { %7573 = vmatmul.mubr.msk.f32.gmra.mrb[140].mxu1 %vm1517_vm0, %v8680_v12  ;;  %v8710_v7 = vpop.eup %8709  ;;  %8729 = vtanh.f32 %v2479_v3  ;;  %v2489_v1 = vadd.f32 %v10167_v8, %v10111_v27 }
 0x248   : > { %7575 = vmatprep.mubr.msk.f32.mxu1 %vm1517_vm0, %v8682_v29  ;;  %v8712_v4 = vpop.eup %8711  ;;  %8731 = vtanh.f32 %v2484_v61 }
 0x249   : > { %v10116_v32 = vpop.f32.mrb[42].mxu1  ;;  %v8714_v15 = vpop.eup %8713  ;;  %8733 = vtanh.f32 %v2489_v1 }
 0x24a   : > { %v10121_v34 = vpop.f32.mrb[43].mxu1  ;;  %v8716_v9 = vpop.eup %8715  ;;  %8735 = vtanh.f32 %v2494_v6  ;;  %v2504_v20 = vadd.f32 %v10167_v8, %v10116_v32  ;;  %v3969_v6 = vld [vmem:[%s10798_s7 + $0x10] sm:$0xff] }
 0x24b   : > { %7576 = vmatmul.mubr.msk.f32.gmra.mrb[142].mxu1 %vm1517_vm0, %v8684_v28  ;;  %v8718_v22 = vpop.eup %8717  ;;  %v2499_v11 = vadd.f32 %v10167_v8, %v10121_v34 }
 0x24c   : > { %7578 = vmatprep.mubr.msk.f32.mxu1 %vm1517_vm0, %v8686_v38  ;;  %v8720_v18 = vpop.eup %8719 }
 0x24d   : > { %v10126_v39 = vpop.f32.mrb[44].mxu1  ;;  %v8722_v30 = vpop.eup %8721  ;;  %8737 = vtanh.f32 %v2499_v11  ;;  %v3970_v11 = vld [vmem:[%s10798_s7 + $0x18] sm:$0xff] }
 0x24e   : > { %v10131_v36 = vpop.f32.mrb[45].mxu1  ;;  %v8724_v27 = vpop.eup %8723  ;;  %8739 = vtanh.f32 %v2504_v20  ;;  %v2514_v31 = vadd.f32 %v10167_v8, %v10126_v39 }
 0x24f   : > { %7579 = vmatmul.mubr.msk.f32.gmra.mrb[144].mxu1 %vm1517_vm0, %v8688_v35  ;;  %v8726_v24 = vpop.eup %8725  ;;  %v2509_v25 = vadd.f32 %v10167_v8, %v10131_v36 }
 0x250   : > { %7581 = vmatprep.mubr.msk.f32.mxu1 %vm1517_vm0, %v8690_v43  ;;  %v8728_v34 = vpop.eup %8727 }
 0x251   : > { %v10136_v45 = vpop.f32.mrb[46].mxu1  ;;  %v8730_v44 = vpop.eup %8729  ;;  %8741 = vtanh.f32 %v2509_v25 }
 0x252   : > { %v10141_v46 = vpop.f32.mrb[47].mxu1  ;;  %v8732_v36 = vpop.eup %8731  ;;  %8743 = vtanh.f32 %v2514_v31  ;;  %v2524_v21 = vadd.f32 %v10167_v8, %v10136_v45  ;;  %v8014_v31 = vpack.c.bf16 %v3970_v11, %v3969_v6 }
 0x253   : > { %7582 = vmatmul.mubr.msk.f32.gmra.mrb[146].mxu1 %vm1517_vm0, %v8692_v41  ;;  %v2519_v32 = vadd.f32 %v10167_v8, %v10141_v46  ;;  %v8734_v63 = vpop.eup %8733 }
 0x254   : > { %7584 = vmatprep.mubr.msk.f32.mxu1 %vm1517_vm0, %v8694_v51  ;;  %v8736_v46 = vpop.eup %8735 }
 0x255   : > { %v10146_v50 = vpop.f32.mrb[48].mxu1  ;;  %8745 = vtanh.f32 %v2519_v32 }
 0x256   : > { %v10151_v52 = vpop.f32.mrb[49].mxu1  ;;  %8747 = vtanh.f32 %v2524_v21  ;;  %v2534_v42 = vadd.f32 %v10167_v8, %v10146_v50 }
 0x257   : > { %7585 = vmatmul.mubr.msk.f32.gmra.mrb[148].mxu1 %vm1517_vm0, %v8696_v33  ;;  %v2529_v39 = vadd.f32 %v10167_v8, %v10151_v52  ;;  %v8738_v62 = vpop.eup %8737 }
 0x258   : > { %7587 = vmatprep.mubr.msk.f32.mxu1 %vm1517_vm0, %v8698_v54  ;;  %v8740_v52 = vpop.eup %8739 }
 0x259   : > { %v10159_v10 = vpop.f32.mrb[50].mxu1  ;;  %8749 = vtanh.f32 %v2529_v39 }
 0x25a   : > { %v10161_v49 = vpop.f32.mrb[51].mxu1  ;;  %v2544_v47 = vadd.f32 %v10167_v8, %v10159_v10  ;;  %8751 = vtanh.f32 %v2534_v42 }
 0x25b   : > { %7588 = vmatmul.mubr.msk.f32.gmra.mrb[150].mxu1 %vm1517_vm0, %v8700_v13  ;;  %v2539_v45 = vadd.f32 %v10167_v8, %v10161_v49  ;;  %v8742_v59 = vpop.eup %8741  ;;  %v10277_v49 = vld [vmem:[%s10797_s6] ss:$0 sm:$0xff] }
 0x25c   : > { %7590 = vmatprep.mubr.msk.f32.mxu1 %vm1517_vm0, %v8702_v60 }
 0x25d   : > { %v10174_v58 = vpop.f32.mrb[52].mxu1  ;;  %8753 = vtanh.f32 %v2539_v45 }
 0x25e   : > { %v10176_v55 = vpop.f32.mrb[53].mxu1  ;;  %8755 = vtanh.f32 %v2544_v47 }
 0x25f   : > { %7591 = vmatmul.mubr.msk.f32.gmra.mrb[152].mxu1 %vm1517_vm0, %v8704_v26  ;;  %v2549_v50 = vadd.f32 %v10167_v8, %v10176_v55 }
 0x260   : > { %7593 = vmatprep.mubr.msk.f32.mxu1 %vm1517_vm0, %v8706_v2  ;;  %v8744_v2 = vpop.eup %8743 }
 0x261   : > { %v10184_v40 = vpop.f32.mrb[54].mxu1  ;;  %v8746_v10 = vpop.eup %8745  ;;  %8757 = vtanh.f32 %v2549_v50 }
 0x262   : > { %v10186_v5 = vpop.f32.mrb[55].mxu1  ;;  %v8748_v57 = vpop.eup %8747 }
 0x263   : > { %7594 = vmatmul.mubr.msk.f32.gmra.mrb[154].mxu1 %vm1517_vm0, %v8708_v16  ;;  %v2554_v16 = vadd.f32 %v10167_v8, %v10174_v58  ;;  %v8750_v48 = vpop.eup %8749  ;;  %v2564_v58 = vadd.f32 %v10167_v8, %v10184_v40 }
 0x264   : > { %7596 = vmatprep.mubr.msk.f32.mxu1 %vm1517_vm0, %v8710_v7  ;;  %v2559_v7 = vadd.f32 %v10167_v8, %v10186_v5 }
 0x265   : > { %v10194_v53 = vpop.f32.mrb[56].mxu1 }
 0x266   : > { %v10196_v14 = vpop.f32.mrb[57].mxu1  ;;  %v2574_v40 = vadd.f32 %v10167_v8, %v10194_v53 }
 0x267   : > { %7597 = vmatmul.mubr.msk.f32.gmra.mrb[156].mxu1 %vm1517_vm0, %v8712_v4  ;;  %v2569_v5 = vadd.f32 %v10167_v8, %v10196_v14 }
 0x268   : > { %7599 = vmatprep.mubr.msk.f32.mxu1 %vm1517_vm0, %v8714_v15 }
 0x269   : > { %v10204_v0 = vpop.f32.mrb[58].mxu1 }
 0x26a   : > { %v10206_v19 = vpop.f32.mrb[59].mxu1 }
 0x26b   : > { %7600 = vmatmul.mubr.msk.f32.gmra.mrb[158].mxu1 %vm1517_vm0, %v8716_v9  ;;  %v2579_v14 = vadd.f32 %v10167_v8, %v10206_v19 }
 0x26c   : > { %7602 = vmatprep.mubr.msk.f32.mxu1 %vm1517_vm0, %v8718_v22  ;;  %v8752_v22 = vpop.eup %8751 }
 0x26d   : > { %v10214_v12 = vpop.f32.mrb[60].mxu1 }
 0x26e   : > { %v10216_v29 = vpop.f32.mrb[61].mxu1  ;;  %v2594_v47 = vadd.f32 %v10167_v8, %v10214_v12 }
 0x26f   : > { %7603 = vmatmul.mubr.msk.f32.gmra.mrb[160].mxu1 %vm1517_vm0, %v8720_v18  ;;  %v8754_v18 = vpop.eup %8753  ;;  %v2589_v39 = vadd.f32 %v10167_v8, %v10216_v29 }
 0x270   : > { %7605 = vmatprep.mubr.msk.f32.mxu1 %vm1517_vm0, %v8722_v30 }
 0x271   : > { %v10224_v28 = vpop.f32.mrb[62].mxu1 }
 0x272   : > { %v10226_v38 = vpop.f32.mrb[63].mxu1 }
 0x273   : > { %7606 = vmatmul.mubr.msk.f32.gmra.mrb[162].mxu1 %vm1517_vm0, %v8724_v27  ;;  %v8756_v27 = vpop.eup %8755 }
 0x274   : > { %7608 = vmatprep.mubr.msk.f32.mxu1 %vm1517_vm0, %v8726_v24  ;;  %v8758_v24 = vpop.eup %8757 }
 0x275   : > { %v10234_v35 = vpop.f32.mrb[64].mxu1 }
 0x276   : > { %v10236_v43 = vpop.f32.mrb[65].mxu1 }
 0x277   : > { %7609 = vmatmul.mubr.msk.f32.gmra.mrb[164].mxu1 %vm1517_vm0, %v8728_v34  ;;  %v3201_v34 = vadd.f32 %v10277_v49, %v10236_v43  ;;  %v6600_v43 = vld [vmem:[%s10798_s7 + $0x48] sm:$0xff] }
 0x278   : > { %7611 = vmatprep.mubr.msk.f32.mxu1 %vm1517_vm0, %v8730_v44 }
 0x279   : > { %v10244_v41 = vpop.f32.mrb[66].mxu1 }
 0x27a   : > { %v10246_v51 = vpop.f32.mrb[67].mxu1 }
 0x27b   : > { %7612 = vmatmul.mubr.msk.f32.gmra.mrb[166].mxu1 %vm1517_vm0, %v8732_v36  ;;  %v2584_v36 = vadd.f32 %v10167_v8, %v10204_v0 }
 0x27c   : > { %7614 = vmatprep.mubr.msk.f32.mxu1 %vm1517_vm0, %v8734_v63  ;;  %v6599_v63 = vld [vmem:[%s10798_s7 + $0x40] sm:$0xff] }
 0x27d   : > { %v10254_v33 = vpop.f32.mrb[68].mxu1  ;;  %v10335_v29 = vpack.c.bf16 %v6600_v43, %v6599_v63 }
 0x27e   : > { %v10256_v54 = vpop.f32.mrb[69].mxu1 }
 0x27f   : > { %7615 = vmatmul.mubr.msk.f32.gmra.mrb[168].mxu1 %vm1517_vm0, %v8736_v46 }
 0x280   : > { %7617 = vmatprep.mubr.msk.f32.mxu1 %vm1517_vm0, %v8738_v62  ;;  %v3206_v62 = vadd.f32 %v10234_v35, %v10277_v49  ;;  %v2599_v35 = vadd.f32 %v10167_v8, %v10226_v38 }
 0x281   : > { %v10264_v13 = vpop.f32.mrb[70].mxu1 }
 0x282   : > { %v10266_v60 = vpop.f32.mrb[71].mxu1 }
 0x283   : > { %7618 = vmatmul.mubr.msk.f32.gmra.mrb[170].mxu1 %vm1517_vm0, %v8740_v52  ;;  %v3211_v52 = vadd.f32 %v10277_v49, %v10246_v51 }
 0x284   : > { %7620 = vmatprep.mubr.msk.f32.mxu1 %vm1517_vm0, %v8742_v59 }
 0x285   : > { %v7472_v26 = vpop.f32.mrb[72].mxu1 }
 0x286   : > { %v3246_v23 = vadd.f32 %v7472_v26, %v10277_v49  ;;  %v3240_v56 = vpop.f32.mrb[73].mxu1  ;;  %v3216_v26 = vadd.f32 %v10244_v41, %v10277_v49 }
 0x287   : > { %v3241_v55 = vadd.f32 %v10277_v49, %v3240_v56  ;;  %7621 = vmatmul.mubr.msk.f32.gmra.mrb[172].mxu1 %vm1517_vm0, %v8744_v2  ;;  %v2604_v56 = vadd.f32 %v10167_v8, %v10224_v28  ;;  %v3231_v8 = vadd.f32 %v10277_v49, %v10266_v60 }
 0x288   : > { %7623 = vmatprep.mubr.msk.f32.mxu1 %vm1517_vm0, %v8746_v10 }
 0x289   : > { %8759 = vtanh.f32 %v3241_v55  ;;  %v7475_v37 = vpop.f32.mrb[74].mxu1 }
 0x28a   : > { %8761 = vtanh.f32 %v3246_v23  ;;  %v3256_v4 = vadd.f32 %v7475_v37, %v10277_v49  ;;  %v3250_v15 = vpop.f32.mrb[75].mxu1  ;;  %v3221_v23 = vadd.f32 %v10277_v49, %v10256_v54  ;;  %v6601_v37 = vld [vmem:[%s10798_s7 + $0x50] sm:$0xff] }
 0x28b   : > { %8763 = vtanh.f32 %v2554_v16  ;;  %v3251_v3 = vadd.f32 %v10277_v49, %v3250_v15  ;;  %7624 = vmatmul.mubr.msk.f32.gmra.mrb[174].mxu1 %vm1517_vm0, %v8748_v57  ;;  %v3226_v16 = vadd.f32 %v10254_v33, %v10277_v49  ;;  %v6602_v33 = vld [vmem:[%s10798_s7 + $0x58] sm:$0xff]  ;;  %v3236_v15 = vadd.f32 %v10264_v13, %v10277_v49  ;;  %v6612_v13 = vld [vmem:[%s10798_s7 + $0x68] sm:$0xff] }
 0x28c   : > { %8765 = vtanh.f32 %v2559_v7  ;;  %7626 = vmatprep.mubr.msk.f32.mxu1 %vm1517_vm0, %v8750_v48 }
 0x28d   : > { %8767 = vtanh.f32 %v3251_v3  ;;  %v7478_v9 = vpop.f32.mrb[76].mxu1 }
 0x28e   : > { %8769 = vtanh.f32 %v3256_v4  ;;  %v3266_v61 = vadd.f32 %v7478_v9, %v10277_v49  ;;  %v3260_v1 = vpop.f32.mrb[77].mxu1 }
 0x28f   : > { %8771 = vtanh.f32 %v2564_v58  ;;  %v3261_v30 = vadd.f32 %v10277_v49, %v3260_v1  ;;  %7627 = vmatmul.mubr.msk.f32.gmra.mrb[176].mxu1 %vm1517_vm0, %v8752_v22  ;;  %v6611_v22 = vld [vmem:[%s10798_s7 + $0x60] sm:$0xff] }
 0x290   : > { %8773 = vtanh.f32 %v2569_v5  ;;  %7629 = vmatprep.mubr.msk.f32.mxu1 %vm1517_vm0, %v8754_v18  ;;  %v8022_v5 = vpack.c.bf16 %v6602_v33, %v6601_v37  ;;  %v8026_v11 = vpack.c.bf16 %v6612_v13, %v6611_v22  ;;  %v6635_v22 = vld [vmem:[%s10798_s7 + $0xa0] sm:$0xff]  ;;  %v6636_v13 = vld [vmem:[%s10798_s7 + $0xa8] sm:$0xff] }
 0x291   : > { %8775 = vtanh.f32 %v3261_v30  ;;  %v7481_v53 = vpop.f32.mrb[78].mxu1 }
 0x292   : > { %8777 = vtanh.f32 %v3266_v61  ;;  %v3276_v20 = vadd.f32 %v7481_v53, %v10277_v49  ;;  %v3270_v25 = vpop.f32.mrb[79].mxu1 }
 0x293   : > { %v8760_v19 = vpop.eup %8759  ;;  %8779 = vtanh.f32 %v2574_v40  ;;  %v3271_v44 = vadd.f32 %v10277_v49, %v3270_v25  ;;  %7630 = vmatmul.mubr.msk.f32.gmra.mrb[178].mxu1 %vm1517_vm0, %v8756_v27 }
 0x294   : > { %v8762_v32 = vpop.eup %8761  ;;  %8781 = vtanh.f32 %v2579_v14  ;;  %7658 = vmatprep.mubr.msk.f32.mxu0 %vm3976_vm1, %v8760_v19  ;;  %7632 = vmatprep.mubr.msk.f32.mxu1 %vm1517_vm0, %v8758_v24 }
 0x295   : > { %v8764_v21 = vpop.eup %8763  ;;  %8783 = vtanh.f32 %v3271_v44  ;;  %v10326_v46 = vpop.f32.mrb[80].mxu1  ;;  %7659 = vmatmul.mubr.msk.f32.vlgmr.msra.gmra.mrb[64].mxu0 %vm3976_vm1, %v8762_v32 }
 0x296   : > { %v8766_v0 = vpop.eup %8765  ;;  %8785 = vtanh.f32 %v3276_v20  ;;  %8013 = vmatpush3.bf16.msra.mxu0 %v10003_v17  ;;  %v3280_v42 = vpop.f32.mrb[81].mxu1  ;;  %v3286_v40 = vadd.f32 %v10326_v46, %v10277_v49  ;;  %v6614_v46 = vld [vmem:[%s10798_s7 + $0x78] sm:$0xff] }
 0x297   : > { %v8768_v45 = vpop.eup %8767  ;;  %8787 = vtanh.f32 %v3201_v34  ;;  %7633 = vmatmul.mubr.msk.f32.gmra.mrb[180].mxu1 %vm1517_vm0, %v8764_v21  ;;  %8015 = vmatprep.subr.bf16.mxu0 %v8014_v31  ;;  %v3281_v3 = vadd.f32 %v10277_v49, %v3280_v42 }
 0x298   : > { %v8770_v59 = vpop.eup %8769  ;;  %8789 = vtanh.f32 %v2584_v36  ;;  %7661 = vmatprep.mubr.msk.f32.mxu0 %vm3976_vm1, %v8768_v45  ;;  %7635 = vmatprep.mubr.msk.f32.mxu1 %vm1517_vm0, %v8766_v0 }
 0x299   : > { %v8772_v17 = vpop.eup %8771  ;;  %8791 = vtanh.f32 %v2589_v39  ;;  %v10343_v51 = vpop.f32.mrb[82].mxu1  ;;  %7662 = vmatmul.mubr.msk.f32.gmra.mrb[66].mxu0 %vm3976_vm1, %v8770_v59  ;;  %v6613_v39 = vld [vmem:[%s10798_s7 + $0x70] sm:$0xff] }
 0x29a   : > { %v8774_v50 = vpop.eup %8773  ;;  %8793 = vtanh.f32 %v3206_v62  ;;  %v3290_v2 = vpop.f32.mrb[83].mxu1  ;;  %8017 = vmatpush3.bf16.msra.mxu0 %v8014_v31  ;;  %v3296_v25 = vadd.f32 %v10343_v51, %v10277_v49 }
 0x29b   : > { %v8776_v12 = vpop.eup %8775  ;;  %8795 = vtanh.f32 %v3211_v52  ;;  %7636 = vmatmul.mubr.msk.f32.gmra.mrb[182].mxu1 %vm1517_vm0, %v8772_v17  ;;  %8019 = vmatprep.subr.bf16.mxu0 %v10335_v29  ;;  %v3291_v6 = vadd.f32 %v10277_v49, %v3290_v2  ;;  %v6624_v17 = vld [vmem:[%s10798_s7 + $0x88] sm:$0xff] }
 0x29c   : > { %v8778_v38 = vpop.eup %8777  ;;  %8797 = vtanh.f32 %v2594_v47  ;;  %7664 = vmatprep.mubr.msk.f32.mxu0 %vm3976_vm1, %v8776_v12  ;;  %7638 = vmatprep.mubr.msk.f32.mxu1 %vm1517_vm0, %v8774_v50  ;;  %v6623_v47 = vld [vmem:[%s10798_s7 + $0x80] sm:$0xff] }
 0x29d   : > { %v8780_v41 = vpop.eup %8779  ;;  %8799 = vtanh.f32 %v2599_v35  ;;  %v10356_v10 = vpop.f32.mrb[84].mxu1  ;;  %7665 = vmatmul.mubr.msk.f32.gmra.mrb[68].mxu0 %vm3976_vm1, %v8778_v38  ;;  %v8034_v12 = vpack.c.bf16 %v6624_v17, %v6623_v47 }
 0x29e   : > { %v8782_v54 = vpop.eup %8781  ;;  %8801 = vtanh.f32 %v3216_v26  ;;  %v3300_v55 = vpop.f32.mrb[85].mxu1  ;;  %v3306_v36 = vadd.f32 %v10356_v10, %v10277_v49 }
 0x29f   : > { %v8784_v7 = vpop.eup %8783  ;;  %8803 = vtanh.f32 %v3221_v23  ;;  %7639 = vmatmul.mubr.msk.f32.gmra.mrb[184].mxu1 %vm1517_vm0, %v8780_v41  ;;  %v3301_v34 = vadd.f32 %v10277_v49, %v3300_v55 }
 0x2a0   : > { %v8786_v28 = vpop.eup %8785  ;;  %8805 = vtanh.f32 %v2604_v56  ;;  %7667 = vmatprep.mubr.msk.f32.mxu0 %vm3976_vm1, %v8784_v7  ;;  %7641 = vmatprep.mubr.msk.f32.mxu1 %vm1517_vm0, %v8782_v54 }
 0x2a1   : > { %v8788_v57 = vpop.eup %8787  ;;  %v10372_v4 = vpop.f32.mrb[86].mxu1  ;;  %7668 = vmatmul.mubr.msk.f32.gmra.mrb[70].mxu0 %vm3976_vm1, %v8786_v28  ;;  %8807 = vtanh.f32 %v3226_v16 }
 0x2a2   : > { %v8790_v60 = vpop.eup %8789  ;;  %v3310_v48 = vpop.f32.mrb[87].mxu1  ;;  %7678 = vmatprep.mubr.msk.f32.mxu0 %vm3976_vm1, %v8788_v57  ;;  %8809 = vtanh.f32 %v3231_v8  ;;  %v3316_v42 = vadd.f32 %v10372_v4, %v10277_v49  ;;  %v6625_v57 = vld [vmem:[%s10798_s7 + $0x90] sm:$0xff]  ;;  %v6626_v4 = vld [vmem:[%s10798_s7 + $0x98] sm:$0xff] }
 0x2a3   : > { %v8792_v58 = vpop.eup %8791  ;;  %7642 = vmatmul.mubr.msk.f32.gmra.mrb[186].mxu1 %vm1517_vm0, %v8790_v60  ;;  %8811 = vtanh.f32 %v3236_v15  ;;  %v3311_v43 = vadd.f32 %v10277_v49, %v3310_v48 }
 0x2a4   : > { %v8794_v9 = vpop.eup %8793  ;;  %7644 = vmatprep.mubr.msk.f32.mxu1 %vm1517_vm0, %v8792_v58  ;;  %8813 = vtanh.f32 %v3281_v3 }
 0x2a5   : > { %v8796_v61 = vpop.eup %8795  ;;  %v7496_v1 = vpop.f32.mrb[88].mxu1  ;;  %7679 = vmatmul.mubr.msk.f32.vlgmr.msra.gmra.mrb[64].mxu0 %vm3976_vm1, %v8794_v9  ;;  %8815 = vtanh.f32 %v3286_v40 }
 0x2a6   : > { %v8798_v18 = vpop.eup %8797  ;;  %8021 = vmatpush3.bf16.msra.mxu0 %v10335_v29  ;;  %v3320_v30 = vpop.f32.mrb[89].mxu1  ;;  %7681 = vmatprep.mubr.msk.f32.mxu0 %vm3976_vm1, %v8796_v61  ;;  %8817 = vtanh.f32 %v3291_v6  ;;  %v8030_v29 = vpack.c.bf16 %v6614_v46, %v6613_v39  ;;  %v3326_v50 = vadd.f32 %v7496_v1, %v10277_v49 }
 0x2a7   : > { %v8800_v14 = vpop.eup %8799  ;;  %7645 = vmatmul.mubr.msk.f32.gmra.mrb[188].mxu1 %vm1517_vm0, %v8798_v18  ;;  %8023 = vmatprep.subr.bf16.mxu0 %v8022_v5  ;;  %8819 = vtanh.f32 %v3296_v25  ;;  %v3321_v52 = vadd.f32 %v10277_v49, %v3320_v30 }
 0x2a8   : > { %v8802_v27 = vpop.eup %8801  ;;  %7647 = vmatprep.mubr.msk.f32.mxu1 %vm1517_vm0, %v8800_v14  ;;  %8821 = vtanh.f32 %v3301_v34  ;;  %v8042_v14 = vpack.c.bf16 %v6636_v13, %v6635_v22 }
 0x2a9   : > { %v8804_v53 = vpop.eup %8803  ;;  %v7499_v24 = vpop.f32.mrb[90].mxu1  ;;  %7682 = vmatmul.mubr.msk.f32.gmra.mrb[66].mxu0 %vm3976_vm1, %v8802_v27  ;;  %8823 = vtanh.f32 %v3306_v36 }
 0x2aa   : > { %v8806_v20 = vpop.eup %8805  ;;  %v3330_v19 = vpop.f32.mrb[91].mxu1  ;;  %7684 = vmatprep.mubr.msk.f32.mxu0 %vm3976_vm1, %v8804_v53  ;;  %8025 = vmatpush3.bf16.msra.mxu0 %v8022_v5  ;;  %8825 = vtanh.f32 %v3311_v43  ;;  %v3336_v41 = vadd.f32 %v7499_v24, %v10277_v49  ;;  %v8038_v5 = vpack.c.bf16 %v6626_v4, %v6625_v57  ;;  %v6638_v43 = vld [vmem:[%s10798_s7 + $0xb8] sm:$0xff] }
 0x2ab   : > { %7648 = vmatmul.mubr.msk.f32.gmra.mrb[190].mxu1 %vm1517_vm0, %v8806_v20  ;;  %8027 = vmatprep.subr.bf16.mxu0 %v8026_v11  ;;  %v8808_v44 = vpop.eup %8807  ;;  %8827 = vtanh.f32 %v3316_v42  ;;  %v3331_v2 = vadd.f32 %v10277_v49, %v3330_v19 }
 0x2ac   : > { %v8810_v31 = vpop.eup %8809  ;;  %8829 = vtanh.f32 %v3321_v52  ;;  %v6647_v52 = vld [vmem:[%s10798_s7 + $0xc0] sm:$0xff] }
 0x2ad   : > { %v7502_v32 = vpop.f32.mrb[92].mxu1  ;;  %7685 = vmatmul.mubr.msk.f32.gmra.mrb[68].mxu0 %vm3976_vm1, %v8808_v44  ;;  %v8812_v21 = vpop.eup %8811  ;;  %8831 = vtanh.f32 %v3326_v50 }
 0x2ae   : > { %v3340_v63 = vpop.f32.mrb[93].mxu1  ;;  %7687 = vmatprep.mubr.msk.f32.mxu0 %vm3976_vm1, %v8810_v31  ;;  %v8814_v0 = vpop.eup %8813  ;;  %8833 = vtanh.f32 %v3331_v2  ;;  %v3346_v8 = vadd.f32 %v7502_v32, %v10277_v49 }
 0x2af   : > { %v8816_v59 = vpop.eup %8815  ;;  %v3341_v54 = vadd.f32 %v10277_v49, %v3340_v63  ;;  %8835 = vtanh.f32 %v3336_v41  ;;  %v6637_v63 = vld [vmem:[%s10798_s7 + $0xb0] sm:$0xff] }
 0x2b0   : > { %v8818_v35 = vpop.eup %8817  ;;  %v8046_v42 = vpack.c.bf16 %v6638_v43, %v6637_v63 }
 0x2b1   : > { %v7505_v62 = vpop.f32.mrb[94].mxu1  ;;  %7688 = vmatmul.mubr.msk.f32.gmra.mrb[70].mxu0 %vm3976_vm1, %v8812_v21  ;;  %v8820_v23 = vpop.eup %8819  ;;  %8837 = vtanh.f32 %v3341_v54 }
 0x2b2   : > { %v3350_v45 = vpop.f32.mrb[95].mxu1  ;;  %7698 = vmatprep.mubr.msk.f32.mxu0 %vm3976_vm1, %v8814_v0  ;;  %v8822_v38 = vpop.eup %8821  ;;  %8839 = vtanh.f32 %v3346_v8  ;;  %v3356_v48 = vadd.f32 %v7505_v62, %v10277_v49 }
 0x2b3   : > { %v8824_v16 = vpop.eup %8823  ;;  %v3351_v37 = vadd.f32 %v10277_v49, %v3350_v45 }
 0x2b4   : > { %v8826_v55 = vpop.eup %8825 }
 0x2b5   : > { %v7508_v51 = vpop.f32.mrb[96].mxu1  ;;  %7699 = vmatmul.mubr.msk.f32.vlgmr.msra.gmra.mrb[64].mxu0 %vm3976_vm1, %v8816_v59  ;;  %v8828_v33 = vpop.eup %8827  ;;  %8841 = vtanh.f32 %v3351_v37  ;;  %v6650_v37 = vld [vmem:[%s10798_s7 + $0xd8] sm:$0xff] }
 0x2b6   : > { %8029 = vmatpush3.bf16.msra.mxu0 %v8026_v11  ;;  %v3360_v26 = vpop.f32.mrb[97].mxu1  ;;  %7701 = vmatprep.mubr.msk.f32.mxu0 %vm3976_vm1, %v8818_v35  ;;  %v8830_v60 = vpop.eup %8829  ;;  %8843 = vtanh.f32 %v3356_v48  ;;  %v3366_v18 = vadd.f32 %v7508_v51, %v10277_v49 }
 0x2b7   : > { %8031 = vmatprep.subr.bf16.mxu0 %v8030_v29  ;;  %v3361_v3 = vadd.f32 %v10277_v49, %v3360_v26  ;;  %v8832_v9 = vpop.eup %8831 }
 0x2b8   : > { %v8834_v61 = vpop.eup %8833 }
 0x2b9   : > { %v7511_v56 = vpop.f32.mrb[98].mxu1  ;;  %7702 = vmatmul.mubr.msk.f32.gmra.mrb[66].mxu0 %vm3976_vm1, %v8820_v23  ;;  %8845 = vtanh.f32 %v3361_v3  ;;  %v8836_v6 = vpop.eup %8835  ;;  %v6659_v3 = vld [vmem:[%s10798_s7 + $0xe0] sm:$0xff] }
 0x2ba   : > { %v3370_v10 = vpop.f32.mrb[99].mxu1  ;;  %7704 = vmatprep.mubr.msk.f32.mxu0 %vm3976_vm1, %v8822_v38  ;;  %8033 = vmatpush3.bf16.msra.mxu0 %v8030_v29  ;;  %8847 = vtanh.f32 %v3366_v18  ;;  %v3376_v53 = vadd.f32 %v7511_v56, %v10277_v49  ;;  %v6648_v29 = vld [vmem:[%s10798_s7 + $0xc8] sm:$0xff] }
 0x2bb   : > { %8035 = vmatprep.subr.bf16.mxu0 %v8034_v12  ;;  %v3371_v30 = vadd.f32 %v10277_v49, %v3370_v10  ;;  %v8838_v11 = vpop.eup %8837  ;;  %v8050_v50 = vpack.c.bf16 %v6648_v29, %v6647_v52 }
 0x2bc   : > { %v8840_v25 = vpop.eup %8839 }
 0x2bd   : > { %v7514_v7 = vpop.f32.mrb[100].mxu1  ;;  %7705 = vmatmul.mubr.msk.f32.gmra.mrb[68].mxu0 %vm3976_vm1, %v8824_v16  ;;  %8849 = vtanh.f32 %v3371_v30 }
 0x2be   : > { %v3380_v28 = vpop.f32.mrb[101].mxu1  ;;  %7707 = vmatprep.mubr.msk.f32.mxu0 %vm3976_vm1, %v8826_v55  ;;  %8851 = vtanh.f32 %v3376_v53  ;;  %v3386_v44 = vadd.f32 %v7514_v7, %v10277_v49 }
 0x2bf   : > { %v3381_v20 = vadd.f32 %v10277_v49, %v3380_v28  ;;  %v8842_v19 = vpop.eup %8841  ;;  %v6649_v28 = vld [vmem:[%s10798_s7 + $0xd0] sm:$0xff] }
 0x2c0   : > { %v8844_v36 = vpop.eup %8843  ;;  %v8054_v48 = vpack.c.bf16 %v6650_v37, %v6649_v28  ;;  %v6683_v28 = vld [vmem:[%s10798_s7 + $0x120] sm:$0xff]  ;;  %v6684_v37 = vld [vmem:[%s10798_s7 + $0x128] sm:$0xff] }
 0x2c1   : > { %v7517_v15 = vpop.f32.mrb[102].mxu1  ;;  %7708 = vmatmul.mubr.msk.f32.gmra.mrb[70].mxu0 %vm3976_vm1, %v8828_v33  ;;  %8853 = vtanh.f32 %v3381_v20 }
 0x2c2   : > { %v3390_v58 = vpop.f32.mrb[103].mxu1  ;;  %7718 = vmatprep.mubr.msk.f32.mxu0 %vm3976_vm1, %v8830_v60  ;;  %8855 = vtanh.f32 %v3386_v44  ;;  %v3396_v46 = vadd.f32 %v7517_v15, %v10277_v49  ;;  %v6662_v44 = vld [vmem:[%s10798_s7 + $0xf8] sm:$0xff] }
 0x2c3   : > { %v3391_v32 = vadd.f32 %v10277_v49, %v3390_v58  ;;  %v8846_v21 = vpop.eup %8845 }
 0x2c4   : > { %v8848_v45 = vpop.eup %8847 }
 0x2c5   : > { %v7520_v1 = vpop.f32.mrb[104].mxu1  ;;  %7719 = vmatmul.mubr.msk.f32.vlgmr.msra.gmra.mrb[64].mxu0 %vm3976_vm1, %v8832_v9  ;;  %8857 = vtanh.f32 %v3391_v32 }
 0x2c6   : > { %8037 = vmatpush3.bf16.msra.mxu0 %v8034_v12  ;;  %v3400_v40 = vpop.f32.mrb[105].mxu1  ;;  %7721 = vmatprep.mubr.msk.f32.mxu0 %vm3976_vm1, %v8834_v61  ;;  %8859 = vtanh.f32 %v3396_v46  ;;  %v3406_v17 = vadd.f32 %v7520_v1, %v10277_v49 }
 0x2c7   : > { %8039 = vmatprep.subr.bf16.mxu0 %v8038_v5  ;;  %v3401_v62 = vadd.f32 %v10277_v49, %v3400_v40  ;;  %v8850_v59 = vpop.eup %8849 }
 0x2c8   : > { %v8852_v26 = vpop.eup %8851 }
 0x2c9   : > { %v7523_v27 = vpop.f32.mrb[106].mxu1  ;;  %7722 = vmatmul.mubr.msk.f32.gmra.mrb[66].mxu0 %vm3976_vm1, %v8836_v6  ;;  %8861 = vtanh.f32 %v3401_v62 }
 0x2ca   : > { %v3410_v24 = vpop.f32.mrb[107].mxu1  ;;  %7724 = vmatprep.mubr.msk.f32.mxu0 %vm3976_vm1, %v8838_v11  ;;  %8041 = vmatpush3.bf16.msra.mxu0 %v8038_v5  ;;  %8863 = vtanh.f32 %v3406_v17  ;;  %v3416_v23 = vadd.f32 %v7523_v27, %v10277_v49  ;;  %v6660_v5 = vld [vmem:[%s10798_s7 + $0xe8] sm:$0xff] }
 0x2cb   : > { %8043 = vmatprep.subr.bf16.mxu0 %v8042_v14  ;;  %v3411_v51 = vadd.f32 %v10277_v49, %v3410_v24  ;;  %v8854_v2 = vpop.eup %8853  ;;  %v8058_v18 = vpack.c.bf16 %v6660_v5, %v6659_v3 }
 0x2cc   : > { %v8856_v41 = vpop.eup %8855 }
 0x2cd   : > { %v7526_v34 = vpop.f32.mrb[108].mxu1  ;;  %7725 = vmatmul.mubr.msk.f32.gmra.mrb[68].mxu0 %vm3976_vm1, %v8840_v25  ;;  %8865 = vtanh.f32 %v3411_v51 }
 0x2ce   : > { %v3420_v31 = vpop.f32.mrb[109].mxu1  ;;  %7727 = vmatprep.mubr.msk.f32.mxu0 %vm3976_vm1, %v8842_v19  ;;  %8867 = vtanh.f32 %v3416_v23  ;;  %v3426_v16 = vadd.f32 %v7526_v34, %v10277_v49  ;;  %v6661_v34 = vld [vmem:[%s10798_s7 + $0xf0] sm:$0xff] }
 0x2cf   : > { %v3421_v56 = vadd.f32 %v10277_v49, %v3420_v31  ;;  %v8858_v10 = vpop.eup %8857  ;;  %v8062_v63 = vpack.c.bf16 %v6662_v44, %v6661_v34 }
 0x2d0   : > { %v8860_v8 = vpop.eup %8859 }
 0x2d1   : > { %v7529_v39 = vpop.f32.mrb[110].mxu1  ;;  %7728 = vmatmul.mubr.msk.f32.gmra.mrb[70].mxu0 %vm3976_vm1, %v8844_v36  ;;  %8869 = vtanh.f32 %v3421_v56  ;;  %v6674_v56 = vld [vmem:[%s10798_s7 + $0x118] sm:$0xff] }
 0x2d2   : > { %v3430_v0 = vpop.f32.mrb[111].mxu1  ;;  %7738 = vmatprep.mubr.msk.f32.mxu0 %vm3976_vm1, %v8846_v21  ;;  %8871 = vtanh.f32 %v3426_v16  ;;  %v3436_v4 = vadd.f32 %v7529_v39, %v10277_v49  ;;  %v6671_v21 = vld [vmem:[%s10798_s7 + $0x100] sm:$0xff]  ;;  %v6672_v39 = vld [vmem:[%s10798_s7 + $0x108] sm:$0xff] }
 0x2d3   : > { %v3431_v7 = vadd.f32 %v10277_v49, %v3430_v0  ;;  %v8862_v33 = vpop.eup %8861  ;;  %v8066_v52 = vpack.c.bf16 %v6672_v39, %v6671_v21 }
 0x2d4   : > { %v8864_v58 = vpop.eup %8863 }
 0x2d5   : > { %v7532_v47 = vpop.f32.mrb[112].mxu1  ;;  %7739 = vmatmul.mubr.msk.f32.vlgmr.msra.gmra.mrb[64].mxu0 %vm3976_vm1, %v8848_v45  ;;  %8873 = vtanh.f32 %v3431_v7 }
 0x2d6   : > { %8045 = vmatpush3.bf16.msra.mxu0 %v8042_v14  ;;  %v3440_v35 = vpop.f32.mrb[113].mxu1  ;;  %7741 = vmatprep.mubr.msk.f32.mxu0 %vm3976_vm1, %v8850_v59  ;;  %8875 = vtanh.f32 %v3436_v4  ;;  %v3446_v22 = vadd.f32 %v7532_v47, %v10277_v49 }
 0x2d7   : > { %8047 = vmatprep.subr.bf16.mxu0 %v8046_v42  ;;  %v3441_v15 = vadd.f32 %v10277_v49, %v3440_v35  ;;  %v8866_v9 = vpop.eup %8865 }
 0x2d8   : > { %v8868_v40 = vpop.eup %8867 }
 0x2d9   : > { %v7535_v12 = vpop.f32.mrb[114].mxu1  ;;  %7742 = vmatmul.mubr.msk.f32.gmra.mrb[66].mxu0 %vm3976_vm1, %v8852_v26  ;;  %8877 = vtanh.f32 %v3441_v15  ;;  %v8074_v15 = vpack.c.bf16 %v6684_v37, %v6683_v28 }
 0x2da   : > { %v3450_v38 = vpop.f32.mrb[115].mxu1  ;;  %7744 = vmatprep.mubr.msk.f32.mxu0 %vm3976_vm1, %v8854_v2  ;;  %8049 = vmatpush3.bf16.msra.mxu0 %v8046_v42  ;;  %8879 = vtanh.f32 %v3446_v22  ;;  %v3456_v14 = vadd.f32 %v7535_v12, %v10277_v49 }
 0x2db   : > { %8051 = vmatprep.subr.bf16.mxu0 %v8050_v50  ;;  %v3451_v61 = vadd.f32 %v10277_v49, %v3450_v38  ;;  %v8870_v30 = vpop.eup %8869  ;;  %v6673_v38 = vld [vmem:[%s10798_s7 + $0x110] sm:$0xff] }
 0x2dc   : > { %v8872_v11 = vpop.eup %8871 }
 0x2dd   : > { %v7538_v54 = vpop.f32.mrb[116].mxu1  ;;  %7745 = vmatmul.mubr.msk.f32.gmra.mrb[68].mxu0 %vm3976_vm1, %v8856_v41  ;;  %8881 = vtanh.f32 %v3451_v61 }
 0x2de   : > { %v3460_v55 = vpop.f32.mrb[117].mxu1  ;;  %7747 = vmatprep.mubr.msk.f32.mxu0 %vm3976_vm1, %v8858_v10  ;;  %8883 = vtanh.f32 %v3456_v14  ;;  %v3466_v53 = vadd.f32 %v7538_v54, %v10277_v49 }
 0x2df   : > { %v3461_v6 = vadd.f32 %v10277_v49, %v3460_v55  ;;  %v8874_v27 = vpop.eup %8873  ;;  %v8070_v55 = vpack.c.bf16 %v6674_v56, %v6673_v38 }
 0x2e0   : > { %v8876_v19 = vpop.eup %8875 }
 0x2e1   : > { %v7541_v57 = vpop.f32.mrb[118].mxu1  ;;  %7748 = vmatmul.mubr.msk.f32.gmra.mrb[70].mxu0 %vm3976_vm1, %v8860_v8  ;;  %8885 = vtanh.f32 %v3461_v6 }
 0x2e2   : > { %v3470_v60 = vpop.f32.mrb[119].mxu1  ;;  %7758 = vmatprep.mubr.msk.f32.mxu0 %vm3976_vm1, %v8862_v33  ;;  %8887 = vtanh.f32 %v3466_v53  ;;  %v3476_v32 = vadd.f32 %v7541_v57, %v10277_v49  ;;  %v6686_v53 = vld [vmem:[%s10798_s7 + $0x138] sm:$0xff] }
 0x2e3   : > { %v3471_v20 = vadd.f32 %v10277_v49, %v3470_v60  ;;  %v8878_v31 = vpop.eup %8877 }
 0x2e4   : > { %v8880_v43 = vpop.eup %8879 }
 0x2e5   : > { %7759 = vmatmul.mubr.msk.f32.vlgmr.msra.gmra.mrb[64].mxu0 %vm3976_vm1, %v8864_v58  ;;  %8889 = vtanh.f32 %v3471_v20 }
 0x2e6   : > { %8053 = vmatpush3.bf16.msra.mxu0 %v8050_v50  ;;  %7761 = vmatprep.mubr.msk.f32.mxu0 %vm3976_vm1, %v8866_v9  ;;  %v7544_v13 = vpop.f32.mrb[120].mxu1  ;;  %8891 = vtanh.f32 %v3476_v32  ;;  %v6695_v32 = vld [vmem:[%s10798_s7 + $0x140] sm:$0xff] }
 0x2e7   : > { %v3480_v1 = vpop.f32.mrb[121].mxu1  ;;  %8055 = vmatprep.subr.bf16.mxu0 %v8054_v48  ;;  %v8882_v46 = vpop.eup %8881  ;;  %v3486_v0 = vadd.f32 %v7544_v13, %v10277_v49 }
 0x2e8   : > { %v3481_v36 = vadd.f32 %v10277_v49, %v3480_v1  ;;  %v8884_v29 = vpop.eup %8883 }
 0x2e9   : > { %7762 = vmatmul.mubr.msk.f32.gmra.mrb[66].mxu0 %vm3976_vm1, %v8868_v40 }
 0x2ea   : > { %7764 = vmatprep.mubr.msk.f32.mxu0 %vm3976_vm1, %v8870_v30  ;;  %8057 = vmatpush3.bf16.msra.mxu0 %v8054_v48  ;;  %8893 = vtanh.f32 %v3481_v36  ;;  %v6696_v36 = vld [vmem:[%s10798_s7 + $0x148] sm:$0xff] }
 0x2eb   : > { %8059 = vmatprep.subr.bf16.mxu0 %v8058_v18  ;;  %v8886_v59 = vpop.eup %8885  ;;  %8895 = vtanh.f32 %v3486_v0 }
 0x2ec   : > { %v8888_v35 = vpop.eup %8887 }
 0x2ed   : > { %7765 = vmatmul.mubr.msk.f32.gmra.mrb[68].mxu0 %vm3976_vm1, %v8872_v11 }
 0x2ee   : > { %7767 = vmatprep.mubr.msk.f32.mxu0 %vm3976_vm1, %v8874_v27  ;;  %v7547_v24 = vpop.f32.mrb[122].mxu1  ;;  %v6685_v27 = vld [vmem:[%s10798_s7 + $0x130] sm:$0xff] }
 0x2ef   : > { %v3490_v25 = vpop.f32.mrb[123].mxu1  ;;  %v3496_v47 = vadd.f32 %v7547_v24, %v10277_v49  ;;  %v8890_v51 = vpop.eup %8889  ;;  %v8078_v34 = vpack.c.bf16 %v6686_v53, %v6685_v27 }
 0x2f0   : > { %v3491_v42 = vadd.f32 %v10277_v49, %v3490_v25  ;;  %v8892_v12 = vpop.eup %8891 }
 0x2f1   : > { %7768 = vmatmul.mubr.msk.f32.gmra.mrb[70].mxu0 %vm3976_vm1, %v8876_v19 }
 0x2f2   : > { %7778 = vmatprep.mubr.msk.f32.mxu0 %vm3976_vm1, %v8878_v31  ;;  %8897 = vtanh.f32 %v3491_v42 }
 0x2f3   : > { %8899 = vtanh.f32 %v3496_v47  ;;  %v10601_v47 = vld [vmem:[%s10797_s6] ss:$0 sm:$0xff] }
 0x2f4   : > { %v8894_v41 = vpop.eup %8893 }
 0x2f5   : > { %7779 = vmatmul.mubr.msk.f32.vlgmr.msra.gmra.mrb[64].mxu0 %vm3976_vm1, %v8880_v43  ;;  %v8896_v7 = vpop.eup %8895 }
 0x2f6   : > { %8061 = vmatpush3.bf16.msra.mxu0 %v8058_v18  ;;  %7781 = vmatprep.mubr.msk.f32.mxu0 %vm3976_vm1, %v8882_v46  ;;  %v7550_v62 = vpop.f32.mrb[124].mxu1  ;;  %v8082_v46 = vpack.c.bf16 %v6696_v36, %v6695_v32 }
 0x2f7   : > { %v3500_v45 = vpop.f32.mrb[125].mxu1  ;;  %8063 = vmatprep.subr.bf16.mxu0 %v8062_v63  ;;  %v3506_v50 = vadd.f32 %v7550_v62, %v10277_v49 }
 0x2f8   : > { %v3501_v17 = vadd.f32 %v10277_v49, %v3500_v45 }
 0x2f9   : > { %7782 = vmatmul.mubr.msk.f32.gmra.mrb[66].mxu0 %vm3976_vm1, %v8884_v29 }
 0x2fa   : > { %7784 = vmatprep.mubr.msk.f32.mxu0 %vm3976_vm1, %v8886_v59  ;;  %8065 = vmatpush3.bf16.msra.mxu0 %v8062_v63  ;;  %8901 = vtanh.f32 %v3501_v17 }
 0x2fb   : > { %8067 = vmatprep.subr.bf16.mxu0 %v8066_v52  ;;  %8903 = vtanh.f32 %v3506_v50 }
 0x2fc   : > { %v8898_v33 = vpop.eup %8897 }
 0x2fd   : > { %7785 = vmatmul.mubr.msk.f32.gmra.mrb[68].mxu0 %vm3976_vm1, %v8888_v35  ;;  %v8900_v48 = vpop.eup %8899 }
 0x2fe   : > { %7787 = vmatprep.mubr.msk.f32.mxu0 %vm3976_vm1, %v8890_v51  ;;  %v7553_v26 = vpop.f32.mrb[126].mxu1 }
 0x2ff   : > { %v3510_v2 = vpop.f32.mrb[127].mxu1  ;;  %v3516_v10 = vadd.f32 %v7553_v26, %v10277_v49 }
 0x300   : > { %v3511_v23 = vadd.f32 %v10277_v49, %v3510_v2 }
 0x301   : > { %7788 = vmatmul.mubr.msk.f32.gmra.mrb[70].mxu0 %vm3976_vm1, %v8892_v12  ;;  %v6697_v12 = vld [vmem:[%s10798_s7 + $0x150] sm:$0xff] }
 0x302   : > { %8905 = vtanh.f32 %v3511_v23  ;;  %7798 = vmatprep.mubr.msk.f32.mxu0 %vm3976_vm1, %v8894_v41  ;;  %v7556_v54 = vpop.f32.mrb[128].mxu1  ;;  %v6698_v23 = vld [vmem:[%s10798_s7 + $0x158] sm:$0xff] }
 0x303   : > { %v3520_v16 = vpop.f32.mrb[129].mxu1  ;;  %8907 = vtanh.f32 %v3516_v10  ;;  %v3526_v57 = vadd.f32 %v7556_v54, %v10277_v49  ;;  %v8086_v54 = vpack.c.bf16 %v6698_v23, %v6697_v12 }
 0x304   : > { %v3521_v8 = vadd.f32 %v10277_v49, %v3520_v16  ;;  %v8902_v3 = vpop.eup %8901 }
 0x305   : > { %7799 = vmatmul.mubr.msk.f32.vlgmr.msra.gmra.mrb[64].mxu0 %vm3976_vm1, %v8896_v7  ;;  %v8904_v22 = vpop.eup %8903  ;;  %v6707_v7 = vld [vmem:[%s10798_s7 + $0x160] sm:$0xff] }
 0x306   : > { %8909 = vtanh.f32 %v3521_v8  ;;  %8069 = vmatpush3.bf16.msra.mxu0 %v8066_v52  ;;  %7801 = vmatprep.mubr.msk.f32.mxu0 %vm3976_vm1, %v8898_v33  ;;  %v7559_v4 = vpop.f32.mrb[130].mxu1  ;;  %v6708_v8 = vld [vmem:[%s10798_s7 + $0x168] sm:$0xff] }
 0x307   : > { %v3530_v60 = vpop.f32.mrb[131].mxu1  ;;  %8071 = vmatprep.subr.bf16.mxu0 %v8070_v55  ;;  %8911 = vtanh.f32 %v3526_v57  ;;  %v3536_v5 = vadd.f32 %v7559_v4, %v10277_v49  ;;  %v8090_v4 = vpack.c.bf16 %v6708_v8, %v6707_v7 }
 0x308   : > { %v3531_v58 = vadd.f32 %v10277_v49, %v3530_v60 }
 0x309   : > { %7802 = vmatmul.mubr.msk.f32.gmra.mrb[66].mxu0 %vm3976_vm1, %v8900_v48 }
 0x30a   : > { %8913 = vtanh.f32 %v3531_v58  ;;  %7804 = vmatprep.mubr.msk.f32.mxu0 %vm3976_vm1, %v8902_v3  ;;  %v7562_v9 = vpop.f32.mrb[132].mxu1  ;;  %8073 = vmatpush3.bf16.msra.mxu0 %v8070_v55 }
 0x30b   : > { %v3540_v13 = vpop.f32.mrb[133].mxu1  ;;  %8075 = vmatprep.subr.bf16.mxu0 %v8074_v15  ;;  %8915 = vtanh.f32 %v3536_v5  ;;  %v3546_v18 = vadd.f32 %v7562_v9, %v10277_v49 }
 0x30c   : > { %v8906_v61 = vpop.eup %8905  ;;  %v3541_v1 = vadd.f32 %v10277_v49, %v3540_v13 }
 0x30d   : > { %7805 = vmatmul.mubr.msk.f32.gmra.mrb[68].mxu0 %vm3976_vm1, %v8904_v22  ;;  %v8908_v30 = vpop.eup %8907 }
 0x30e   : > { %8917 = vtanh.f32 %v3541_v1  ;;  %7807 = vmatprep.mubr.msk.f32.mxu0 %vm3976_vm1, %v8906_v61  ;;  %v7565_v40 = vpop.f32.mrb[134].mxu1 }
 0x30f   : > { %v3550_v14 = vpop.f32.mrb[135].mxu1  ;;  %8919 = vtanh.f32 %v3546_v18  ;;  %v3556_v24 = vadd.f32 %v7565_v40, %v10277_v49 }
 0x310   : > { %v8910_v6 = vpop.eup %8909  ;;  %v3551_v11 = vadd.f32 %v10277_v49, %v3550_v14  ;;  %v6709_v14 = vld [vmem:[%s10798_s7 + $0x170] sm:$0xff] }
 0x311   : > { %7808 = vmatmul.mubr.msk.f32.gmra.mrb[70].mxu0 %vm3976_vm1, %v8908_v30  ;;  %v8912_v25 = vpop.eup %8911 }
 0x312   : > { %8921 = vtanh.f32 %v3551_v11  ;;  %7818 = vmatprep.mubr.msk.f32.mxu0 %vm3976_vm1, %v8910_v6  ;;  %v7568_v20 = vpop.f32.mrb[136].mxu1  ;;  %v6710_v6 = vld [vmem:[%s10798_s7 + $0x178] sm:$0xff] }
 0x313   : > { %v3560_v19 = vpop.f32.mrb[137].mxu1  ;;  %8923 = vtanh.f32 %v3556_v24  ;;  %v3566_v63 = vadd.f32 %v7568_v20, %v10277_v49  ;;  %v8094_v20 = vpack.c.bf16 %v6710_v6, %v6709_v14 }
 0x314   : > { %v8914_v44 = vpop.eup %8913  ;;  %v3561_v31 = vadd.f32 %v10277_v49, %v3560_v19 }
 0x315   : > { %7819 = vmatmul.mubr.msk.f32.vlgmr.msra.gmra.mrb[64].mxu0 %vm3976_vm1, %v8912_v25  ;;  %v8916_v21 = vpop.eup %8915 }
 0x316   : > { %8925 = vtanh.f32 %v3561_v31  ;;  %8077 = vmatpush3.bf16.msra.mxu0 %v8074_v15  ;;  %7821 = vmatprep.mubr.msk.f32.mxu0 %vm3976_vm1, %v8914_v44  ;;  %v7571_v43 = vpop.f32.mrb[138].mxu1  ;;  %v6720_v44 = vld [vmem:[%s10798_s7 + $0x188] sm:$0xff] }
 0x317   : > { %v3570_v39 = vpop.f32.mrb[139].mxu1  ;;  %8079 = vmatprep.subr.bf16.mxu0 %v8078_v34  ;;  %8927 = vtanh.f32 %v3566_v63  ;;  %v3576_v42 = vadd.f32 %v7571_v43, %v10277_v49 }
 0x318   : > { %v8918_v0 = vpop.eup %8917  ;;  %v3571_v62 = vadd.f32 %v10277_v49, %v3570_v39 }
 0x319   : > { %7822 = vmatmul.mubr.msk.f32.gmra.mrb[66].mxu0 %vm3976_vm1, %v8916_v21  ;;  %v8920_v52 = vpop.eup %8919 }
 0x31a   : > { %8929 = vtanh.f32 %v3571_v62  ;;  %7824 = vmatprep.mubr.msk.f32.mxu0 %vm3976_vm1, %v8918_v0  ;;  %v7574_v45 = vpop.f32.mrb[140].mxu1  ;;  %8081 = vmatpush3.bf16.msra.mxu0 %v8078_v34  ;;  %v6719_v34 = vld [vmem:[%s10798_s7 + $0x180] sm:$0xff] }
 0x31b   : > { %v3580_v29 = vpop.f32.mrb[141].mxu1  ;;  %8083 = vmatprep.subr.bf16.mxu0 %v8082_v46  ;;  %8931 = vtanh.f32 %v3576_v42  ;;  %v3586_v49 = vadd.f32 %v10601_v47, %v7574_v45  ;;  %v8098_v43 = vpack.c.bf16 %v6720_v44, %v6719_v34 }
 0x31c   : > { %v8922_v59 = vpop.eup %8921  ;;  %v3581_v17 = vadd.f32 %v10601_v47, %v3580_v29 }
 0x31d   : > { %7825 = vmatmul.mubr.msk.f32.gmra.mrb[68].mxu0 %vm3976_vm1, %v8920_v52  ;;  %v8924_v51 = vpop.eup %8923 }
 0x31e   : > { %8933 = vtanh.f32 %v3581_v17  ;;  %7827 = vmatprep.mubr.msk.f32.mxu0 %vm3976_vm1, %v8922_v59  ;;  %v7577_v35 = vpop.f32.mrb[142].mxu1 }
 0x31f   : > { %v3590_v50 = vpop.f32.mrb[143].mxu1  ;;  %8935 = vtanh.f32 %v3586_v49  ;;  %v3596_v38 = vadd.f32 %v10601_v47, %v7577_v35 }
 0x320   : > { %v8926_v26 = vpop.eup %8925  ;;  %v3591_v2 = vadd.f32 %v10601_v47, %v3590_v50  ;;  %v6721_v50 = vld [vmem:[%s10798_s7 + $0x190] sm:$0xff] }
 0x321   : > { %7828 = vmatmul.mubr.msk.f32.gmra.mrb[70].mxu0 %vm3976_vm1, %v8924_v51  ;;  %v8928_v41 = vpop.eup %8927 }
 0x322   : > { %8937 = vtanh.f32 %v3591_v2  ;;  %7838 = vmatprep.mubr.msk.f32.mxu0 %vm3976_vm1, %v8926_v26  ;;  %v7580_v56 = vpop.f32.mrb[144].mxu1  ;;  %v6722_v26 = vld [vmem:[%s10798_s7 + $0x198] sm:$0xff] }
 0x323   : > { %v3600_v10 = vpop.f32.mrb[145].mxu1  ;;  %8939 = vtanh.f32 %v3596_v38  ;;  %v3606_v28 = vadd.f32 %v10601_v47, %v7580_v56  ;;  %v8102_v56 = vpack.c.bf16 %v6722_v26, %v6721_v50 }
 0x324   : > { %v8930_v16 = vpop.eup %8929  ;;  %v3601_v55 = vadd.f32 %v10601_v47, %v3600_v10 }
 0x325   : > { %7839 = vmatmul.mubr.msk.f32.vlgmr.msra.gmra.mrb[64].mxu0 %vm3976_vm1, %v8928_v41  ;;  %v8932_v33 = vpop.eup %8931 }
 0x326   : > { %8941 = vtanh.f32 %v3601_v55  ;;  %8085 = vmatpush3.bf16.msra.mxu0 %v8082_v46  ;;  %7841 = vmatprep.mubr.msk.f32.mxu0 %vm3976_vm1, %v8930_v16  ;;  %v7583_v37 = vpop.f32.mrb[146].mxu1  ;;  %v6732_v16 = vld [vmem:[%s10798_s7 + $0x1a8] sm:$0xff] }
 0x327   : > { %v3610_v57 = vpop.f32.mrb[147].mxu1  ;;  %8087 = vmatprep.subr.bf16.mxu0 %v8086_v54  ;;  %8943 = vtanh.f32 %v3606_v28  ;;  %v3616_v48 = vadd.f32 %v10601_v47, %v7583_v37 }
 0x328   : > { %v8934_v60 = vpop.eup %8933  ;;  %v3611_v15 = vadd.f32 %v10601_v47, %v3610_v57 }
 0x329   : > { %7842 = vmatmul.mubr.msk.f32.gmra.mrb[66].mxu0 %vm3976_vm1, %v8932_v33  ;;  %v8936_v3 = vpop.eup %8935 }
 0x32a   : > { %8945 = vtanh.f32 %v3611_v15  ;;  %7844 = vmatprep.mubr.msk.f32.mxu0 %vm3976_vm1, %v8934_v60  ;;  %v7586_v58 = vpop.f32.mrb[148].mxu1  ;;  %8089 = vmatpush3.bf16.msra.mxu0 %v8086_v54  ;;  %v6731_v54 = vld [vmem:[%s10798_s7 + $0x1a0] sm:$0xff] }
 0x32b   : > { %v3620_v5 = vpop.f32.mrb[149].mxu1  ;;  %8091 = vmatprep.subr.bf16.mxu0 %v8090_v4  ;;  %8947 = vtanh.f32 %v3616_v48  ;;  %v3626_v13 = vadd.f32 %v10601_v47, %v7586_v58  ;;  %v8106_v37 = vpack.c.bf16 %v6732_v16, %v6731_v54 }
 0x32c   : > { %v8938_v9 = vpop.eup %8937  ;;  %v3621_v22 = vadd.f32 %v10601_v47, %v3620_v5 }
 0x32d   : > { %7845 = vmatmul.mubr.msk.f32.gmra.mrb[68].mxu0 %vm3976_vm1, %v8936_v3  ;;  %v8940_v1 = vpop.eup %8939 }
 0x32e   : > { %8949 = vtanh.f32 %v3621_v22  ;;  %7847 = vmatprep.mubr.msk.f32.mxu0 %vm3976_vm1, %v8938_v9  ;;  %v7589_v61 = vpop.f32.mrb[150].mxu1 }
 0x32f   : > { %v3630_v18 = vpop.f32.mrb[151].mxu1  ;;  %8951 = vtanh.f32 %v3626_v13  ;;  %v3636_v11 = vadd.f32 %v10601_v47, %v7589_v61 }
 0x330   : > { %v8942_v40 = vpop.eup %8941  ;;  %v3631_v30 = vadd.f32 %v10601_v47, %v3630_v18  ;;  %v6733_v18 = vld [vmem:[%s10798_s7 + $0x1b0] sm:$0xff] }
 0x331   : > { %7848 = vmatmul.mubr.msk.f32.gmra.mrb[70].mxu0 %vm3976_vm1, %v8940_v1  ;;  %v8944_v53 = vpop.eup %8943 }
 0x332   : > { %8953 = vtanh.f32 %v3631_v30  ;;  %7858 = vmatprep.mubr.msk.f32.mxu0 %vm3976_vm1, %v8942_v40  ;;  %v7592_v27 = vpop.f32.mrb[152].mxu1  ;;  %v6734_v40 = vld [vmem:[%s10798_s7 + $0x1b8] sm:$0xff] }
 0x333   : > { %v3640_v24 = vpop.f32.mrb[153].mxu1  ;;  %8955 = vtanh.f32 %v3636_v11  ;;  %v3646_v31 = vadd.f32 %v10601_v47, %v7592_v27  ;;  %v8110_v27 = vpack.c.bf16 %v6734_v40, %v6733_v18 }
 0x334   : > { %v8946_v25 = vpop.eup %8945  ;;  %v3641_v19 = vadd.f32 %v10601_v47, %v3640_v24 }
 0x335   : > { %7859 = vmatmul.mubr.msk.f32.vlgmr.msra.gmra.mrb[64].mxu0 %vm3976_vm1, %v8944_v53  ;;  %v8948_v36 = vpop.eup %8947 }
 0x336   : > { %8957 = vtanh.f32 %v3641_v19  ;;  %8093 = vmatpush3.bf16.msra.mxu0 %v8090_v4  ;;  %7861 = vmatprep.mubr.msk.f32.mxu0 %vm3976_vm1, %v8946_v25  ;;  %v7595_v32 = vpop.f32.mrb[154].mxu1  ;;  %v6744_v25 = vld [vmem:[%s10798_s7 + $0x1c8] sm:$0xff] }
 0x337   : > { %v3650_v63 = vpop.f32.mrb[155].mxu1  ;;  %8095 = vmatprep.subr.bf16.mxu0 %v8094_v20  ;;  %8959 = vtanh.f32 %v3646_v31  ;;  %v3656_v46 = vadd.f32 %v10601_v47, %v7595_v32 }
 0x338   : > { %v8950_v21 = vpop.eup %8949  ;;  %v3651_v39 = vadd.f32 %v10601_v47, %v3650_v63 }
 0x339   : > { %7862 = vmatmul.mubr.msk.f32.gmra.mrb[66].mxu0 %vm3976_vm1, %v8948_v36  ;;  %v8952_v62 = vpop.eup %8951 }
 0x33a   : > { %8961 = vtanh.f32 %v3651_v39  ;;  %7864 = vmatprep.mubr.msk.f32.mxu0 %vm3976_vm1, %v8950_v21  ;;  %v7598_v0 = vpop.f32.mrb[156].mxu1  ;;  %8097 = vmatpush3.bf16.msra.mxu0 %v8094_v20  ;;  %v6743_v20 = vld [vmem:[%s10798_s7 + $0x1c0] sm:$0xff] }
 0x33b   : > { %v3660_v42 = vpop.f32.mrb[157].mxu1  ;;  %8099 = vmatprep.subr.bf16.mxu0 %v8098_v43  ;;  %8963 = vtanh.f32 %v3656_v46  ;;  %v3666_v29 = vadd.f32 %v10601_v47, %v7598_v0  ;;  %v8114_v32 = vpack.c.bf16 %v6744_v25, %v6743_v20 }
 0x33c   : > { %v8954_v45 = vpop.eup %8953  ;;  %v3661_v52 = vadd.f32 %v10601_v47, %v3660_v42 }
 0x33d   : > { %7865 = vmatmul.mubr.msk.f32.gmra.mrb[68].mxu0 %vm3976_vm1, %v8952_v62  ;;  %v8956_v17 = vpop.eup %8955 }
 0x33e   : > { %8965 = vtanh.f32 %v3661_v52  ;;  %7867 = vmatprep.mubr.msk.f32.mxu0 %vm3976_vm1, %v8954_v45  ;;  %v7601_v59 = vpop.f32.mrb[158].mxu1 }
 0x33f   : > { %v3670_v49 = vpop.f32.mrb[159].mxu1  ;;  %8967 = vtanh.f32 %v3666_v29  ;;  %v3676_v2 = vadd.f32 %v10601_v47, %v7601_v59 }
 0x340   : > { %v8958_v35 = vpop.eup %8957  ;;  %v3671_v51 = vadd.f32 %v10601_v47, %v3670_v49  ;;  %v6745_v49 = vld [vmem:[%s10798_s7 + $0x1d0] sm:$0xff] }
 0x341   : > { %7868 = vmatmul.mubr.msk.f32.gmra.mrb[70].mxu0 %vm3976_vm1, %v8956_v17  ;;  %v8960_v23 = vpop.eup %8959 }
 0x342   : > { %8969 = vtanh.f32 %v3671_v51  ;;  %7878 = vmatprep.mubr.msk.f32.mxu0 %vm3976_vm1, %v8958_v35  ;;  %v7604_v12 = vpop.f32.mrb[160].mxu1  ;;  %v6746_v35 = vld [vmem:[%s10798_s7 + $0x1d8] sm:$0xff] }
 0x343   : > { %v3680_v38 = vpop.f32.mrb[161].mxu1  ;;  %8971 = vtanh.f32 %v3676_v2  ;;  %v3686_v55 = vadd.f32 %v10601_v47, %v7604_v12  ;;  %v8118_v12 = vpack.c.bf16 %v6746_v35, %v6745_v49  ;;  %v6767_v35 = vld [vmem:[%s10799_s8] ss:$0 sm:$0xff] }
 0x344   : > { %v8962_v41 = vpop.eup %8961  ;;  %v3681_v10 = vadd.f32 %v10601_v47, %v3680_v38 }
 0x345   : > { %7879 = vmatmul.mubr.msk.f32.vlgmr.msra.gmra.mrb[64].mxu0 %vm3976_vm1, %v8960_v23  ;;  %v8964_v8 = vpop.eup %8963 }
 0x346   : > { %8973 = vtanh.f32 %v3681_v10  ;;  %8101 = vmatpush3.bf16.msra.mxu0 %v8098_v43  ;;  %7881 = vmatprep.mubr.msk.f32.mxu0 %vm3976_vm1, %v8962_v41  ;;  %v7607_v7 = vpop.f32.mrb[162].mxu1  ;;  %v6756_v41 = vld [vmem:[%s10798_s7 + $0x1e8] sm:$0xff] }
 0x347   : > { %v3690_v28 = vpop.f32.mrb[163].mxu1  ;;  %8103 = vmatprep.subr.bf16.mxu0 %v8102_v56  ;;  %8975 = vtanh.f32 %v3686_v55  ;;  %v3696_v4 = vadd.f32 %v10601_v47, %v7607_v7 }
 0x348   : > { %v8966_v33 = vpop.eup %8965  ;;  %v3691_v57 = vadd.f32 %v10601_v47, %v3690_v28 }
 0x349   : > { %7882 = vmatmul.mubr.msk.f32.gmra.mrb[66].mxu0 %vm3976_vm1, %v8964_v8  ;;  %v8968_v15 = vpop.eup %8967 }
 0x34a   : > { %8977 = vtanh.f32 %v3691_v57  ;;  %7884 = vmatprep.mubr.msk.f32.mxu0 %vm3976_vm1, %v8966_v33  ;;  %v7610_v60 = vpop.f32.mrb[164].mxu1  ;;  %8105 = vmatpush3.bf16.msra.mxu0 %v8102_v56  ;;  %v6755_v56 = vld [vmem:[%s10798_s7 + $0x1e0] sm:$0xff] }
 0x34b   : > { %v3700_v48 = vpop.f32.mrb[165].mxu1  ;;  %8107 = vmatprep.subr.bf16.mxu0 %v8106_v37  ;;  %8979 = vtanh.f32 %v3696_v4  ;;  %v3706_v5 = vadd.f32 %v10601_v47, %v7610_v60  ;;  %v8122_v7 = vpack.c.bf16 %v6756_v41, %v6755_v56 }
 0x34c   : > { %v8970_v58 = vpop.eup %8969  ;;  %v3701_v3 = vadd.f32 %v10601_v47, %v3700_v48 }
 0x34d   : > { %7885 = vmatmul.mubr.msk.f32.gmra.mrb[68].mxu0 %vm3976_vm1, %v8968_v15  ;;  %v8972_v22 = vpop.eup %8971 }
 0x34e   : > { %8981 = vtanh.f32 %v3701_v3  ;;  %7887 = vmatprep.mubr.msk.f32.mxu0 %vm3976_vm1, %v8970_v58  ;;  %v7613_v9 = vpop.f32.mrb[166].mxu1 }
 0x34f   : > { %v3710_v13 = vpop.f32.mrb[167].mxu1  ;;  %8983 = vtanh.f32 %v3706_v5  ;;  %v3716_v30 = vadd.f32 %v10601_v47, %v7613_v9 }
 0x350   : > { %v8974_v61 = vpop.eup %8973  ;;  %v3711_v1 = vadd.f32 %v10601_v47, %v3710_v13  ;;  %v6757_v13 = vld [vmem:[%s10798_s7 + $0x1f0] sm:$0xff] }
 0x351   : > { %7888 = vmatmul.mubr.msk.f32.gmra.mrb[70].mxu0 %vm3976_vm1, %v8972_v22  ;;  %v8976_v6 = vpop.eup %8975 }
 0x352   : > { %8985 = vtanh.f32 %v3711_v1  ;;  %7898 = vmatprep.mubr.msk.f32.mxu0 %vm3976_vm1, %v8974_v61  ;;  %v7616_v14 = vpop.f32.mrb[168].mxu1  ;;  %v6758_v61 = vld [vmem:[%s10798_s7 + $0x1f8] sm:$0xff] }
 0x353   : > { %v3720_v11 = vpop.f32.mrb[169].mxu1  ;;  %8987 = vtanh.f32 %v3716_v30  ;;  %v3726_v19 = vadd.f32 %v10601_v47, %v7616_v14  ;;  %v8126_v14 = vpack.c.bf16 %v6758_v61, %v6757_v13 }
 0x354   : > { %v8978_v53 = vpop.eup %8977  ;;  %v3721_v24 = vadd.f32 %v10601_v47, %v3720_v11 }
 0x355   : > { %7899 = vmatmul.mubr.msk.f32.vlgmr.msra.gmra.mrb[64].mxu0 %vm3976_vm1, %v8976_v6  ;;  %v8980_v44 = vpop.eup %8979 }
 0x356   : > { %8989 = vtanh.f32 %v3721_v24  ;;  %8109 = vmatpush3.bf16.msra.mxu0 %v8106_v37  ;;  %7901 = vmatprep.mubr.msk.f32.mxu0 %vm3976_vm1, %v8978_v53  ;;  %v7619_v34 = vpop.f32.mrb[170].mxu1 }
 0x357   : > { %v3730_v31 = vpop.f32.mrb[171].mxu1  ;;  %8111 = vmatprep.subr.bf16.mxu0 %v8110_v27  ;;  %8991 = vtanh.f32 %v3726_v19  ;;  %v3736_v43 = vadd.f32 %v10601_v47, %v7619_v34 }
 0x358   : > { %v8982_v36 = vpop.eup %8981  ;;  %v3731_v63 = vadd.f32 %v10601_v47, %v3730_v31 }
 0x359   : > { %7902 = vmatmul.mubr.msk.f32.gmra.mrb[66].mxu0 %vm3976_vm1, %v8980_v44  ;;  %v8984_v39 = vpop.eup %8983 }
 0x35a   : > { %8993 = vtanh.f32 %v3731_v63  ;;  %7904 = vmatprep.mubr.msk.f32.mxu0 %vm3976_vm1, %v8982_v36  ;;  %v7622_v21 = vpop.f32.mrb[172].mxu1  ;;  %8113 = vmatpush3.bf16.msra.mxu0 %v8110_v27 }
 0x35b   : > { %v3740_v46 = vpop.f32.mrb[173].mxu1  ;;  %8115 = vmatprep.subr.bf16.mxu0 %v8114_v32  ;;  %8995 = vtanh.f32 %v3736_v43  ;;  %v3746_v42 = vadd.f32 %v10601_v47, %v7622_v21 }
 0x35c   : > { %v8986_v0 = vpop.eup %8985  ;;  %v3741_v62 = vadd.f32 %v10601_v47, %v3740_v46 }
 0x35d   : > { %7905 = vmatmul.mubr.msk.f32.gmra.mrb[68].mxu0 %vm3976_vm1, %v8984_v39  ;;  %v8988_v52 = vpop.eup %8987 }
 0x35e   : > { %8997 = vtanh.f32 %v3741_v62  ;;  %7907 = vmatprep.mubr.msk.f32.mxu0 %vm3976_vm1, %v8986_v0  ;;  %v7625_v45 = vpop.f32.mrb[174].mxu1 }
 0x35f   : > { %v3750_v29 = vpop.f32.mrb[175].mxu1  ;;  %8999 = vtanh.f32 %v3746_v42  ;;  %v3756_v51 = vadd.f32 %v10601_v47, %v7625_v45 }
 0x360   : > { %v8990_v59 = vpop.eup %8989  ;;  %v3751_v17 = vadd.f32 %v10601_v47, %v3750_v29 }
 0x361   : > { %7908 = vmatmul.mubr.msk.f32.gmra.mrb[70].mxu0 %vm3976_vm1, %v8988_v52  ;;  %v8992_v26 = vpop.eup %8991 }
 0x362   : > { %9001 = vtanh.f32 %v3751_v17  ;;  %7918 = vmatprep.mubr.msk.f32.mxu0 %vm3976_vm1, %v8990_v59  ;;  %v7628_v50 = vpop.f32.mrb[176].mxu1 }
 0x363   : > { %v3760_v2 = vpop.f32.mrb[177].mxu1  ;;  %9003 = vtanh.f32 %v3756_v51  ;;  %v3766_v10 = vadd.f32 %v10601_v47, %v7628_v50 }
 0x364   : > { %v8994_v23 = vpop.eup %8993  ;;  %v3761_v38 = vadd.f32 %v10601_v47, %v3760_v2 }
 0x365   : > { %7919 = vmatmul.mubr.msk.f32.vlgmr.msra.gmra.mrb[64].mxu0 %vm3976_vm1, %v8992_v26  ;;  %v8996_v16 = vpop.eup %8995 }
 0x366   : > { %9005 = vtanh.f32 %v3761_v38  ;;  %8117 = vmatpush3.bf16.msra.mxu0 %v8114_v32  ;;  %7921 = vmatprep.mubr.msk.f32.mxu0 %vm3976_vm1, %v8994_v23  ;;  %v7631_v54 = vpop.f32.mrb[178].mxu1 }
 0x367   : > { %v3770_v55 = vpop.f32.mrb[179].mxu1  ;;  %8119 = vmatprep.subr.bf16.mxu0 %v8118_v12  ;;  %9007 = vtanh.f32 %v3766_v10  ;;  %v3776_v37 = vadd.f32 %v10601_v47, %v7631_v54 }
 0x368   : > { %v8998_v8 = vpop.eup %8997  ;;  %v3771_v28 = vadd.f32 %v10601_v47, %v3770_v55 }
 0x369   : > { %7922 = vmatmul.mubr.msk.f32.gmra.mrb[66].mxu0 %vm3976_vm1, %v8996_v16  ;;  %v9000_v57 = vpop.eup %8999 }
 0x36a   : > { %9009 = vtanh.f32 %v3771_v28  ;;  %7924 = vmatprep.mubr.msk.f32.mxu0 %vm3976_vm1, %v8998_v8  ;;  %v7634_v33 = vpop.f32.mrb[180].mxu1  ;;  %8121 = vmatpush3.bf16.msra.mxu0 %v8118_v12 }
 0x36b   : > { %v3780_v4 = vpop.f32.mrb[181].mxu1  ;;  %8123 = vmatprep.subr.bf16.mxu0 %v8122_v7  ;;  %9011 = vtanh.f32 %v3776_v37  ;;  %v3786_v48 = vadd.f32 %v10601_v47, %v7634_v33 }
 0x36c   : > { %v9002_v60 = vpop.eup %9001  ;;  %v3781_v15 = vadd.f32 %v10601_v47, %v3780_v4 }
 0x36d   : > { %7925 = vmatmul.mubr.msk.f32.gmra.mrb[68].mxu0 %vm3976_vm1, %v9000_v57  ;;  %v9004_v3 = vpop.eup %9003 }
 0x36e   : > { %9013 = vtanh.f32 %v3781_v15  ;;  %7927 = vmatprep.mubr.msk.f32.mxu0 %vm3976_vm1, %v9002_v60  ;;  %v7637_v58 = vpop.f32.mrb[182].mxu1 }
 0x36f   : > { %v3790_v5 = vpop.f32.mrb[183].mxu1  ;;  %9015 = vtanh.f32 %v3786_v48  ;;  %v3796_v1 = vadd.f32 %v10601_v47, %v7637_v58 }
 0x370   : > { %v9006_v9 = vpop.eup %9005  ;;  %v3791_v22 = vadd.f32 %v10601_v47, %v3790_v5 }
 0x371   : > { %7928 = vmatmul.mubr.msk.f32.gmra.mrb[70].mxu0 %vm3976_vm1, %v9004_v3  ;;  %v9008_v40 = vpop.eup %9007 }
 0x372   : > { %9017 = vtanh.f32 %v3791_v22  ;;  %7938 = vmatprep.mubr.msk.f32.mxu0 %vm3976_vm1, %v9006_v9  ;;  %v7640_v18 = vpop.f32.mrb[184].mxu1 }
 0x373   : > { %v3800_v30 = vpop.f32.mrb[185].mxu1  ;;  %9019 = vtanh.f32 %v3796_v1  ;;  %v3806_v27 = vadd.f32 %v10601_v47, %v7640_v18 }
 0x374   : > { %v9010_v6 = vpop.eup %9009  ;;  %v3801_v11 = vadd.f32 %v10601_v47, %v3800_v30 }
 0x375   : > { %7939 = vmatmul.mubr.msk.f32.vlgmr.msra.gmra.mrb[64].mxu0 %vm3976_vm1, %v9008_v40  ;;  %v9012_v24 = vpop.eup %9011 }
 0x376   : > { %9021 = vtanh.f32 %v3801_v11  ;;  %8125 = vmatpush3.bf16.msra.mxu0 %v8122_v7  ;;  %7941 = vmatprep.mubr.msk.f32.mxu0 %vm3976_vm1, %v9010_v6  ;;  %v7643_v53 = vpop.f32.mrb[186].mxu1 }
 0x377   : > { %v3810_v20 = vpop.f32.mrb[187].mxu1  ;;  %8127 = vmatprep.subr.bf16.mxu0 %v8126_v14  ;;  %9023 = vtanh.f32 %v3806_v27  ;;  %v3816_v34 = vadd.f32 %v10601_v47, %v7643_v53 }
 0x378   : > { %v9014_v25 = vpop.eup %9013  ;;  %v3811_v19 = vadd.f32 %v10601_v47, %v3810_v20 }
 0x379   : > { %7942 = vmatmul.mubr.msk.f32.gmra.mrb[66].mxu0 %vm3976_vm1, %v9012_v24  ;;  %v9016_v31 = vpop.eup %9015 }
 0x37a   : > { %9025 = vtanh.f32 %v3811_v19  ;;  %7944 = vmatprep.mubr.msk.f32.mxu0 %vm3976_vm1, %v9014_v25  ;;  %v7646_v44 = vpop.f32.mrb[188].mxu1  ;;  %8129 = vmatpush3.bf16.msra.mxu0 %v8126_v14 }
 0x37b   : > { %v3820_v32 = vpop.f32.mrb[189].mxu1  ;;  %9027 = vtanh.f32 %v3816_v34  ;;  %v3826_v43 = vadd.f32 %v10601_v47, %v7646_v44 }
 0x37c   : > { %v9018_v36 = vpop.eup %9017  ;;  %v3821_v63 = vadd.f32 %v10601_v47, %v3820_v32 }
 0x37d   : > { %7945 = vmatmul.mubr.msk.f32.gmra.mrb[68].mxu0 %vm3976_vm1, %v9016_v31  ;;  %v9020_v39 = vpop.eup %9019 }
 0x37e   : > { %9029 = vtanh.f32 %v3821_v63  ;;  %7947 = vmatprep.mubr.msk.f32.mxu0 %vm3976_vm1, %v9018_v36  ;;  %v7649_v21 = vpop.f32.mrb[190].mxu1 }
 0x37f   : > { %v3830_v46 = vpop.f32.mrb[191].mxu1  ;;  %9031 = vtanh.f32 %v3826_v43  ;;  %v3836_v42 = vadd.f32 %v10601_v47, %v7649_v21 }
 0x380   : > { %v9022_v0 = vpop.eup %9021  ;;  %v3831_v62 = vadd.f32 %v10601_v47, %v3830_v46 }
 0x381   : > { %7948 = vmatmul.mubr.msk.f32.gmra.mrb[70].mxu0 %vm3976_vm1, %v9020_v39  ;;  %v9024_v45 = vpop.eup %9023 }
 0x382   : > { %9033 = vtanh.f32 %v3831_v62  ;;  %7958 = vmatprep.mubr.msk.f32.mxu0 %vm3976_vm1, %v9022_v0 }
 0x383   : > { %9035 = vtanh.f32 %v3836_v42 }
 0x384   : > { %v9026_v52 = vpop.eup %9025 }
 0x385   : > { %7959 = vmatmul.mubr.msk.f32.vlgmr.msra.gmra.mrb[64].mxu0 %vm3976_vm1, %v9024_v45  ;;  %v9028_v29 = vpop.eup %9027 }
 0x386   : > { %7961 = vmatprep.mubr.msk.f32.mxu0 %vm3976_vm1, %v9026_v52 }
 0x388   : > { %v9030_v59 = vpop.eup %9029 }
 0x389   : > { %7962 = vmatmul.mubr.msk.f32.gmra.mrb[66].mxu0 %vm3976_vm1, %v9028_v29  ;;  %v9032_v17 = vpop.eup %9031 }
 0x38a   : > { %7964 = vmatprep.mubr.msk.f32.mxu0 %vm3976_vm1, %v9030_v59 }
 0x38c   : > { %v9034_v49 = vpop.eup %9033 }
 0x38d   : > { %7965 = vmatmul.mubr.msk.f32.gmra.mrb[68].mxu0 %vm3976_vm1, %v9032_v17  ;;  %v9036_v47 = vpop.eup %9035 }
 0x38e   : > { %7967 = vmatprep.mubr.msk.f32.mxu0 %vm3976_vm1, %v9034_v49 }
 0x391   : > { %7968 = vmatmul.mubr.msk.f32.gmra.mrb[70].mxu0 %vm3976_vm1, %v9036_v47 }
 0x458   : > { %v7960_v51 = vpop.f32.mrb[64].mxu0 }
 0x459   : > { %v6231_v50 = vadd.f32 %v7960_v51, %v6767_v35  ;;  %v6176_v26 = vpop.f32.mrb[65].mxu0 }
 0x45a   : > { %v6230_v2 = vadd.f32 %v6767_v35, %v6176_v26 }
 0x45b   : > { %9037 = vtanh.f32 %v6231_v50 }
 0x45c   : > { %9039 = vtanh.f32 %v6230_v2  ;;  %v7963_v12 = vpop.f32.mrb[66].mxu0 }
 0x45d   : > { %v6233_v23 = vadd.f32 %v7963_v12, %v6767_v35  ;;  %v6186_v38 = vpop.f32.mrb[67].mxu0 }
 0x45e   : > { %v6232_v56 = vadd.f32 %v6767_v35, %v6186_v38 }
 0x45f   : > { %9041 = vtanh.f32 %v6233_v23 }
 0x460   : > { %9043 = vtanh.f32 %v6232_v56  ;;  %v7966_v41 = vpop.f32.mrb[68].mxu0 }
 0x461   : > { %v6235_v10 = vadd.f32 %v7966_v41, %v6767_v35  ;;  %v6196_v54 = vpop.f32.mrb[69].mxu0 }
 0x462   : > { %v6234_v16 = vadd.f32 %v6767_v35, %v6196_v54 }
 0x463   : > { %9045 = vtanh.f32 %v6235_v10 }
 0x464   : > { %9047 = vtanh.f32 %v6234_v16  ;;  %v7969_v55 = vpop.f32.mrb[70].mxu0 }
 0x465   : > { %v9038_v7 = vpop.eup %9037  ;;  %v6237_v8 = vadd.f32 %v7969_v55, %v6767_v35  ;;  %v6206_v28 = vpop.f32.mrb[71].mxu0 }
 0x466   : > { %v9040_v37 = vpop.eup %9039  ;;  %6247 = vst [vmem:[%s334_s27 + $0x8] sm:$0xff] %v9038_v7  ;;  %v6236_v33 = vadd.f32 %v6767_v35, %v6206_v28 }
 0x467   : > { %6246 = vst [vmem:[%s334_s27] sm:$0xff] %v9040_v37  ;;  %9049 = vtanh.f32 %v6237_v8 }
 0x468   : > { %9051 = vtanh.f32 %v6236_v33 }
 0x469   : > { %v9042_v57 = vpop.eup %9041 }
 0x46a   : > { %v9044_v4 = vpop.eup %9043  ;;  %6249 = vst [vmem:[%s334_s27 + $0x18] sm:$0xff] %v9042_v57 }
 0x46b   : > { %6248 = vst [vmem:[%s334_s27 + $0x10] sm:$0xff] %v9044_v4 }
 0x46d   : > { %v9046_v60 = vpop.eup %9045 }
 0x46e   : > { %v9048_v15 = vpop.eup %9047  ;;  %6251 = vst [vmem:[%s334_s27 + $0x28] sm:$0xff] %v9046_v60 }
 0x46f   : > { %6250 = vst [vmem:[%s334_s27 + $0x20] sm:$0xff] %v9048_v15 }
 0x471   : > { %v9050_v48 = vpop.eup %9049 }
 0x472   : > { %v9052_v58 = vpop.eup %9051  ;;  %6253 = vst [vmem:[%s334_s27 + $0x38] sm:$0xff] %v9050_v48 }
 0x473   : > { %6252 = vst [vmem:[%s334_s27 + $0x30] sm:$0xff] %v9052_v58 }
 0x474 PF: > { %s19_s30 = sadd.s32 1, %s9063_s30  }
 0x475   : > { %p16_p5 = scmp.ge.s32.totalorder %s19_s30, 5  }
 0x477   :  { %18 = sbr.rel (!%p16_p5) target bundleno = 1 (0x1), region = 101 }

</bundles_post_ra>
